<compile_context>
chip_gen: v5e
topology: v5e:2x2
jax: 0.10.0
libtpu: 0.0.40
codegen_flags: <defaults>
</compile_context>

<pallas_src>
import math

import jax
import jax.numpy as jnp
import numpy as np
from jax.experimental import pallas as pl
from jax.experimental.pallas import tpu as pltpu


# ----------------------------- shared math helpers ---------------------------
def _layernorm(x, gamma, beta, eps=1e-5):
    # torch nn.LayerNorm default eps = 1e-5
    mu = jnp.mean(x, axis=-1, keepdims=True)
    var = jnp.mean(jnp.square(x - mu), axis=-1, keepdims=True)
    return (x - mu) * jax.lax.rsqrt(var + eps) * gamma + beta


def _gelu_tanh(x):
    c = 0.7978845608028654  # sqrt(2/pi)
    return 0.5 * x * (1.0 + jnp.tanh(c * (x + 0.044715 * x * x * x)))


# ------------------------------ chip-aware knobs ------------------------------
def _tensorcores_per_chip():
    """2 on chips whose 'parallel' grid axis spans two TensorCores, else 1."""
    try:
        kind = jax.devices()[0].device_kind.lower()
    except Exception:
        return 1
    return 2 if any(t in kind for t in ("v7", "v4", "v5p")) else 1


def _vmem_limit_bytes(N, D, DFF):
    """Scoped-VMEM request sized to the working set, capped by physical VMEM."""
    w_layer = 2 * (4 * D * D + 2 * D * DFF)        # bf16 weights per layer
    p_layer = 4 * (8 * D + DFF)                    # f32 biases + LN per layer
    acts = 4 * N * (3 * D + DFF + 8 * D)           # f32 intermediates
    carry = 4 * N * D * 4                          # carried out block + x buffers
    need = 2 * 2 * (w_layer + p_layer) + acts + carry   # 2-deep weight buffering
    try:
        phys = int(pltpu.get_tpu_info().vmem_capacity_bytes)
    except Exception:
        phys = 64 * 1024 * 1024                    # assume v7x (smallest) if unknown
    cap = (3 * phys) // 4                          # headroom for Mosaic internals
    want = max(48 * 1024 * 1024, 2 * need)
    return int(max(32 * 1024 * 1024, min(cap, want)))


# --------------------------------- kernel ------------------------------------
def _make_kernel(BC, S, D, H, DFF, has_qkv_bias):
    DK = D // H
    N = BC * S                      # rows folded into the matmul M dimension
    G = BC * H                      # (row, head) batch for the attention einsums
    scale = DK ** -0.5

    def kernel(*refs):
        if has_qkv_bias:
            (x_ref, wqkv_ref, bqkv_ref, wproj_ref, bproj_ref,
             w1_ref, b1_ref, w2_ref, b2_ref, lnp_ref, lnf_ref, o_ref) = refs
        else:
            (x_ref, wqkv_ref, wproj_ref, bproj_ref,
             w1_ref, b1_ref, w2_ref, b2_ref, lnp_ref, lnf_ref, o_ref) = refs
            bqkv_ref = None

        d = pl.program_id(1)
        last = pl.num_programs(1) - 1
        bf16 = jnp.bfloat16

        # Residual stream carried in the output VMEM block across the depth
        # ("arbitrary") grid axis; the HBM input is consumed only at d == 0.
        @pl.when(d == 0)
        def _init():
            o_ref[...] = x_ref[...]

        x = o_ref[...]                       # (N, D) f32 residual stream
        ln = lnp_ref[0]                      # (4, D): [g1, b1, g2, b2]

        # ----------------------------- attention ------------------------------
        h = _layernorm(x, ln[0:1], ln[1:2]).astype(bf16)
        # fused QKV projection: one (N,D)x(D,3D) bf16 MXU matmul, f32 accumulate
        qkv = jnp.dot(h, wqkv_ref[0], preferred_element_type=jnp.float32)
        if has_qkv_bias:
            qkv = qkv + bqkv_ref[0]
        # head split with a single reshape + ONE einshape:
        #   (N, 3D) -> (N, 3H, DK) -> (3H, N, DK) -> (3G, S, DK)
        # leading index = t*G + head*BC + row  (per-row, per-head batch)
        qkv = pltpu.einshape("mgd->gmd", qkv.reshape(N, 3 * H, DK))
        qkv = qkv.reshape(3 * G, S, DK)
        q = (qkv[0 * G:1 * G] * scale).astype(bf16)   # 1/sqrt(dk) folded into q
        k = qkv[1 * G:2 * G].astype(bf16)
        v = qkv[2 * G:3 * G].astype(bf16)

        # per-(row, head) attention over S -> no cross-row mask needed
        s = jnp.einsum("bqd,bkd->bqk", q, k,
                       preferred_element_type=jnp.float32)        # (G, S, S)
        m = jnp.max(s, axis=-1, keepdims=True)
        e = jnp.exp(s - m)
        p = e * pl.reciprocal(jnp.sum(e, axis=-1, keepdims=True), approx=False)
        ctx = jnp.einsum("bqk,bkd->bqd", p.astype(bf16), v,
                         preferred_element_type=jnp.float32)      # (G, S, DK)
        # (G,S,DK) -> (H, N, DK) -> (N, H, DK) -> (N, D)
        ctx = pltpu.einshape("hmd->mhd", ctx.reshape(H, N, DK)).reshape(N, D)

        attn = jnp.dot(ctx.astype(bf16), wproj_ref[0],
                       preferred_element_type=jnp.float32) + bproj_ref[0]
        x = x + attn

        # -------------------------------- MLP ---------------------------------
        h = _layernorm(x, ln[2:3], ln[3:4]).astype(bf16)
        mid = jnp.dot(h, w1_ref[0], preferred_element_type=jnp.float32) + b1_ref[0]
        mid = _gelu_tanh(mid)                 # f32 VPU/EUP math (v5e-safe)
        x = x + jnp.dot(mid.astype(bf16), w2_ref[0],
                        preferred_element_type=jnp.float32) + b2_ref[0]

        # single store per step; the final encoder LayerNorm (self.norm) is
        # applied to the register-resident x on the last depth step.
        @pl.when(d != last)
        def _store():
            o_ref[...] = x

        @pl.when(d == last)
        def _store_final():
            lnf = lnf_ref[...]
            o_ref[...] = _layernorm(x, lnf[0:1], lnf[1:2])

    return kernel


# --------------------------------- wrapper ------------------------------------
def text_encoder_blocks_pallas(x, params, num_heads, *, batch_block=None):
    """TextEncoder_FSM Block stack + final LayerNorm (eval semantics)."""
    B, S, D = x.shape
    depth = params["wqkv"].shape[0]
    DFF = params["w1"].shape[-1]
    assert D % num_heads == 0
    has_qkv_bias = ("bqkv" in params) and (params["bqkv"] is not None)

    # Chip-aware batch chunking: split only when a second TensorCore can
    # consume the "parallel" grid axis; otherwise one chunk (weights streamed
    # from HBM exactly once, maximal MXU M dimension).
    if batch_block is None:
        if _tensorcores_per_chip() >= 2 and B % 2 == 0 and B >= 2:
            batch_block = B // 2
        else:
            batch_block = B
    BC = batch_block
    assert B % BC == 0
    if BC != B and (BC * S) % 8 != 0:      # keep the (8,128)-tiling rule satisfied
        BC = B
    N = BC * S

    kernel = _make_kernel(BC, S, D, num_heads, DFF, has_qkv_bias)

    # bf16 matmul operands (native MXU rate, half the weight DMA bytes);
    # biases / LN params / residual stream stay f32.
    wqkv = params["wqkv"].astype(jnp.bfloat16)
    wproj = params["wproj"].astype(jnp.bfloat16)
    w1 = params["w1"].astype(jnp.bfloat16)
    w2 = params["w2"].astype(jnp.bfloat16)

    x2 = x.reshape(B * S, D)               # flat I/O slab (lane-dense for D=768)

    xmap = lambda b, d: (b, 0)
    wmap = lambda b, d: (d, 0, 0)

    args = [x2, wqkv]
    in_specs = [pl.BlockSpec((N, D), xmap),             # x (consumed at d == 0)
                pl.BlockSpec((1, D, 3 * D), wmap)]      # fused QKV weight (bf16)
    if has_qkv_bias:
        args.append(params["bqkv"])
        in_specs.append(pl.BlockSpec((1, 1, 3 * D), wmap))
    args += [wproj, params["bproj"], w1, params["b1"], w2, params["b2"],
             params["lnp"], params["lnf"]]
    in_specs += [pl.BlockSpec((1, D, D), wmap),          # attn proj weight (bf16)
                 pl.BlockSpec((1, 1, D), wmap),          # proj bias
                 pl.BlockSpec((1, D, DFF), wmap),        # MLP fc1 weight (bf16)
                 pl.BlockSpec((1, 1, DFF), wmap),        # fc1 bias
                 pl.BlockSpec((1, DFF, D), wmap),        # MLP fc2 weight (bf16)
                 pl.BlockSpec((1, 1, D), wmap),          # fc2 bias
                 pl.BlockSpec((1, 4, D), wmap),          # per-block LN [g1,b1,g2,b2]
                 pl.BlockSpec((2, D), lambda b, d: (0, 0))]  # final LN gamma/beta

    grid_spec = pltpu.PrefetchScalarGridSpec(
        num_scalar_prefetch=0,
        grid=(B // BC, depth),
        in_specs=in_specs,
        out_specs=pl.BlockSpec((N, D), xmap),
    )

    # advisory cost hint for the XLA scheduler
    flops = depth * B * S * (8 * D * D + 4 * S * D + 4 * D * DFF)
    transcendentals = depth * B * S * (num_heads * S + DFF + 4)
    bytes_accessed = int(sum(int(a.size) * a.dtype.itemsize for a in args)
                         + B * S * D * 4)

    out = pl.pallas_call(
        kernel,
        out_shape=jax.ShapeDtypeStruct((B * S, D), jnp.float32),
        grid_spec=grid_spec,
        input_output_aliases={0: 0},      # donate x's HBM buffer to the output
        compiler_params=pltpu.CompilerParams(
            dimension_semantics=("parallel", "arbitrary"),
            vmem_limit_bytes=_vmem_limit_bytes(N, D, DFF)),
        cost_estimate=pl.CostEstimate(flops=flops,
                                      transcendentals=transcendentals,
                                      bytes_accessed=bytes_accessed),
    )(*args)
    return out.reshape(B, S, D)


# -------------------- pure-JAX f32 reference (for validation) -----------------
def text_encoder_blocks_ref(x, params, num_heads):
    B, S, D = x.shape
    depth = params["wqkv"].shape[0]
    dk = D // num_heads
    scale = dk ** -0.5
    has_qkv_bias = ("bqkv" in params) and (params["bqkv"] is not None)
    for d in range(depth):
        ln = params["lnp"][d]
        # attention
        h = _layernorm(x, ln[0], ln[1])
        qkv = h @ params["wqkv"][d]
        if has_qkv_bias:
            qkv = qkv + params["bqkv"][d, 0]
        qkv = qkv.reshape(B, S, 3, num_heads, dk).transpose(2, 0, 3, 1, 4)
        q, k, v = qkv[0], qkv[1], qkv[2]
        s = jnp.einsum("bhqd,bhkd->bhqk", q, k) * scale
        p = jax.nn.softmax(s, axis=-1)
        ctx = jnp.einsum("bhqk,bhkd->bhqd", p, v)
        ctx = ctx.transpose(0, 2, 1, 3).reshape(B, S, D)
        x = x + ctx @ params["wproj"][d] + params["bproj"][d, 0]
        # MLP
        h = _layernorm(x, ln[2], ln[3])
        mid = _gelu_tanh(h @ params["w1"][d] + params["b1"][d, 0])
        x = x + mid @ params["w2"][d] + params["b2"][d, 0]
    return _layernorm(x, params["lnf"][0], params["lnf"][1])


# ----------------------------------- main --------------------------------------
if __name__ == "__main__":
    # Small shapes consistent with the module: embed_dim -> 32, heads -> 4,
    # mlp_ratio = 4.0, 2 Blocks, 7 tokens + 1 task-embedding token.
    B, S_TOK, D, H, DEPTH = 4, 7, 32, 4, 2
    DFF = int(4.0 * D)
    S = S_TOK + 1

    key = jax.random.PRNGKey(0)
    ks = jax.random.split(key, 16)

    def xavier(k, shape, fan_in, fan_out):
        bound = math.sqrt(6.0 / (fan_in + fan_out))
        return jax.random.uniform(k, shape, jnp.float32, -bound, bound)

    params = {
        "wqkv": xavier(ks[0], (DEPTH, D, 3 * D), D, 3 * D),
        # qkv_bias=False in the module -> no "bqkv" entry (statically removed)
        "wproj": xavier(ks[1], (DEPTH, D, D), D, D),
        "bproj": 0.02 * jax.random.normal(ks[2], (DEPTH, 1, D), jnp.float32),
        "w1": xavier(ks[3], (DEPTH, D, DFF), D, DFF),
        "b1": 0.02 * jax.random.normal(ks[4], (DEPTH, 1, DFF), jnp.float32),
        "w2": xavier(ks[5], (DEPTH, DFF, D), DFF, D),
        "b2": 0.02 * jax.random.normal(ks[6], (DEPTH, 1, D), jnp.float32),
        "lnp": jnp.concatenate(
            [1.0 + 0.05 * jax.random.normal(ks[7], (DEPTH, 1, D), jnp.float32),
             0.02 * jax.random.normal(ks[8], (DEPTH, 1, D), jnp.float32),
             1.0 + 0.05 * jax.random.normal(ks[9], (DEPTH, 1, D), jnp.float32),
             0.02 * jax.random.normal(ks[10], (DEPTH, 1, D), jnp.float32)],
            axis=1),                                          # (DEPTH, 4, D)
        "lnf": jnp.stack(
            [1.0 + 0.05 * jax.random.normal(ks[11], (D,), jnp.float32),
             0.02 * jax.random.normal(ks[12], (D,), jnp.float32)]),  # (2, D)
    }

    # Stand-in for BERT embedding output + task-token concat (as in forward()).
    x_embed = jax.random.normal(ks[13], (B, S_TOK, D), jnp.float32)
    task_tok = 0.02 * jax.random.normal(ks[14], (1, 1, D), jnp.float32)
    x = jnp.concatenate([x_embed, jnp.broadcast_to(task_tok, (B, 1, D))], axis=1)

    out = text_encoder_blocks_pallas(x, params, num_heads=H)
    out = jax.block_until_ready(out)

    ref = text_encoder_blocks_ref(x, params, num_heads=H)
    # bf16 MXU operands (f32 accumulation) -> looser tolerance than pure f32.
    np.testing.assert_allclose(np.asarray(out), np.asarray(ref),
                               rtol=5e-2, atol=5e-2)
    print("KERNEL_OK")
</pallas_src>

<mosaic_0001>
module attributes {stable_mosaic.version = 11 : i64} {
  func.func @kernel(%arg0: i32, %arg1: i32, %arg2: memref<32x32xf32, #tpu.memory_space<vmem>>, %arg3: memref<1x32x96xbf16, #tpu.memory_space<vmem>>, %arg4: memref<1x32x32xbf16, #tpu.memory_space<vmem>>, %arg5: memref<1x1x32xf32, #tpu.memory_space<vmem>>, %arg6: memref<1x32x128xbf16, #tpu.memory_space<vmem>>, %arg7: memref<1x1x128xf32, #tpu.memory_space<vmem>>, %arg8: memref<1x128x32xbf16, #tpu.memory_space<vmem>>, %arg9: memref<1x1x32xf32, #tpu.memory_space<vmem>>, %arg10: memref<1x4x32xf32, #tpu.memory_space<vmem>>, %arg11: memref<2x32xf32, #tpu.memory_space<vmem>>, %arg12: memref<32x32xf32, #tpu.memory_space<vmem>>) attributes {dimension_semantics = [#tpu.dimension_semantics<parallel>, #tpu.dimension_semantics<arbitrary>], iteration_bounds = array<i64: 1, 2>, scalar_prefetch = 0 : i64, scratch_operands = 0 : i64, tpu.core_type = #tpu.core_type<tc>, window_params = [{transform_indices = @transform_0, window_bounds = array<i64: 32, 32>}, {transform_indices = @transform_1, window_bounds = array<i64: 1, 32, 96>}, {transform_indices = @transform_2, window_bounds = array<i64: 1, 32, 32>}, {transform_indices = @transform_3, window_bounds = array<i64: 1, 1, 32>}, {transform_indices = @transform_4, window_bounds = array<i64: 1, 32, 128>}, {transform_indices = @transform_5, window_bounds = array<i64: 1, 1, 128>}, {transform_indices = @transform_6, window_bounds = array<i64: 1, 128, 32>}, {transform_indices = @transform_7, window_bounds = array<i64: 1, 1, 32>}, {transform_indices = @transform_8, window_bounds = array<i64: 1, 4, 32>}, {pipeline_mode = #tpu.pipeline_mode<synchronous>, transform_indices = @transform_9, window_bounds = array<i64: 2, 32>}, {transform_indices = @transform_10, window_bounds = array<i64: 32, 32>}]} {
    %c0_i32 = arith.constant 0 : i32
    %0 = arith.cmpi eq, %arg1, %c0_i32 : i32
    %1 = arith.extui %0 : i1 to i32
    %c0_i32_0 = arith.constant 0 : i32
    %2 = arith.cmpi ne, %1, %c0_i32_0 : i32
    scf.if %2 {
      %c0_51 = arith.constant 0 : index
      %c0_52 = arith.constant 0 : index
      %130 = vector.load %arg2[%c0_51, %c0_52] : memref<32x32xf32, #tpu.memory_space<vmem>>, vector<32x32xf32>
      %c0_53 = arith.constant 0 : index
      %c0_54 = arith.constant 0 : index
      %131 = vector.load %arg12[%c0_53, %c0_54] : memref<32x32xf32, #tpu.memory_space<vmem>>, vector<32x32xf32>
      tpu.vector_store %arg12[%c0_53, %c0_54], %130 {strides = array<i32>} : memref<32x32xf32, #tpu.memory_space<vmem>>, vector<32x32xf32>,
    } else {
    }
    %c0 = arith.constant 0 : index
    %c0_1 = arith.constant 0 : index
    %3 = vector.load %arg12[%c0, %c0_1] : memref<32x32xf32, #tpu.memory_space<vmem>>, vector<32x32xf32>
    %c0_2 = arith.constant 0 : index
    %c0_3 = arith.constant 0 : index
    %c0_4 = arith.constant 0 : index
    %4 = vector.load %arg10[%c0_2, %c0_3, %c0_4] : memref<1x4x32xf32, #tpu.memory_space<vmem>>, vector<1x4x32xf32>
    %5 = vector.shape_cast %4 : vector<1x4x32xf32> to vector<4x32xf32>
    %6 = vector.extract_strided_slice %5 {offsets = [0, 0], sizes = [1, 32], strides = [1, 1]} : vector<4x32xf32> to vector<1x32xf32>
    %7 = vector.extract_strided_slice %5 {offsets = [1, 0], sizes = [1, 32], strides = [1, 1]} : vector<4x32xf32> to vector<1x32xf32>
    %cst = arith.constant dense<0.000000e+00> : vector<32xf32>
    %8 = vector.multi_reduction <add>, %3, %cst [1] : vector<32x32xf32> to vector<32xf32>
    %9 = vector.shape_cast %8 : vector<32xf32> to vector<32x1xf32>
    %cst_5 = arith.constant 3.200000e+01 : f32
    %10 = vector.broadcast %cst_5 : f32 to vector<32x1xf32>
    %11 = arith.divf %9, %10 : vector<32x1xf32>
    %12 = vector.broadcast %11 : vector<32x1xf32> to vector<32x32xf32>
    %13 = arith.subf %3, %12 : vector<32x32xf32>
    %14 = arith.mulf %13, %13 : vector<32x32xf32>
    %cst_6 = arith.constant dense<0.000000e+00> : vector<32xf32>
    %15 = vector.multi_reduction <add>, %14, %cst_6 [1] : vector<32x32xf32> to vector<32xf32>
    %16 = vector.shape_cast %15 : vector<32xf32> to vector<32x1xf32>
    %cst_7 = arith.constant 3.200000e+01 : f32
    %17 = vector.broadcast %cst_7 : f32 to vector<32x1xf32>
    %18 = arith.divf %16, %17 : vector<32x1xf32>
    %19 = vector.broadcast %11 : vector<32x1xf32> to vector<32x32xf32>
    %20 = arith.subf %3, %19 : vector<32x32xf32>
    %cst_8 = arith.constant 9.99999974E-6 : f32
    %21 = vector.broadcast %cst_8 : f32 to vector<32x1xf32>
    %22 = arith.addf %18, %21 : vector<32x1xf32>
    %23 = math.rsqrt %22 : vector<32x1xf32>
    %24 = vector.broadcast %23 : vector<32x1xf32> to vector<32x32xf32>
    %25 = arith.mulf %20, %24 : vector<32x32xf32>
    %26 = vector.broadcast %6 : vector<1x32xf32> to vector<32x32xf32>
    %27 = arith.mulf %25, %26 : vector<32x32xf32>
    %28 = vector.broadcast %7 : vector<1x32xf32> to vector<32x32xf32>
    %29 = arith.addf %27, %28 : vector<32x32xf32>
    %30 = arith.truncf %29 : vector<32x32xf32> to vector<32x32xbf16>
    %c0_9 = arith.constant 0 : index
    %c0_10 = arith.constant 0 : index
    %c0_11 = arith.constant 0 : index
    %31 = vector.load %arg3[%c0_9, %c0_10, %c0_11] : memref<1x32x96xbf16, #tpu.memory_space<vmem>>, vector<1x32x96xbf16>
    %32 = vector.shape_cast %31 : vector<1x32x96xbf16> to vector<32x96xbf16>
    %cst_12 = arith.constant dense<0.000000e+00> : vector<32x96xf32>
    %33 = tpu.matmul %30, %32, %cst_12 {dimension_numbers = #tpu.dot_dimension_numbers<[1], [0], [0], [1], [0, 0, 1, 1], [], []>} : vector<32x32xbf16>, vector<32x96xbf16>, vector<32x96xf32> -> vector<32x96xf32>
    %34 = vector.shape_cast %33 : vector<32x96xf32> to vector<32x12x8xf32>
    %35 = tpu.transpose %34, [1, 0, 2] : vector<32x12x8xf32> -> vector<12x32x8xf32>
    %36 = vector.shape_cast %35 : vector<12x32x8xf32> to vector<48x8x8xf32>
    %37 = vector.extract_strided_slice %36 {offsets = [0, 0, 0], sizes = [16, 8, 8], strides = [1, 1, 1]} : vector<48x8x8xf32> to vector<16x8x8xf32>
    %cst_13 = arith.constant 0.353553385 : f32
    %38 = vector.broadcast %cst_13 : f32 to vector<16x8x8xf32>
    %39 = arith.mulf %37, %38 : vector<16x8x8xf32>
    %40 = arith.truncf %39 : vector<16x8x8xf32> to vector<16x8x8xbf16>
    %41 = vector.extract_strided_slice %36 {offsets = [16, 0, 0], sizes = [16, 8, 8], strides = [1, 1, 1]} : vector<48x8x8xf32> to vector<16x8x8xf32>
    %42 = arith.truncf %41 : vector<16x8x8xf32> to vector<16x8x8xbf16>
    %43 = vector.extract_strided_slice %36 {offsets = [32, 0, 0], sizes = [16, 8, 8], strides = [1, 1, 1]} : vector<48x8x8xf32> to vector<16x8x8xf32>
    %44 = arith.truncf %43 : vector<16x8x8xf32> to vector<16x8x8xbf16>
    "tpu.trace_start"() <{level = 10 : i32, message = "bqd,bkd->bqk"}> : () -> ()
    %cst_14 = arith.constant dense<0.000000e+00> : vector<16x8x8xf32>
    %45 = tpu.matmul %40, %42, %cst_14 {dimension_numbers = #tpu.dot_dimension_numbers<[2], [2], [1], [1], [0, 0, 0, 1, 1, 1], [0], [0]>} : vector<16x8x8xbf16>, vector<16x8x8xbf16>, vector<16x8x8xf32> -> vector<16x8x8xf32>
    "tpu.trace_stop"() : () -> ()
    %cst_15 = arith.constant dense<0xFF800000> : vector<16x8xf32>
    %46 = vector.multi_reduction <maximumf>, %45, %cst_15 [2] : vector<16x8x8xf32> to vector<16x8xf32>
    %47 = vector.shape_cast %46 : vector<16x8xf32> to vector<16x8x1xf32>
    %48 = vector.broadcast %47 : vector<16x8x1xf32> to vector<16x8x8xf32>
    %49 = arith.subf %45, %48 : vector<16x8x8xf32>
    %50 = math.exp %49 : vector<16x8x8xf32>
    %cst_16 = arith.constant dense<0.000000e+00> : vector<16x8xf32>
    %51 = vector.multi_reduction <add>, %50, %cst_16 [2] : vector<16x8x8xf32> to vector<16x8xf32>
    %52 = vector.shape_cast %51 : vector<16x8xf32> to vector<16x8x1xf32>
    %53 = tpu.reciprocal %52 : vector<16x8x1xf32> -> vector<16x8x1xf32>
    %54 = vector.broadcast %53 : vector<16x8x1xf32> to vector<16x8x8xf32>
    %55 = arith.mulf %50, %54 : vector<16x8x8xf32>
    %56 = arith.truncf %55 : vector<16x8x8xf32> to vector<16x8x8xbf16>
    "tpu.trace_start"() <{level = 10 : i32, message = "bqk,bkd->bqd"}> : () -> ()
    %cst_17 = arith.constant dense<0.000000e+00> : vector<16x8x8xf32>
    %57 = tpu.matmul %56, %44, %cst_17 {dimension_numbers = #tpu.dot_dimension_numbers<[2], [1], [1], [2], [0, 0, 0, 1, 1, 2], [0], [0]>} : vector<16x8x8xbf16>, vector<16x8x8xbf16>, vector<16x8x8xf32> -> vector<16x8x8xf32>
    "tpu.trace_stop"() : () -> ()
    %58 = vector.shape_cast %57 : vector<16x8x8xf32> to vector<4x32x8xf32>
    %59 = tpu.transpose %58, [1, 0, 2] : vector<4x32x8xf32> -> vector<32x4x8xf32>
    %60 = vector.shape_cast %59 : vector<32x4x8xf32> to vector<32x32xf32>
    %61 = arith.truncf %60 : vector<32x32xf32> to vector<32x32xbf16>
    %c0_18 = arith.constant 0 : index
    %c0_19 = arith.constant 0 : index
    %c0_20 = arith.constant 0 : index
    %62 = vector.load %arg4[%c0_18, %c0_19, %c0_20] : memref<1x32x32xbf16, #tpu.memory_space<vmem>>, vector<1x32x32xbf16>
    %63 = vector.shape_cast %62 : vector<1x32x32xbf16> to vector<32x32xbf16>
    %cst_21 = arith.constant dense<0.000000e+00> : vector<32x32xf32>
    %64 = tpu.matmul %61, %63, %cst_21 {dimension_numbers = #tpu.dot_dimension_numbers<[1], [0], [0], [1], [0, 0, 1, 1], [], []>} : vector<32x32xbf16>, vector<32x32xbf16>, vector<32x32xf32> -> vector<32x32xf32>
    %c0_22 = arith.constant 0 : index
    %c0_23 = arith.constant 0 : index
    %c0_24 = arith.constant 0 : index
    %65 = vector.load %arg5[%c0_22, %c0_23, %c0_24] : memref<1x1x32xf32, #tpu.memory_space<vmem>>, vector<1x1x32xf32>
    %66 = vector.shape_cast %65 : vector<1x1x32xf32> to vector<1x32xf32>
    %67 = vector.broadcast %66 : vector<1x32xf32> to vector<32x32xf32>
    %68 = arith.addf %64, %67 : vector<32x32xf32>
    %69 = arith.addf %3, %68 : vector<32x32xf32>
    %70 = vector.extract_strided_slice %5 {offsets = [2, 0], sizes = [1, 32], strides = [1, 1]} : vector<4x32xf32> to vector<1x32xf32>
    %71 = vector.extract_strided_slice %5 {offsets = [3, 0], sizes = [1, 32], strides = [1, 1]} : vector<4x32xf32> to vector<1x32xf32>
    %cst_25 = arith.constant dense<0.000000e+00> : vector<32xf32>
    %72 = vector.multi_reduction <add>, %69, %cst_25 [1] : vector<32x32xf32> to vector<32xf32>
    %73 = vector.shape_cast %72 : vector<32xf32> to vector<32x1xf32>
    %cst_26 = arith.constant 3.200000e+01 : f32
    %74 = vector.broadcast %cst_26 : f32 to vector<32x1xf32>
    %75 = arith.divf %73, %74 : vector<32x1xf32>
    %76 = vector.broadcast %75 : vector<32x1xf32> to vector<32x32xf32>
    %77 = arith.subf %69, %76 : vector<32x32xf32>
    %78 = arith.mulf %77, %77 : vector<32x32xf32>
    %cst_27 = arith.constant dense<0.000000e+00> : vector<32xf32>
    %79 = vector.multi_reduction <add>, %78, %cst_27 [1] : vector<32x32xf32> to vector<32xf32>
    %80 = vector.shape_cast %79 : vector<32xf32> to vector<32x1xf32>
    %cst_28 = arith.constant 3.200000e+01 : f32
    %81 = vector.broadcast %cst_28 : f32 to vector<32x1xf32>
    %82 = arith.divf %80, %81 : vector<32x1xf32>
    %83 = vector.broadcast %75 : vector<32x1xf32> to vector<32x32xf32>
    %84 = arith.subf %69, %83 : vector<32x32xf32>
    %cst_29 = arith.constant 9.99999974E-6 : f32
    %85 = vector.broadcast %cst_29 : f32 to vector<32x1xf32>
    %86 = arith.addf %82, %85 : vector<32x1xf32>
    %87 = math.rsqrt %86 : vector<32x1xf32>
    %88 = vector.broadcast %87 : vector<32x1xf32> to vector<32x32xf32>
    %89 = arith.mulf %84, %88 : vector<32x32xf32>
    %90 = vector.broadcast %70 : vector<1x32xf32> to vector<32x32xf32>
    %91 = arith.mulf %89, %90 : vector<32x32xf32>
    %92 = vector.broadcast %71 : vector<1x32xf32> to vector<32x32xf32>
    %93 = arith.addf %91, %92 : vector<32x32xf32>
    %94 = arith.truncf %93 : vector<32x32xf32> to vector<32x32xbf16>
    %c0_30 = arith.constant 0 : index
    %c0_31 = arith.constant 0 : index
    %c0_32 = arith.constant 0 : index
    %95 = vector.load %arg6[%c0_30, %c0_31, %c0_32] : memref<1x32x128xbf16, #tpu.memory_space<vmem>>, vector<1x32x128xbf16>
    %96 = vector.shape_cast %95 : vector<1x32x128xbf16> to vector<32x128xbf16>
    %cst_33 = arith.constant dense<0.000000e+00> : vector<32x128xf32>
    %97 = tpu.matmul %94, %96, %cst_33 {dimension_numbers = #tpu.dot_dimension_numbers<[1], [0], [0], [1], [0, 0, 1, 1], [], []>} : vector<32x32xbf16>, vector<32x128xbf16>, vector<32x128xf32> -> vector<32x128xf32>
    %c0_34 = arith.constant 0 : index
    %c0_35 = arith.constant 0 : index
    %c0_36 = arith.constant 0 : index
    %98 = vector.load %arg7[%c0_34, %c0_35, %c0_36] : memref<1x1x128xf32, #tpu.memory_space<vmem>>, vector<1x1x128xf32>
    %99 = vector.shape_cast %98 : vector<1x1x128xf32> to vector<1x128xf32>
    %100 = vector.broadcast %99 : vector<1x128xf32> to vector<32x128xf32>
    %101 = arith.addf %97, %100 : vector<32x128xf32>
    %cst_37 = arith.constant 5.000000e-01 : f32
    %102 = vector.broadcast %cst_37 : f32 to vector<32x128xf32>
    %103 = arith.mulf %102, %101 : vector<32x128xf32>
    %cst_38 = arith.constant 4.471500e-02 : f32
    %104 = vector.broadcast %cst_38 : f32 to vector<32x128xf32>
    %105 = arith.mulf %104, %101 : vector<32x128xf32>
    %106 = arith.mulf %105, %101 : vector<32x128xf32>
    %107 = arith.mulf %106, %101 : vector<32x128xf32>
    %108 = arith.addf %101, %107 : vector<32x128xf32>
    %cst_39 = arith.constant 0.797884583 : f32
    %109 = vector.broadcast %cst_39 : f32 to vector<32x128xf32>
    %110 = arith.mulf %109, %108 : vector<32x128xf32>
    %111 = math.tanh %110 : vector<32x128xf32>
    %cst_40 = arith.constant 1.000000e+00 : f32
    %112 = vector.broadcast %cst_40 : f32 to vector<32x128xf32>
    %113 = arith.addf %112, %111 : vector<32x128xf32>
    %114 = arith.mulf %103, %113 : vector<32x128xf32>
    %115 = arith.truncf %114 : vector<32x128xf32> to vector<32x128xbf16>
    %c0_41 = arith.constant 0 : index
    %c0_42 = arith.constant 0 : index
    %c0_43 = arith.constant 0 : index
    %116 = vector.load %arg8[%c0_41, %c0_42, %c0_43] : memref<1x128x32xbf16, #tpu.memory_space<vmem>>, vector<1x128x32xbf16>
    %117 = vector.shape_cast %116 : vector<1x128x32xbf16> to vector<128x32xbf16>
    %cst_44 = arith.constant dense<0.000000e+00> : vector<32x32xf32>
    %118 = tpu.matmul %115, %117, %cst_44 {dimension_numbers = #tpu.dot_dimension_numbers<[1], [0], [0], [1], [0, 0, 1, 1], [], []>} : vector<32x128xbf16>, vector<128x32xbf16>, vector<32x32xf32> -> vector<32x32xf32>
    %119 = arith.addf %69, %118 : vector<32x32xf32>
    %c0_45 = arith.constant 0 : index
    %c0_46 = arith.constant 0 : index
    %c0_47 = arith.constant 0 : index
    %120 = vector.load %arg9[%c0_45, %c0_46, %c0_47] : memref<1x1x32xf32, #tpu.memory_space<vmem>>, vector<1x1x32xf32>
    %121 = vector.shape_cast %120 : vector<1x1x32xf32> to vector<1x32xf32>
    %122 = vector.broadcast %121 : vector<1x32xf32> to vector<32x32xf32>
    %123 = arith.addf %119, %122 : vector<32x32xf32>
    %c1_i32 = arith.constant 1 : i32
    %124 = arith.cmpi ne, %arg1, %c1_i32 : i32
    %125 = arith.extui %124 : i1 to i32
    %c0_i32_48 = arith.constant 0 : i32
    %126 = arith.cmpi ne, %125, %c0_i32_48 : i32
    scf.if %126 {
      %c0_51 = arith.constant 0 : index
      %c0_52 = arith.constant 0 : index
      %130 = vector.load %arg12[%c0_51, %c0_52] : memref<32x32xf32, #tpu.memory_space<vmem>>, vector<32x32xf32>
      tpu.vector_store %arg12[%c0_51, %c0_52], %123 {strides = array<i32>} : memref<32x32xf32, #tpu.memory_space<vmem>>, vector<32x32xf32>,
    } else {
    }
    %c1_i32_49 = arith.constant 1 : i32
    %127 = arith.cmpi eq, %arg1, %c1_i32_49 : i32
    %128 = arith.extui %127 : i1 to i32
    %c0_i32_50 = arith.constant 0 : i32
    %129 = arith.cmpi ne, %128, %c0_i32_50 : i32
    scf.if %129 {
      %c0_51 = arith.constant 0 : index
      %c0_52 = arith.constant 0 : index
      %130 = vector.load %arg11[%c0_51, %c0_52] : memref<2x32xf32, #tpu.memory_space<vmem>>, vector<2x32xf32>
      %131 = vector.extract_strided_slice %130 {offsets = [0, 0], sizes = [1, 32], strides = [1, 1]} : vector<2x32xf32> to vector<1x32xf32>
      %132 = vector.extract_strided_slice %130 {offsets = [1, 0], sizes = [1, 32], strides = [1, 1]} : vector<2x32xf32> to vector<1x32xf32>
      %cst_53 = arith.constant dense<0.000000e+00> : vector<32xf32>
      %133 = vector.multi_reduction <add>, %123, %cst_53 [1] : vector<32x32xf32> to vector<32xf32>
      %134 = vector.shape_cast %133 : vector<32xf32> to vector<32x1xf32>
      %cst_54 = arith.constant 3.200000e+01 : f32
      %135 = vector.broadcast %cst_54 : f32 to vector<32x1xf32>
      %136 = arith.divf %134, %135 : vector<32x1xf32>
      %137 = vector.broadcast %136 : vector<32x1xf32> to vector<32x32xf32>
      %138 = arith.subf %123, %137 : vector<32x32xf32>
      %139 = arith.mulf %138, %138 : vector<32x32xf32>
      %cst_55 = arith.constant dense<0.000000e+00> : vector<32xf32>
      %140 = vector.multi_reduction <add>, %139, %cst_55 [1] : vector<32x32xf32> to vector<32xf32>
      %141 = vector.shape_cast %140 : vector<32xf32> to vector<32x1xf32>
      %cst_56 = arith.constant 3.200000e+01 : f32
      %142 = vector.broadcast %cst_56 : f32 to vector<32x1xf32>
      %143 = arith.divf %141, %142 : vector<32x1xf32>
      %144 = vector.broadcast %136 : vector<32x1xf32> to vector<32x32xf32>
      %145 = arith.subf %123, %144 : vector<32x32xf32>
      %cst_57 = arith.constant 9.99999974E-6 : f32
      %146 = vector.broadcast %cst_57 : f32 to vector<32x1xf32>
      %147 = arith.addf %143, %146 : vector<32x1xf32>
      %148 = math.rsqrt %147 : vector<32x1xf32>
      %149 = vector.broadcast %148 : vector<32x1xf32> to vector<32x32xf32>
      %150 = arith.mulf %145, %149 : vector<32x32xf32>
      %151 = vector.broadcast %131 : vector<1x32xf32> to vector<32x32xf32>
      %152 = arith.mulf %150, %151 : vector<32x32xf32>
      %153 = vector.broadcast %132 : vector<1x32xf32> to vector<32x32xf32>
      %154 = arith.addf %152, %153 : vector<32x32xf32>
      %c0_58 = arith.constant 0 : index
      %c0_59 = arith.constant 0 : index
      %155 = vector.load %arg12[%c0_58, %c0_59] : memref<32x32xf32, #tpu.memory_space<vmem>>, vector<32x32xf32>
      tpu.vector_store %arg12[%c0_58, %c0_59], %154 {strides = array<i32>} : memref<32x32xf32, #tpu.memory_space<vmem>>, vector<32x32xf32>,
    } else {
    }
    return
  }
  func.func @transform_0(%arg0: i32, %arg1: i32) -> (i32, i32) {
    %c0_i32 = arith.constant 0 : i32
    %c0_i32_0 = arith.constant 0 : i32
    return %arg0, %c0_i32 : i32, i32
  }
  func.func @transform_1(%arg0: i32, %arg1: i32) -> (i32, i32, i32) {
    %c0_i32 = arith.constant 0 : i32
    %c0_i32_0 = arith.constant 0 : i32
    %c0_i32_1 = arith.constant 0 : i32
    return %arg1, %c0_i32, %c0_i32_0 : i32, i32, i32
  }
  func.func @transform_2(%arg0: i32, %arg1: i32) -> (i32, i32, i32) {
    %c0_i32 = arith.constant 0 : i32
    %c0_i32_0 = arith.constant 0 : i32
    %c0_i32_1 = arith.constant 0 : i32
    return %arg1, %c0_i32, %c0_i32_0 : i32, i32, i32
  }
  func.func @transform_3(%arg0: i32, %arg1: i32) -> (i32, i32, i32) {
    %c0_i32 = arith.constant 0 : i32
    %c0_i32_0 = arith.constant 0 : i32
    %c0_i32_1 = arith.constant 0 : i32
    return %arg1, %c0_i32, %c0_i32_0 : i32, i32, i32
  }
  func.func @transform_4(%arg0: i32, %arg1: i32) -> (i32, i32, i32) {
    %c0_i32 = arith.constant 0 : i32
    %c0_i32_0 = arith.constant 0 : i32
    %c0_i32_1 = arith.constant 0 : i32
    return %arg1, %c0_i32, %c0_i32_0 : i32, i32, i32
  }
  func.func @transform_5(%arg0: i32, %arg1: i32) -> (i32, i32, i32) {
    %c0_i32 = arith.constant 0 : i32
    %c0_i32_0 = arith.constant 0 : i32
    %c0_i32_1 = arith.constant 0 : i32
    return %arg1, %c0_i32, %c0_i32_0 : i32, i32, i32
  }
  func.func @transform_6(%arg0: i32, %arg1: i32) -> (i32, i32, i32) {
    %c0_i32 = arith.constant 0 : i32
    %c0_i32_0 = arith.constant 0 : i32
    %c0_i32_1 = arith.constant 0 : i32
    return %arg1, %c0_i32, %c0_i32_0 : i32, i32, i32
  }
  func.func @transform_7(%arg0: i32, %arg1: i32) -> (i32, i32, i32) {
    %c0_i32 = arith.constant 0 : i32
    %c0_i32_0 = arith.constant 0 : i32
    %c0_i32_1 = arith.constant 0 : i32
    return %arg1, %c0_i32, %c0_i32_0 : i32, i32, i32
  }
  func.func @transform_8(%arg0: i32, %arg1: i32) -> (i32, i32, i32) {
    %c0_i32 = arith.constant 0 : i32
    %c0_i32_0 = arith.constant 0 : i32
    %c0_i32_1 = arith.constant 0 : i32
    return %arg1, %c0_i32, %c0_i32_0 : i32, i32, i32
  }
  func.func @transform_9(%arg0: i32, %arg1: i32) -> (i32, i32) {
    %c0_i32 = arith.constant 0 : i32
    %c0_i32_0 = arith.constant 0 : i32
    %c0_i32_1 = arith.constant 0 : i32
    return %c0_i32, %c0_i32_0 : i32, i32
  }
  func.func @transform_10(%arg0: i32, %arg1: i32) -> (i32, i32) {
    %c0_i32 = arith.constant 0 : i32
    %c0_i32_0 = arith.constant 0 : i32
    return %arg0, %c0_i32 : i32, i32
  }
}

</mosaic_0001>

<bundles_post_ra>
// kernel: tpu_custom_call.1
= control target key start
LH: loop header
LB: loop body
LE: loop exit
PB: predicated region body
PF: predicated region fallthrough
CT: control target
= control target key end

     0   :  { %s6830_s0 = inlined_call_operand.hbm [shape: f32[32,32], index: 0, kind: input, shape index: {}, may-alias: {0,10}]   ;;  %s6831_s1 = inlined_call_operand.vmem [shape: bf16[2,32,96], index: 1, kind: input, shape index: {}]   ;;  %s6832_s2 = inlined_call_operand.vmem [shape: bf16[2,32,32], index: 2, kind: input, shape index: {}]   ;;  %s6833_s3 = inlined_call_operand.vmem [shape: f32[2,1,32], index: 3, kind: input, shape index: {}]   ;;  %s6834_s4 = inlined_call_operand.vmem [shape: bf16[2,32,128], index: 4, kind: input, shape index: {}]   ;;  %s6835_s5 = inlined_call_operand.vmem [shape: f32[2,1,128], index: 5, kind: input, shape index: {}]   ;;  %s6836_s6 = inlined_call_operand.vmem [shape: bf16[2,128,32], index: 6, kind: input, shape index: {}]   ;;  %s6837_s7 = inlined_call_operand.vmem [shape: f32[2,1,32], index: 7, kind: input, shape index: {}]   ;;  %s6838_s8 = inlined_call_operand.vmem [shape: f32[2,4,32], index: 8, kind: input, shape index: {}]   ;;  %s6839_s9 = inlined_call_operand.vmem [shape: f32[2,32], index: 9, kind: input, shape index: {}]   ;;  %s6840_s10 = inlined_call_operand.hbm [shape: f32[32,32], index: 10, kind: output, shape index: {}, may-alias: {0,10}]  }
   0x1   :  { %6854 = sst [smem:[#allocation16_spill]] %s6830_s0 }
   0x2   :  { %6855 = sst [smem:[#allocation17_spill]] %s6831_s1 }
   0x3   :  { %6856 = sst [smem:[#allocation18_spill]] %s6832_s2 }
   0x4   :  { %15 = vsyncpa [#allocation3], 0 }
   0x5   :  { %16 = vsyncpa [#allocation4], 0  ;;  %s4862_s13 = smov 0   ;;  %s4864_s14 = smov 0  }
   0x6   :  { %s4866_s15 = smov 0  }
   0x7 LB: > { %s6841_s16 = sadd.s32 4294967295, %s4783_s15   ;;  %s31_s17 = sadd.s32 1, %s4779_s14  ;;  %s4783_s15 = sphi %s4866_s15, %s22_s15   ;;  %s4779_s14 = sphi %s4864_s14, %s6915_s14   ;;  %s4775_s13 = sphi %s4862_s13, %s6914_s13  }
   0x8   : > { %p32_p0 = scmp.ge.s32.totalorder %s31_s17, 2  ;;  %p4324_p1 = scmp.ge.s32.totalorder %s4783_s15, 1 }
   0x9   : > { %p320_p2 = scmp.lt.s32.totalorder %s4783_s15, 3  ;;  %p4469_p4 = scmp.eq.s32.totalorder %s6841_s16, 0 }
   0xa   : > { %s6917_s17 = smov (%p32_p0, %s31_s17), 0  ;;  %s6858_s0 = sld [smem:[#allocation16_spill]] }
   0xb   : > { %6857 = sst [smem:[#allocation8_spill]] %s6917_s17  ;;  %p321_p3 = pnand %p4324_p1, %p320_p2 }
   0xc   : > { %s4785_s21 = smov [#allocation2]   ;;  %s4786_s23 = smov 128  }
   0xd   : > { %p4465_p5 = pneg %p321_p3  ;;  %s336_s22 = sshll.u32 %s4785_s21, 4  ;;  %s337_s22 = int_to_ptr.vmem [resolvable:$true] %s336_s22 }
   0xe   : > { %s4787_s24 = smov 8   ;;  %412 = sbr.rel (%p321_p3) target bundleno = 2597 (0xa25), region = 60 }
   0xf   : > { %p4466_p6 = pnand %p4469_p4, %p4465_p5 }
  0x10   : > { %s334_s20 = sshll.u32 %s6858_s0, 4  ;;  %s335_s20 = int_to_ptr.hbm [resolvable:$true] %s334_s20 }
  0x11   : > { %4468 = dma.hbm_to_vmem [thread:$0]  (!%p4466_p6), %s335_s20, 512, %s337_s22, [#allocation3], %s4786_s23, %s4786_s23, %s4787_s24  }
  0x13   : > { %4766 = dma.done.wait (%p4469_p4), [#allocation3], 512  }
  0x14   : > { %4768 = vsyncadd (%p4469_p4), [#allocation3], 4294966784  ;;  %p475_p7 = scmp.lt.s32.totalorder %s4775_s13, 1  ;;  %s6859_s1 = sld [smem:[#allocation17_spill]] }
  0x15   : > { %s6860_s2 = sld [smem:[#allocation18_spill]]  ;;  %p4338_p8 = scmp.ne.s32.totalorder %s4775_s13, 0 }
  0x16   : > { %s4890_s25 = scalar_select %p475_p7, %s4775_s13, 1 }
  0x18   : > { %s4439_s26 = sshll.u32 %s4890_s25, 4  ;;  %s495_s27 = scalar_lea.vmem %s6835_s5, %s4890_s25 }
  0x19   : > { %s4910_s23 = scalar_lea.vmem %s6834_s4, %s4439_s26  ;;  %s4442_s28 = sshll.u32 %s4890_s25, 6 }
  0x1a   : > { %s4900_s12 = scalar_lea.vmem %s6859_s1, %s4439_s26  ;;  %s503_s30 = scalar_lea.vmem %s6837_s7, %s4890_s25 }
  0x1b   : > { %s4905_s20 = scalar_lea.vmem %s6860_s2, %s4439_s26  ;;  %s4924_s18 = scalar_lea.vmem %s6836_s6, %s4442_s28 }
  0x1c   : > { %s4337_s19 = sshll.u32 %s4890_s25, 2  ;;  %513 = sbr.rel (%p4338_p8) target bundleno = 38 (0x26), region = 68 }
  0x1d   : > { %s4930_s26 = scalar_lea.vmem %s6838_s8, %s4337_s19 }
  0x21   : > { %v514_v0 = vld [vmem:[#allocation2] sm:$0xff]  ;;  %vm518_vm0 = vcmask 261120   ;;  %v515_v1 = vld [vmem:[#allocation2 + $0x8] sm:$0xff]  ;;  %v516_v2 = vld [vmem:[#allocation2 + $0x10] sm:$0xff] }
  0x22   : > { %519 = vst.msk [vmem:[#allocation5] sm:$0xff] %vm518_vm0, %v514_v0  ;;  %v517_v3 = vld [vmem:[#allocation2 + $0x18] sm:$0xff] }
  0x23   : > { %520 = vst.msk [vmem:[#allocation5 + $0x8] sm:$0xff] %vm518_vm0, %v515_v1 }
  0x24   : > { %521 = vst.msk [vmem:[#allocation5 + $0x10] sm:$0xff] %vm518_vm0, %v516_v2 }
  0x25   : > { %522 = vst.msk [vmem:[#allocation5 + $0x18] sm:$0xff] %vm518_vm0, %v517_v3 }
  0x26 PF: > { %vm528_vm1 = vcmask 261120   ;;  %v4788_v12 = vmov 32.0   ;;  %v4444_v39 = vld [vmem:[%s4900_s12 + $0x8] sm:$0xff]  ;;  %v4443_v43 = vld [vmem:[%s4900_s12] sm:$0xff]  ;;  %s4789_s0 = smov 112   ;;  %s4790_s1 = smov 88  }
  0x27   : > { %4592 = vrcp.f32 %v4788_v12  ;;  %664 = vmatpush.bf16.msra.mxu1 %v4444_v39  ;;  %s4791_s2 = smov 120   ;;  %s4792_s16 = smov 104   ;;  %vm814_vm15 = vcmask 1047556   ;;  %vm2214_vm0 = vcmask 64512  }
  0x28   : > { %s4793_s17 = smov 72   ;;  %s4794_s29 = smov 96  }
  0x29   : > { %v523_v5 = vld [vmem:[#allocation5] sm:$0xff]  ;;  %s4795_s12 = smov 80   ;;  %s4796_s21 = smov 48  }
  0x2a   : > { %v529_v7 = vsel %vm528_vm1, %v523_v5, 0.0  ;;  %v524_v9 = vld [vmem:[#allocation5 + $0x8] sm:$0xff]  ;;  %s4797_s22 = smov 56   ;;  %s4798_s24 = smov 64  }
  0x2b   : > { %v525_v4 = vld [vmem:[#allocation5 + $0x10] sm:$0xff]  ;;  %530 = vadd.xlane.f32.xlu0 %v529_v7  ;;  %v532_v11 = vsel %vm528_vm1, %v524_v9, 0.0  ;;  %665 = vmatpush.bf16.msra.mxu1 %v4443_v43  ;;  %s4799_s28 = smov 40   ;;  %s4802_s11 = smov 16  }
  0x2c   : > { %v535_v6 = vsel %vm528_vm1, %v525_v4, 0.0  ;;  %v526_v8 = vld [vmem:[#allocation5 + $0x18] sm:$0xff]  ;;  %s4803_s19 = smov 24   ;;  %p4433_p9 = scmp.eq.s32.totalorder %s4775_s13, 1 }
  0x2d   : > { %536 = vadd.xlane.f32.xlu1 %v535_v6  ;;  %v538_v10 = vsel %vm528_vm1, %v526_v8, 0.0  ;;  %v4593_v13 = vpop.eup %4592  ;;  %v527_v6 = vld [vmem:[%s4930_s26] sm:$0xf] }
  0x2e   : > { %v542_v14 = vmul.f32 32.0, %v4593_v13  ;;  %vm546_vm2 = vweird.f32 %v4593_v13 }
  0x30   : > { %v543_v15 = vsub.f32 1.0, %v542_v14 }
  0x32   : > { %v544_v16 = vmul.f32 %v4593_v13, %v543_v15 }
  0x33   : > { %533 = vadd.xlane.f32.xlu0 %v532_v11 }
  0x34   : > { %v545_v17 = vadd.f32 %v4593_v13, %v544_v16 }
  0x35   : > { %539 = vadd.xlane.f32.xlu1 %v538_v10  ;;  %v624_v10 = vperm.slane %v527_v6, 0 }
  0x36   : > { %v4937_v18 = vsel %vm546_vm2, %v4593_v13, %v545_v17  ;;  %v629_v17 = vperm.slane %v527_v6, 1  ;;  %vm2922_vm2 = vcmask 1043456  }
  0x37   : > { %6861 = vst [vmem:[#allocation9_spill] sm:$0xff] %v4937_v18 }
  0x9e   : > { %v531_v20 = vpop.xlane.xlu0 %530 }
  0x9f   : > { %v548_v22 = vmul.f32 %v4937_v18, %v531_v20 }
  0xa0   : > { %v537_v19 = vpop.xlane.xlu1 %536 }
  0xa1   : > { %v550_v21 = vmul.f32 %v4937_v18, %v537_v19  ;;  %v4943_v24 = vsub.f32 %v523_v5, %v548_v22 }
  0xa3   : > { %v4941_v23 = vsub.f32 %v525_v4, %v550_v21  ;;  %v556_v26 = vmul.f32 %v4943_v24, %v4943_v24 }
  0xa5   : > { %v558_v25 = vmul.f32 %v4941_v23, %v4941_v23  ;;  %v560_v28 = vsel %vm528_vm1, %v556_v26, 0.0 }
  0xa6   : > { %561 = vadd.xlane.f32.xlu2 %v560_v28  ;;  %v534_v30 = vpop.xlane.xlu0 %533 }
  0xa7   : > { %v566_v27 = vsel %vm528_vm1, %v558_v25, 0.0  ;;  %v549_v32 = vmul.f32 %v4937_v18, %v534_v30 }
  0xa8   : > { %v540_v29 = vpop.xlane.xlu1 %539  ;;  %567 = vadd.xlane.f32.xlu0 %v566_v27 }
  0xa9   : > { %v551_v31 = vmul.f32 %v4937_v18, %v540_v29  ;;  %v553_v34 = vsub.f32 %v524_v9, %v549_v32 }
  0xab   : > { %v4953_v33 = vsub.f32 %v526_v8, %v551_v31  ;;  %v557_v36 = vmul.f32 %v553_v34, %v553_v34 }
  0xad   : > { %v559_v35 = vmul.f32 %v4953_v33, %v4953_v33  ;;  %v563_v38 = vsel %vm528_vm1, %v557_v36, 0.0 }
  0xae   : > { %564 = vadd.xlane.f32.xlu2 %v563_v38 }
  0xaf   : > { %v569_v37 = vsel %vm528_vm1, %v559_v35, 0.0 }
  0xb0   : > { %570 = vadd.xlane.f32.xlu1 %v569_v37 }
 0x119   : > { %v562_v40 = vpop.xlane.xlu2 %561 }
 0x11a   : > { %v572_v41 = vmul.f32 %v562_v40, %v4937_v18 }
 0x11b   : > { %v568_v42 = vpop.xlane.xlu0 %567 }
 0x11c   : > { %v576_v44 = vadd.f32 1e-05, %v572_v41  ;;  %v574_v45 = vmul.f32 %v568_v42, %v4937_v18 }
 0x11e   : > { %4594 = vrsqrt.f32 %v576_v44  ;;  %v578_v46 = vadd.f32 1e-05, %v574_v45  ;;  %vm586_vm4 = vweird.f32 %v576_v44 }
 0x120   : > { %4596 = vrsqrt.f32 %v578_v46  ;;  %vm606_vm11 = vweird.f32 %v578_v46 }
 0x121   : > { %v565_v48 = vpop.xlane.xlu2 %564 }
 0x122   : > { %v573_v50 = vmul.f32 %v565_v48, %v4937_v18 }
 0x123   : > { %v571_v47 = vpop.xlane.xlu1 %570 }
 0x124   : > { %v575_v49 = vmul.f32 %v571_v47, %v4937_v18  ;;  %v4595_v51 = vpop.eup %4594  ;;  %v577_v53 = vadd.f32 1e-05, %v573_v50 }
 0x125   : > { %v581_v54 = vmul.f32 %v4595_v51, %v576_v44  ;;  %vm587_vm3 = vweird.f32 %v4595_v51  ;;  %v4800_v44 = vmov 1983009808  }
 0x126   : > { %v579_v52 = vadd.f32 1e-05, %v575_v49  ;;  %v4597_v57 = vpop.eup %4596  ;;  %vm588_vm5 = vmor %vm586_vm4, %vm587_vm3  ;;  %vm596_vm7 = vweird.f32 %v577_v53  ;;  %v819_v45 = vunpack.c.l.s4 %v4800_v44 }
 0x127   : > { %v582_v55 = vmul.f32 %v4595_v51, %v581_v54  ;;  %v601_v63 = vmul.f32 %v4597_v57, %v578_v46  ;;  %vm607_vm12 = vweird.f32 %v4597_v57 }
 0x128   : > { %4598 = vrsqrt.f32 %v579_v52  ;;  %vm616_vm9 = vweird.f32 %v579_v52  ;;  %vm608_vm14 = vmor %vm606_vm11, %vm607_vm12 }
 0x129   : > { %4600 = vrsqrt.f32 %v577_v53  ;;  %v583_v56 = vmul.f32 0.5, %v582_v55  ;;  %v602_v4 = vmul.f32 %v4597_v57, %v601_v63 }
 0x12b   : > { %v584_v58 = vsub.f32 1.5, %v583_v56  ;;  %v603_v11 = vmul.f32 0.5, %v602_v4 }
 0x12d   : > { %v585_v62 = vmul.f32 %v4595_v51, %v584_v58  ;;  %v604_v19 = vsub.f32 1.5, %v603_v11 }
 0x12e   : > { %v4599_v59 = vpop.eup %4598 }
 0x12f   : > { %v4601_v60 = vpop.eup %4600  ;;  %v611_v61 = vmul.f32 %v4599_v59, %v579_v52  ;;  %v589_v3 = vsel %vm588_vm5, %v4595_v51, %v585_v62  ;;  %vm617_vm10 = vweird.f32 %v4599_v59  ;;  %v605_v25 = vmul.f32 %v4597_v57, %v604_v19 }
 0x130   : > { %v591_v0 = vmul.f32 %v4601_v60, %v577_v53  ;;  %vm597_vm6 = vweird.f32 %v4601_v60  ;;  %v620_v9 = vmul.f32 %v589_v3, %v4943_v24  ;;  %vm618_vm13 = vmor %vm616_vm9, %vm617_vm10  ;;  %v5032_v51 = vunpack.c.0.s8 %v819_v45 }
 0x131   : > { %v612_v1 = vmul.f32 %v4599_v59, %v611_v61  ;;  %vm598_vm8 = vmor %vm596_vm7, %vm597_vm6  ;;  %v609_v28 = vsel %vm608_vm14, %v4597_v57, %v605_v25 }
 0x132   : > { %v592_v2 = vmul.f32 %v4601_v60, %v591_v0  ;;  %v625_v16 = vmul.f32 %v624_v10, %v620_v9  ;;  %v622_v30 = vmul.f32 %v609_v28, %v4941_v23  ;;  %v4801_v0 = vmov 1934713408  }
 0x133   : > { %v613_v7 = vmul.f32 0.5, %v612_v1  ;;  %v867_v1 = vunpack.c.l.s4 %v4801_v0 }
 0x134   : > { %v593_v5 = vmul.f32 0.5, %v592_v2  ;;  %v630_v22 = vadd.f32 %v629_v17, %v625_v16  ;;  %v627_v32 = vmul.f32 %v624_v10, %v622_v30 }
 0x135   : > { %v614_v13 = vsub.f32 1.5, %v613_v7 }
 0x136   : > { %v594_v8 = vsub.f32 1.5, %v593_v5  ;;  %v632_v35 = vadd.f32 %v629_v17, %v627_v32 }
 0x137   : > { %v615_v21 = vmul.f32 %v4599_v59, %v614_v13 }
 0x138   : > { %v595_v12 = vmul.f32 %v4601_v60, %v594_v8 }
 0x139   : > { %v619_v27 = vsel %vm618_vm13, %v4599_v59, %v615_v21 }
 0x13a   : > { %v599_v14 = vsel %vm598_vm8, %v4601_v60, %v595_v12  ;;  %v623_v29 = vmul.f32 %v619_v27, %v4953_v33 }
 0x13b   : > { %v621_v15 = vmul.f32 %v599_v14, %v553_v34 }
 0x13c   : > { %v628_v31 = vmul.f32 %v624_v10, %v623_v29 }
 0x13d   : > { %v626_v20 = vmul.f32 %v624_v10, %v621_v15  ;;  %v5046_v10 = vunpack.c.0.s8 %v867_v1 }
 0x13e   : > { %v633_v34 = vadd.f32 %v629_v17, %v628_v31 }
 0x13f   : > { %v631_v24 = vadd.f32 %v629_v17, %v626_v20 }
 0x140   : > { %v635_v36 = vpack.c.bf16 %v633_v34, %v632_v35 }
 0x141   : > { %v634_v26 = vpack.c.bf16 %v631_v24, %v630_v22 }
 0x143   : > { %4347 = vmatmul.msk.bf16.vlgmr.msra.gmra.mxu1 %vm528_vm1, %v634_v26 }
 0x153   : > { %4348 = vmatmul.msk.bf16.gmra.mxu1 %vm528_vm1, %v635_v36 }
 0x1c0   : > { %v4971_v37 = vpop.f32.mrf.mxu1 }
 0x1c1   : > { %693 = vrot.lane.b32.xlu2 %v4971_v37, %s4789_s0  ;;  %729 = vrot.lane.b32.xlu0 %v4971_v37, %s4790_s1  ;;  %v816_v50 = vrot.slane %v4971_v37, 4 }
 0x1c2   : > { %681 = vrot.lane.b32.xlu1 %v4971_v37, %s4791_s2 }
 0x1c8   : > { %v4978_v23 = vpop.f32.mrf.mxu1 }
 0x1c9   : > { %731 = vrot.lane.b32.xlu0 %v4978_v23, %s4790_s1  ;;  %683 = vrot.lane.b32.xlu2 %v4978_v23, %s4791_s2  ;;  %v4529_v39 = vpack.i.bf16 %v4978_v23, %v4971_v37  ;;  %v984_v21 = vrot.slane %v4978_v23, 4 }
 0x1ca   : > { %705 = vrot.lane.b32.xlu1 %v4971_v37, %s4792_s16 }
 0x1d0   : > { %v4987_v33 = vpop.f32.mrf.mxu1 }
 0x1d1   : > { %755 = vrot.lane.b32.xlu0 %v4978_v23, %s4793_s17  ;;  %719 = vrot.lane.b32.xlu2 %v4978_v23, %s4794_s29  ;;  %v1152_v25 = vrot.slane %v4987_v33, 4 }
 0x1d2   : > { %707 = vrot.lane.b32.xlu1 %v4978_v23, %s4792_s16 }
 0x1d8   : > { %v5001_v38 = vpop.f32.mrf.mxu1 }
 0x1d9   : > { %743 = vrot.lane.b32.xlu0 %v4978_v23, %s4795_s12  ;;  %709 = vrot.lane.b32.xlu2 %v4987_v33, %s4792_s16  ;;  %v5021_v40 = vpack.i.bf16 %v5001_v38, %v4987_v33  ;;  %v1320_v26 = vrot.slane %v5001_v38, 4 }
 0x1da   : > { %695 = vrot.lane.b32.xlu1 %v4978_v23, %s4789_s0 }
 0x1db   : > { %6862 = vst [vmem:[#allocation10_spill] sm:$0xff] %v5021_v40 }
 0x1e1   : > { %733 = vrot.lane.b32.xlu2 %v4987_v33, %s4790_s1  ;;  %685 = vrot.lane.b32.xlu0 %v4987_v33, %s4791_s2 }
 0x1e2   : > { %721 = vrot.lane.b32.xlu1 %v4987_v33, %s4794_s29 }
 0x1e9   : > { %757 = vrot.lane.b32.xlu2 %v4987_v33, %s4793_s17  ;;  %697 = vrot.lane.b32.xlu0 %v4987_v33, %s4789_s0 }
 0x1ea   : > { %717 = vrot.lane.b32.xlu1 %v4971_v37, %s4794_s29 }
 0x1f1   : > { %745 = vrot.lane.b32.xlu2 %v4987_v33, %s4795_s12  ;;  %753 = vrot.lane.b32.xlu0 %v4971_v37, %s4793_s17 }
 0x1f2   : > { %687 = vrot.lane.b32.xlu1 %v5001_v38, %s4791_s2  ;;  %s6909_s2 = scalar_lea.vmem %s6833_s3, %s4890_s25 }
 0x1f9   : > { %741 = vrot.lane.b32.xlu2 %v4971_v37, %s4795_s12  ;;  %711 = vrot.lane.b32.xlu0 %v5001_v38, %s4792_s16 }
 0x1fa   : > { %699 = vrot.lane.b32.xlu1 %v5001_v38, %s4789_s0  ;;  %s4804_s0 = smov 8  }
 0x201   : > { %735 = vrot.lane.b32.xlu2 %v5001_v38, %s4790_s1  ;;  %723 = vrot.lane.b32.xlu0 %v5001_v38, %s4794_s29 }
 0x202   : > { %747 = vrot.lane.b32.xlu1 %v5001_v38, %s4795_s12 }
 0x209   : > { %759 = vrot.lane.b32.xlu2 %v5001_v38, %s4793_s17  ;;  %4530 = vrot.lane.b32.xlu0 %v4529_v39, %s4796_s21 }
 0x20a   : > { %4525 = vrot.lane.b32.xlu1 %v4529_v39, %s4797_s22 }
 0x211   : > { %4520 = vrot.lane.b32.xlu2 %v4529_v39, %s4798_s24  ;;  %4540 = vrot.lane.b32.xlu0 %v5021_v40, %s4798_s24 }
 0x219   : > { %4535 = vrot.lane.b32.xlu2 %v4529_v39, %s4799_s28 }
 0x21b   : > { %v694_v41 = vpop.permute.xlu2 %693 }
 0x21c   : > { %v813_v49 = vrot.slane %v694_v41, 4  ;;  %v817_v52 = vsel %vm814_vm15, %v694_v41, %v816_v50 }
 0x21d   : > { %v825_v54 = vperm.slane %v817_v52, %v5032_v51 }
 0x21e   : > { %v815_v53 = vsel %vm814_vm15, %v813_v49, %v4971_v37 }
 0x21f   : > { %v821_v58 = vperm.slane %v815_v53, %v5032_v51  ;;  %v876_v62 = vrot.slane %v825_v54, 4 }
 0x221   : > { %v864_v3 = vrot.slane %v821_v58, 4 }
 0x223   : > { %v684_v42 = vpop.permute.xlu2 %683 }
 0x224   : > { %v996_v13 = vrot.slane %v684_v42, 4 }
 0x22b   : > { %v5025_v43 = vpop.permute.xlu2 %719 }
 0x22c   : > { %v1008_v31 = vrot.slane %v5025_v43, 4 }
 0x233   : > { %v5027_v46 = vpop.permute.xlu2 %709  ;;  %v5029_v47 = vpop.permute.xlu0 %729 }
 0x234   : > { %v682_v48 = vpop.permute.xlu1 %681  ;;  %v1162_v32 = vrot.slane %v5027_v46, 4  ;;  %v852_v36 = vrot.slane %v5029_v47, 4 }
 0x235   : > { %v828_v55 = vrot.slane %v682_v48, 4 }
 0x23b   : > { %v734_v56 = vpop.permute.xlu2 %733  ;;  %v732_v57 = vpop.permute.xlu0 %731 }
 0x23c   : > { %v706_v59 = vpop.permute.xlu1 %705  ;;  %v1020_v19 = vrot.slane %v732_v57, 4  ;;  %v1188_v34 = vrot.slane %v734_v56, 4 }
 0x23d   : > { %v826_v60 = vrot.slane %v706_v59, 4  ;;  %v829_v61 = vsel %vm814_vm15, %v706_v59, %v828_v55 }
 0x23e   : > { %v837_v63 = vperm.slane %v829_v61, %v5032_v51 }
 0x23f   : > { %v827_v2 = vsel %vm814_vm15, %v826_v60, %v682_v48 }
 0x240   : > { %v833_v4 = vperm.slane %v827_v2, %v5032_v51  ;;  %v874_v5 = vrot.slane %v837_v63, 4  ;;  %v877_v6 = vsel %vm814_vm15, %v837_v63, %v876_v62 }
 0x241   : > { %v5052_v22 = vperm.slane %v877_v6, %v5046_v10 }
 0x242   : > { %v862_v7 = vrot.slane %v833_v4, 4  ;;  %v865_v8 = vsel %vm814_vm15, %v833_v4, %v864_v3  ;;  %v875_v9 = vsel %vm814_vm15, %v874_v5, %v825_v54 }
 0x243   : > { %v758_v11 = vpop.permute.xlu2 %757  ;;  %v756_v12 = vpop.permute.xlu0 %755  ;;  %v5058_v27 = vperm.slane %v865_v8, %v5046_v10  ;;  %v5067_v37 = vperm.slane %v875_v9, %v5046_v10  ;;  %v924_v44 = vrot.slane %v5052_v22, 4 }
 0x244   : > { %v863_v14 = vsel %vm814_vm15, %v862_v7, %v821_v58  ;;  %v708_v15 = vpop.permute.xlu1 %707  ;;  %v1018_v16 = vrot.slane %v756_v12, 4  ;;  %v1186_v28 = vrot.slane %v758_v11, 4  ;;  %v1021_v30 = vsel %vm814_vm15, %v756_v12, %v1020_v19 }
 0x245   : > { %v994_v17 = vrot.slane %v708_v15, 4  ;;  %v997_v20 = vsel %vm814_vm15, %v708_v15, %v996_v13  ;;  %v1029_v41 = vperm.slane %v1021_v30, %v5032_v51  ;;  %v1189_v45 = vsel %vm814_vm15, %v758_v11, %v1188_v34 }
 0x246   : > { %v1019_v29 = vsel %vm814_vm15, %v1018_v16, %v732_v57  ;;  %v1005_v35 = vperm.slane %v997_v20, %v5032_v51  ;;  %v916_v52 = vrot.slane %v5058_v27, 4  ;;  %v1187_v53 = vsel %vm814_vm15, %v1186_v28, %v734_v56 }
 0x247   : > { %v995_v24 = vsel %vm814_vm15, %v994_v17, %v684_v42  ;;  %v5072_v42 = vperm.slane %v863_v14, %v5046_v10  ;;  %v1025_v48 = vperm.slane %v1019_v29, %v5032_v51  ;;  %v1066_v63 = vrot.slane %v1029_v41, 4 }
 0x248   : > { %v1001_v39 = vperm.slane %v995_v24, %v5032_v51  ;;  %v1042_v58 = vrot.slane %v1005_v35, 4  ;;  %v5097_v13 = vperm.slane %v1189_v45, %v5032_v51  ;;  %v1193_v28 = vperm.slane %v1187_v53, %v5032_v51 }
 0x249   : > { %v1054_v2 = vrot.slane %v1025_v48, 4 }
 0x24a   : > { %v1030_v62 = vrot.slane %v1001_v39, 4 }
 0x24b   : > { %v5077_v49 = vpop.permute.xlu2 %745  ;;  %v744_v50 = vpop.permute.xlu0 %743 }
 0x24c   : > { %v696_v54 = vpop.permute.xlu1 %695  ;;  %v1006_v55 = vrot.slane %v744_v50, 4  ;;  %v1009_v57 = vsel %vm814_vm15, %v744_v50, %v1008_v31  ;;  %v1174_v29 = vrot.slane %v5077_v49, 4 }
 0x24d   : > { %v982_v59 = vrot.slane %v696_v54, 4  ;;  %v985_v60 = vsel %vm814_vm15, %v696_v54, %v984_v21  ;;  %v1017_v61 = vperm.slane %v1009_v57, %v5032_v51  ;;  %v912_v57 = vrot.slane %v5072_v42, 4 }
 0x24e   : > { %v993_v0 = vperm.slane %v985_v60, %v5032_v51  ;;  %v1007_v1 = vsel %vm814_vm15, %v1006_v55, %v5025_v43 }
 0x24f   : > { %v983_v56 = vsel %vm814_vm15, %v982_v59, %v4978_v23  ;;  %v1013_v3 = vperm.slane %v1007_v1, %v5032_v51  ;;  %v1068_v4 = vrot.slane %v1017_v61, 4  ;;  %v1067_v8 = vsel %vm814_vm15, %v1066_v63, %v1017_v61 }
 0x250   : > { %v989_v5 = vperm.slane %v983_v56, %v5032_v51  ;;  %v1043_v6 = vsel %vm814_vm15, %v1042_v58, %v993_v0  ;;  %v1044_v7 = vrot.slane %v993_v0, 4  ;;  %v1073_v20 = vperm.slane %v1067_v8, %v5046_v10 }
 0x251   : > { %v1049_v9 = vperm.slane %v1043_v6, %v5046_v10  ;;  %v1055_v11 = vsel %vm814_vm15, %v1054_v2, %v1013_v3  ;;  %v1056_v12 = vrot.slane %v1013_v3, 4  ;;  %v1069_v43 = vsel %vm814_vm15, %v1029_v41, %v1068_v4 }
 0x252   : > { %v1031_v23 = vsel %vm814_vm15, %v1030_v62, %v989_v5  ;;  %v1032_v14 = vrot.slane %v989_v5, 4  ;;  %v1045_v15 = vsel %vm814_vm15, %v1005_v35, %v1044_v7  ;;  %v5110_v30 = vperm.slane %v1055_v11, %v5046_v10 }
 0x253   : > { %v5102_v16 = vperm.slane %v1031_v23, %v5046_v10  ;;  %v1053_v17 = vperm.slane %v1045_v15, %v5046_v10  ;;  %v1057_v19 = vsel %vm814_vm15, %v1025_v48, %v1056_v12  ;;  %v742_v21 = vpop.permute.xlu2 %741  ;;  %v686_v24 = vpop.permute.xlu0 %685  ;;  %v1077_v31 = vperm.slane %v1069_v43, %v5046_v10 }
 0x254   : > { %v722_v34 = vpop.permute.xlu1 %721  ;;  %v920_v35 = vrot.slane %v5067_v37, 4  ;;  %v1088_v41 = vrot.slane %v1049_v9, 4  ;;  %v5115_v48 = vperm.slane %v1057_v19, %v5046_v10  ;;  %v1033_v50 = vsel %vm814_vm15, %v1001_v39, %v1032_v14 }
 0x255   : > { %v1092_v45 = vrot.slane %v1053_v17, 4  ;;  %v1080_v54 = vrot.slane %v5102_v16, 4  ;;  %v1090_v53 = vrot.slane %v1077_v31, 4  ;;  %v1175_v55 = vsel %vm814_vm15, %v1174_v29, %v722_v34 }
 0x256   : > { %v1234_v58 = vrot.slane %v5097_v13, 4  ;;  %v1086_v59 = vrot.slane %v1073_v20, 4  ;;  %v1222_v61 = vrot.slane %v1193_v28, 4  ;;  %v1078_v62 = vrot.slane %v5110_v30, 4 }
 0x257   : > { %v5123_v60 = vsel %vm814_vm15, %v1077_v31, %v1092_v45  ;;  %v5127_v63 = vsel %vm814_vm15, %v1090_v53, %v1053_v17  ;;  %v5131_v0 = vperm.slane %v1033_v50, %v5046_v10  ;;  %v1082_v1 = vrot.slane %v5115_v48, 4 }
 0x258   : > { %v1634_v39 = vrot.slane %v5123_v60, 4  ;;  %v1176_v2 = vrot.slane %v722_v34, 4  ;;  %v1181_v56 = vperm.slane %v1175_v55, %v5032_v51  ;;  %v5137_v3 = vsel %vm814_vm15, %v5110_v30, %v1080_v54 }
 0x259   : > { %v5140_v4 = vsel %vm814_vm15, %v1073_v20, %v1088_v41  ;;  %v1163_v5 = vsel %vm814_vm15, %v1162_v32, %v686_v24  ;;  %v1164_v6 = vrot.slane %v686_v24, 4  ;;  %v5146_v7 = vsel %vm814_vm15, %v1086_v59, %v1049_v9 }
 0x25a   : > { %v1622_v8 = vrot.slane %v5127_v63, 4  ;;  %v1177_v11 = vsel %vm814_vm15, %v5077_v49, %v1176_v2  ;;  %v1223_v12 = vsel %vm814_vm15, %v1222_v61, %v1181_v56  ;;  %v1635_v14 = vsel %vm814_vm15, %v1634_v39, %v5140_v4 }
 0x25b   : > { %v736_v43 = vpop.permute.xlu2 %735  ;;  %v698_v23 = vpop.permute.xlu0 %697  ;;  %v1185_v15 = vperm.slane %v1177_v11, %v5032_v51  ;;  %v1224_v17 = vrot.slane %v1181_v56, 4  ;;  %v1165_v32 = vsel %vm814_vm15, %v5027_v46, %v1164_v6  ;;  %v5158_v19 = vperm.slane %v1223_v12, %v5046_v10 }
 0x25c   : > { %v718_v9 = vpop.permute.xlu1 %717  ;;  %v838_v20 = vrot.slane %v742_v21, 4  ;;  %v1169_v49 = vperm.slane %v1163_v5, %v5032_v51  ;;  %v1173_v41 = vperm.slane %v1165_v32, %v5032_v51  ;;  %v1084_v45 = vrot.slane %v5131_v0, 4 }
 0x25d   : > { %v840_v24 = vrot.slane %v718_v9, 4  ;;  %v1225_v29 = vsel %vm814_vm15, %v1193_v28, %v1224_v17  ;;  %v1235_v31 = vsel %vm814_vm15, %v1234_v58, %v1185_v15  ;;  %v1236_v34 = vrot.slane %v1185_v15, 4 }
 0x25e   : > { %v1612_v50 = vrot.slane %v5137_v3, 4  ;;  %v1624_v46 = vrot.slane %v5146_v7, 4  ;;  %v1636_v54 = vrot.slane %v5140_v4, 4  ;;  %v5170_v53 = vsel %vm814_vm15, %v1622_v8, %v5146_v7 }
 0x25f   : > { %v5173_v55 = vperm.slane %v1225_v29, %v5046_v10  ;;  %v1237_v28 = vsel %vm814_vm15, %v5097_v13, %v1236_v34  ;;  %v839_v58 = vsel %vm814_vm15, %v838_v20, %v718_v9  ;;  %v5179_v59 = vperm.slane %v1635_v14, %v5032_v51 }
 0x260   : > { %v1241_v61 = vperm.slane %v1235_v31, %v5046_v10  ;;  %v1246_v39 = vrot.slane %v5158_v19, 4  ;;  %v841_v2 = vsel %vm814_vm15, %v742_v21, %v840_v24  ;;  %v1198_v56 = vrot.slane %v1169_v49, 4 }
 0x261   : > { %6863 = vst [vmem:[#allocation11_spill] sm:$0xff] %v5179_v59  ;;  %v1210_v5 = vrot.slane %v1173_v41, 4  ;;  %v1150_v6 = vrot.slane %v698_v23, 4  ;;  %v1153_v8 = vsel %vm814_vm15, %v698_v23, %v1152_v25  ;;  %v1245_v13 = vperm.slane %v1237_v28, %v5046_v10 }
 0x262   : > { %v845_v11 = vperm.slane %v839_v58, %v5032_v51  ;;  %v1356_v12 = vrot.slane %v736_v43, 4  ;;  %v1161_v14 = vperm.slane %v1153_v8, %v5032_v51  ;;  %v849_v21 = vperm.slane %v841_v2, %v5032_v51 }
 0x263   : > { %v760_v15 = vpop.permute.xlu2 %759  ;;  %v754_v17 = vpop.permute.xlu0 %753  ;;  %v1151_v9 = vsel %vm814_vm15, %v1150_v6, %v4987_v33  ;;  %v1254_v31 = vrot.slane %v1241_v61, 4  ;;  %v1258_v6 = vrot.slane %v1245_v13, 4 }
 0x264   : > { %v1354_v20 = vrot.slane %v760_v15, 4  ;;  %v1157_v24 = vperm.slane %v1151_v9, %v5032_v51  ;;  %v1211_v25 = vsel %vm814_vm15, %v1210_v5, %v1161_v14  ;;  %v1212_v23 = vrot.slane %v1161_v14, 4  ;;  %v5205_v14 = vpop.permute.xlu1 %687 }
 0x265   : > { %v850_v29 = vrot.slane %v754_v17, 4  ;;  %v1217_v34 = vperm.slane %v1211_v25, %v5046_v10  ;;  %v1357_v58 = vsel %vm814_vm15, %v760_v15, %v1356_v12  ;;  %v888_v8 = vrot.slane %v845_v11, 4 }
 0x266   : > { %v1355_v28 = vsel %vm814_vm15, %v1354_v20, %v736_v43  ;;  %v1199_v2 = vsel %vm814_vm15, %v1198_v56, %v1157_v24  ;;  %v1200_v32 = vrot.slane %v1157_v24, 4  ;;  %v1213_v33 = vsel %vm814_vm15, %v1173_v41, %v1212_v23 }
 0x267   : > { %v1221_v9 = vperm.slane %v1213_v33, %v5046_v10  ;;  %v5203_v5 = vperm.slane %v1355_v28, %v5032_v51  ;;  %v5211_v43 = vsel %vm814_vm15, %v1078_v62, %v5102_v16  ;;  %v900_v12 = vrot.slane %v849_v21, 4 }
 0x268   : > { %v5214_v56 = vsel %vm814_vm15, %v1254_v31, %v1217_v34  ;;  %v5217_v41 = vperm.slane %v1357_v58, %v5032_v51  ;;  %v851_v15 = vsel %vm814_vm15, %v850_v29, %v5029_v47  ;;  %v1201_v20 = vsel %vm814_vm15, %v1169_v49, %v1200_v32 }
 0x269   : > { %v1205_v24 = vperm.slane %v1199_v2, %v5046_v10  ;;  %v1256_v25 = vrot.slane %v1217_v34, 4  ;;  %v5227_v16 = vsel %vm814_vm15, %v1082_v1, %v5131_v0  ;;  %v5230_v30 = vsel %vm814_vm15, %v1258_v6, %v1221_v9 }
 0x26a   : > { %v1260_v62 = vrot.slane %v1221_v9, 4  ;;  %v1332_v23 = vrot.slane %v5205_v14, 4  ;;  %v853_v29 = vsel %vm814_vm15, %v754_v17, %v852_v36  ;;  %v1734_v49 = vrot.slane %v5230_v30, 4 }
 0x26b   : > { %v857_v34 = vperm.slane %v851_v15, %v5032_v51  ;;  %v5241_v1 = vperm.slane %v1201_v20, %v5046_v10  ;;  %v861_v47 = vperm.slane %v853_v29, %v5032_v51  ;;  %v5249_v36 = vsel %vm814_vm15, %v1246_v39, %v1205_v24 }
 0x26c   : > { %v5244_v28 = vsel %vm814_vm15, %v1245_v13, %v1260_v62  ;;  %v5252_v17 = vsel %vm814_vm15, %v1241_v61, %v1256_v25  ;;  %v1248_v20 = vrot.slane %v1205_v24, 4  ;;  %v1735_v62 = vsel %vm814_vm15, %v1734_v49, %v5214_v56 }
 0x26d   : > { %v886_v2 = vrot.slane %v857_v34, 4  ;;  %v889_v33 = vsel %vm814_vm15, %v857_v34, %v888_v8  ;;  %v1746_v6 = vrot.slane %v5244_v28, 4  ;;  %v898_v13 = vrot.slane %v861_v47, 4 }
 0x26e   : > { %v5257_v9 = vperm.slane %v889_v33, %v5046_v10  ;;  %v901_v15 = vsel %vm814_vm15, %v861_v47, %v900_v12  ;;  %v5273_v12 = vsel %vm814_vm15, %v5115_v48, %v1084_v45  ;;  %v1600_v34 = vrot.slane %v5211_v43, 4 }
 0x26f   : > { %v887_v39 = vsel %vm814_vm15, %v886_v2, %v845_v11  ;;  %v909_v61 = vperm.slane %v901_v15, %v5046_v10  ;;  %v899_v29 = vsel %vm814_vm15, %v898_v13, %v849_v21  ;;  %v5284_v47 = vperm.slane %v1735_v62, %v5032_v51 }
 0x270   : > { %v5266_v8 = vperm.slane %v887_v39, %v5046_v10  ;;  %v905_v24 = vperm.slane %v899_v29, %v5046_v10  ;;  %v5280_v11 = vsel %vm814_vm15, %v5257_v9, %v916_v52  ;;  %v1747_v0 = vsel %vm814_vm15, %v1746_v6, %v5252_v17 }
 0x271   : > { %v922_v49 = vrot.slane %v909_v61, 4  ;;  %v925_v52 = vsel %vm814_vm15, %v909_v61, %v924_v44  ;;  %v5306_v6 = vsel %vm814_vm15, %v5158_v19, %v1248_v20  ;;  %v1613_v19 = vsel %vm814_vm15, %v5273_v12, %v1612_v50 }
 0x272   : > { %v5292_v48 = vsel %vm814_vm15, %v5266_v8, %v912_v57  ;;  %v918_v45 = vrot.slane %v905_v24, 4  ;;  %v921_v21 = vsel %vm814_vm15, %v905_v24, %v920_v35  ;;  %v1522_v33 = vrot.slane %v925_v52, 4 }
 0x273   : > { %v5302_v2 = vsel %vm814_vm15, %v922_v49, %v5052_v22  ;;  %v1524_v15 = vrot.slane %v921_v21, 4  ;;  %v1601_v22 = vsel %vm814_vm15, %v5227_v16, %v1600_v34  ;;  %v5322_v20 = vperm.slane %v1747_v0, %v5032_v51  ;;  %v700_v49 = vpop.permute.xlu1 %699 }
 0x274   : > { %v1510_v13 = vrot.slane %v5302_v2, 4  ;;  %v5312_v44 = vsel %vm814_vm15, %v918_v45, %v5067_v37  ;;  %v1523_v35 = vsel %vm814_vm15, %v1522_v33, %v921_v21  ;;  %v1598_v37 = vrot.slane %v5227_v16, 4  ;;  %v712_v45 = vpop.permute.xlu0 %711 }
 0x275   : > { %v1525_v39 = vsel %vm814_vm15, %v925_v52, %v1524_v15  ;;  %v5331_v24 = vperm.slane %v1613_v19, %v5032_v51  ;;  %v1625_v50 = vsel %vm814_vm15, %v5127_v63, %v1624_v46  ;;  %v5339_v0 = vperm.slane %v1523_v35, %v5032_v51 }
 0x276   : > { %v1511_v62 = vsel %vm814_vm15, %v1510_v13, %v5312_v44  ;;  %v5342_v16 = vperm.slane %v1601_v22, %v5032_v51  ;;  %v1637_v52 = vsel %vm814_vm15, %v5123_v60, %v1636_v54  ;;  %v1610_v21 = vrot.slane %v5273_v12, 4 }
 0x277   : > { %v5351_v63 = vperm.slane %v1637_v52, %v5032_v51  ;;  %v1658_v46 = vrot.slane %v5331_v24, 4  ;;  %v5356_v13 = vperm.slane %v1511_v62, %v5032_v51  ;;  %v5359_v4 = vperm.slane %v1625_v50, %v5032_v51 }
 0x278   : > { %v1318_v15 = vrot.slane %v700_v49, 4  ;;  %v1321_v12 = vsel %vm814_vm15, %v700_v49, %v1320_v26  ;;  %v1330_v35 = vrot.slane %v712_v45, 4  ;;  %v5368_v22 = vperm.slane %v1525_v39, %v5032_v51 }
 0x279   : > { %v1659_v60 = vsel %vm814_vm15, %v1658_v46, %v5342_v16  ;;  %v1682_v54 = vrot.slane %v5351_v63, 4  ;;  %v5376_v46 = vpop.permute.xlu2 %4520  ;;  %v1329_v26 = vperm.slane %v1321_v12, %v5032_v51  ;;  %v1712_v18 = vrot.slane %v5249_v36, 4 }
 0x27a   : > { %v1319_v50 = vsel %vm814_vm15, %v1318_v15, %v5001_v38  ;;  %v1331_v39 = vsel %vm814_vm15, %v1330_v35, %v5205_v14  ;;  %v5383_v49 = vperm.slane %v1659_v60, %v5046_v10  ;;  %v1333_v38 = vsel %vm814_vm15, %v712_v45, %v1332_v23 }
 0x27b   : > { %v1683_v52 = vsel %vm814_vm15, %v1682_v54, %v5359_v4  ;;  %v1325_v61 = vperm.slane %v1319_v50, %v5032_v51  ;;  %v1337_v15 = vperm.slane %v1331_v39, %v5032_v51  ;;  %v1380_v50 = vrot.slane %v1329_v26, 4 }
 0x27c   : > { %v5386_v19 = vperm.slane %v1683_v52, %v5046_v10  ;;  %v1341_v12 = vperm.slane %v1333_v38, %v5032_v51  ;;  %v1599_v60 = vsel %vm814_vm15, %v1598_v37, %v5211_v43  ;;  %v1611_v52 = vsel %vm814_vm15, %v1610_v21, %v5137_v3 }
 0x27d   : > { %v1368_v54 = vrot.slane %v1325_v61, 4  ;;  %v1366_v35 = vrot.slane %v1337_v15, 4  ;;  %v5401_v45 = vperm.slane %v1611_v52, %v5032_v51  ;;  %v6843_v38 = vunpack.i.h.bf16 %v5376_v46 }
 0x27e   : > { %v1702_v7 = vrot.slane %v5386_v19, 4  ;;  %v1378_v62 = vrot.slane %v1341_v12, 4  ;;  %v1381_v23 = vsel %vm814_vm15, %v1341_v12, %v1380_v50  ;;  %v6842_v33 = vunpack.i.l.bf16 %v5376_v46  ;;  %v748_v12 = vpop.permute.xlu1 %747 }
 0x27f   : > { %v1369_v14 = vsel %vm814_vm15, %v1337_v15, %v1368_v54  ;;  %6864 = vst [vmem:[#allocation12_spill] sm:$0xff] %v5401_v45  ;;  %v1367_v43 = vsel %vm814_vm15, %v1366_v35, %v1325_v61  ;;  %v5410_v21 = vperm.slane %v1599_v60, %v5032_v51  ;;  %v1646_v15 = vrot.slane %v5401_v45, 4 }
 0x280   : > { %v1703_v39 = vsel %vm814_vm15, %v1702_v7, %v5383_v49  ;;  %v1379_v3 = vsel %vm814_vm15, %v1378_v62, %v1329_v26  ;;  %v5414_v54 = vperm.slane %v1367_v43, %v5046_v10  ;;  %v5417_v50 = vperm.slane %v1369_v14, %v5046_v10  ;;  %v724_v62 = vpop.permute.xlu0 %723 }
 0x281   : > { %v2183_v37 = vpack.c.bf16 %v1703_v39, %v1703_v39  ;;  %6865 = vst [vmem:[#allocation13_spill] sm:$0xff] %v5410_v21  ;;  %v5420_v7 = vperm.slane %v1381_v23, %v5046_v10  ;;  %v5424_v61 = vperm.slane %v5170_v53, %v5032_v51  ;;  %v5428_v35 = vperm.slane %v1379_v3, %v5046_v10  ;;  %v5448_v3 = vpop.permute.xlu2 %4535 }
 0x282   : > { %v1647_v60 = vsel %vm814_vm15, %v1646_v15, %v5410_v21  ;;  %v1670_v52 = vrot.slane %v5179_v59, 4  ;;  %v5437_v53 = vrot.slane %v6843_v38, 4  ;;  %v5441_v39 = vrot.slane %v6842_v33, 4 }
 0x283   : > { %6866 = vst [vmem:[#allocation14_spill] sm:$0xff] %v5424_v61  ;;  %v2238_v26 = vsel %vm2214_vm0, %v2183_v37, 0  ;;  %v5444_v43 = vperm.slane %v1647_v60, %v5046_v10  ;;  %v1342_v15 = vrot.slane %v748_v12, 4  ;;  %v1344_v14 = vrot.slane %v724_v62, 4 }
 0x284   : > { %2247 = vmatpush.bf16.xpose.msra.mxu2 %v2238_v26  ;;  %v1671_v37 = vsel %vm814_vm15, %v1670_v52, %v5424_v61  ;;  %v1420_v26 = vrot.slane %v5417_v50, 4  ;;  %v1428_v23 = vrot.slane %v5420_v7, 4  ;;  %v1416_v33 = vrot.slane %v5414_v54, 4 }
 0x285   : > { %v5454_v34 = vperm.slane %v1671_v37, %v5046_v10  ;;  %v1424_v60 = vrot.slane %v5428_v35, 4  ;;  %v1343_v38 = vsel %vm814_vm15, %v1342_v15, %v724_v62  ;;  %v1345_v52 = vsel %vm814_vm15, %v748_v12, %v1344_v14 }
 0x286   : > { %v1349_v57 = vperm.slane %v1343_v38, %v5032_v51  ;;  %v1353_v58 = vperm.slane %v1345_v52, %v5032_v51  ;;  %v6867_v12 = vrot.slane %v5203_v5, 4  ;;  %v6868_v38 = vrot.slane %v5217_v41, 4 }
 0x287   : > { %v1694_v25 = vrot.slane %v5454_v34, 4  ;;  %v6869_v40 = vunpack.i.h.bf16 %v5448_v3 }
 0x288   : > { %v1391_v14 = vsel %vm814_vm15, %v6867_v12, %v1349_v57  ;;  %v1392_v15 = vrot.slane %v1349_v57, 4  ;;  %v1403_v52 = vsel %vm814_vm15, %v6868_v38, %v1353_v58  ;;  %v1404_v37 = vrot.slane %v1353_v58, 4 }
 0x289   : > { %v1695_v62 = vsel %vm814_vm15, %v1694_v25, %v5444_v43  ;;  %v1397_v29 = vperm.slane %v1391_v14, %v5046_v10  ;;  %v1409_v31 = vperm.slane %v1403_v52, %v5046_v10  ;;  %v5480_v59 = vrot.slane %v6869_v40, 4 }
 0x28a   : > { %v2151_v32 = vmul.f32 0.35355338, %v1695_v62  ;;  %v1393_v25 = vsel %vm814_vm15, %v5203_v5, %v1392_v15  ;;  %v6870_v57 = vrot.slane %v5173_v55, 4  ;;  %v1724_v62 = vrot.slane %v5306_v6, 4 }
 0x28b   : > { %v1401_v58 = vperm.slane %v1393_v25, %v5046_v10  ;;  %v1405_v14 = vsel %vm814_vm15, %v5217_v41, %v1404_v37  ;;  %v6871_v40 = vrot.slane %v5241_v1, 4  ;;  %v1414_v15 = vrot.slane %v1397_v29, 4 }
 0x28c   : > { %v5488_v12 = vsel %vm814_vm15, %v6870_v57, %v5241_v1  ;;  %v2167_v38 = vpack.c.bf16 %v2151_v32, %v2151_v32  ;;  %v5501_v5 = vperm.slane %v1405_v14, %v5046_v10  ;;  %v1417_v57 = vsel %vm814_vm15, %v1397_v29, %v1416_v33 }
 0x28d   : > { %v5498_v52 = vsel %vm814_vm15, %v5173_v55, %v6871_v40  ;;  %v1422_v61 = vrot.slane %v1409_v31, 4  ;;  %v1418_v32 = vrot.slane %v1401_v58, 4  ;;  %v1421_v25 = vsel %vm814_vm15, %v1401_v58, %v1420_v26 }
 0x28e   : > { %4350 = vmatmul.msk.bf16.vlgmr.msra.gmra.mxu2 %vm2214_vm0, %v2167_v38  ;;  %v1713_v41 = vsel %vm814_vm15, %v5488_v12, %v1712_v18  ;;  %v6872_v1 = vrot.slane %v5214_v56, 4  ;;  %v6873_v37 = vunpack.i.l.bf16 %v5448_v3  ;;  %v1725_v33 = vsel %vm814_vm15, %v5498_v52, %v1724_v62 }
 0x28f   : > { %v5520_v26 = vsel %vm814_vm15, %v1418_v32, %v5417_v50  ;;  %v5524_v18 = vsel %vm814_vm15, %v5501_v5, %v1428_v23  ;;  %v1834_v56 = vrot.slane %v1421_v25, 4  ;;  %v5528_v38 = vsel %vm814_vm15, %v1414_v15, %v5414_v54 }
 0x290   : > { %v1737_v55 = vsel %vm814_vm15, %v5230_v30, %v6872_v1  ;;  %v938_v14 = vrot.slane %v6873_v37, 4  ;;  %6874 = vst [vmem:[#allocation15_spill] sm:$0xff] %v5524_v18  ;;  %v1836_v30 = vrot.slane %v1417_v57, 4  ;;  %v5532_v58 = vsel %vm814_vm15, %v1422_v61, %v5428_v35 }
 0x291   : > { %v1721_v62 = vperm.slane %v1713_v41, %v5032_v51  ;;  %v1745_v1 = vperm.slane %v1737_v55, %v5032_v51  ;;  %v1822_v50 = vrot.slane %v5520_v26, 4  ;;  %v1733_v32 = vperm.slane %v1725_v33, %v5032_v51 }
 0x292   : > { %v6875_v23 = vrot.slane %v5252_v17, 4  ;;  %v1704_v54 = vrot.slane %v5383_v49, 4  ;;  %v5544_v15 = vsel %vm814_vm15, %v1409_v31, %v1424_v60  ;;  %v1835_v61 = vsel %vm814_vm15, %v1834_v56, %v1417_v57  ;;  %v4526_v57 = vpop.permute.xlu1 %4525 }
 0x293   : > { %v1858_v35 = vrot.slane %v5524_v18, 4  ;;  %v5552_v17 = vsel %vm814_vm15, %v1421_v25, %v1836_v30  ;;  %v1770_v29 = vrot.slane %v1733_v32, 4  ;;  %v1772_v60 = vrot.slane %v1721_v62, 4 }
 0x294   : > { %v1749_v37 = vsel %vm814_vm15, %v5244_v28, %v6875_v23  ;;  %v1705_v31 = vsel %vm814_vm15, %v5386_v19, %v1704_v54  ;;  %v1823_v56 = vsel %vm814_vm15, %v1822_v50, %v5528_v38  ;;  %v5560_v23 = vperm.slane %v1835_v61, %v5032_v51  ;;  %v4531_v54 = vpop.permute.xlu0 %4530 }
 0x295   : > { %v1757_v41 = vperm.slane %v1749_v37, %v5032_v51  ;;  %v1771_v37 = vsel %vm814_vm15, %v1770_v29, %v1721_v62  ;;  %v1796_v33 = vrot.slane %v1745_v1, 4  ;;  %v1859_v25 = vsel %vm814_vm15, %v1858_v35, %v5544_v15 }
 0x296   : > { %v1777_v30 = vperm.slane %v1771_v37, %v5046_v10  ;;  %v1773_v19 = vsel %vm814_vm15, %v1733_v32, %v1772_v60  ;;  %v2187_v40 = vpack.c.bf16 %v1705_v31, %v1705_v31  ;;  %v4528_v61 = vunpack.i.h.bf16 %v4526_v57 }
 0x297   : > { %v1794_v49 = vrot.slane %v1757_v41, 4  ;;  %v1797_v50 = vsel %vm814_vm15, %v1757_v41, %v1796_v33  ;;  %v5571_v29 = vperm.slane %v1773_v19, %v5046_v10  ;;  %v4527_v35 = vunpack.i.l.bf16 %v4526_v57 }
 0x298   : > { %v1816_v45 = vrot.slane %v1777_v30, 4  ;;  %v5574_v62 = vperm.slane %v1797_v50, %v5046_v10  ;;  %v1108_v32 = vrot.slane %v4528_v61, 4  ;;  %v6876_v50 = vunpack.i.h.bf16 %v5448_v3 }
 0x299   : > { %v1795_v28 = vsel %vm814_vm15, %v1794_v49, %v1745_v1  ;;  %v1107_v1 = vsel %vm814_vm15, %v5480_v59, %v4528_v61  ;;  %v4533_v49 = vunpack.i.h.bf16 %v4531_v54  ;;  %v939_v33 = vsel %vm814_vm15, %v938_v14, %v4527_v35 }
 0x29a   : > { %v1801_v55 = vperm.slane %v1795_v28, %v5046_v10  ;;  %v1818_v31 = vrot.slane %v5574_v62, 4  ;;  %v1113_v41 = vperm.slane %v1107_v1, %v5032_v51  ;;  %v1109_v57 = vsel %vm814_vm15, %v6876_v50, %v1108_v32 }
 0x29b   : > { %v940_v21 = vrot.slane %v4527_v35, 4  ;;  %v2314_v59 = vsel %vm2214_vm0, %v2187_v40, 0  ;;  %v6877_v14 = vunpack.i.l.bf16 %v5448_v3  ;;  %v4532_v50 = vunpack.i.l.bf16 %v4531_v54 }
 0x29c   : > { %v1814_v37 = vrot.slane %v1801_v55, 4  ;;  %v1817_v28 = vsel %vm814_vm15, %v1801_v55, %v1816_v45  ;;  %v1819_v45 = vsel %vm814_vm15, %v1818_v31, %v5571_v29  ;;  %v1117_v55 = vperm.slane %v1109_v57, %v5032_v51 }
 0x29d   : > { %v2188_v19 = vpack.c.bf16 %v1817_v28, %v1817_v28  ;;  %v2192_v1 = vpack.c.bf16 %v1819_v45, %v1819_v45  ;;  %v1094_v28 = vrot.slane %v4533_v49, 4  ;;  %v5601_v3 = vperm.slane %v1823_v56, %v5032_v51 }
 0x29e   : > { %v1815_v60 = vsel %vm814_vm15, %v1814_v37, %v1777_v30  ;;  %v941_v30 = vsel %vm814_vm15, %v6877_v14, %v940_v21  ;;  %v945_v37 = vperm.slane %v939_v33, %v5032_v51  ;;  %v1130_v35 = vrot.slane %v1117_v55, 4 }
 0x29f   : > { %v2184_v18 = vpack.c.bf16 %v1815_v60, %v1815_v60  ;;  %v2333_v61 = vsel %vm2214_vm0, %v2188_v19, 0  ;;  %v949_v40 = vperm.slane %v941_v30, %v5032_v51  ;;  %v2409_v31 = vsel %vm2214_vm0, %v2192_v1, 0 }
 0x2a0   : > { %2342 = vmatpush.bf16.xpose.msra.mxu0 %v2333_v61  ;;  %v1118_v60 = vrot.slane %v1113_v41, 4  ;;  %v1097_v19 = vsel %vm814_vm15, %v4533_v49, %v5437_v53  ;;  %v950_v45 = vrot.slane %v945_v37, 4  ;;  %v926_v1 = vrot.slane %v4532_v50, 4 }
 0x2a1   : > { %v2257_v32 = vsel %vm2214_vm0, %v2184_v18, 0  ;;  %v6878_v18 = vunpack.i.h.bf16 %v5376_v46  ;;  %v1105_v57 = vperm.slane %v1097_v19, %v5032_v51  ;;  %v929_v53 = vsel %vm814_vm15, %v4532_v50, %v5441_v39 }
 0x2a2   : > { %2266 = vmatpush.bf16.xpose.msra.mxu3 %v2257_v32  ;;  %v962_v54 = vrot.slane %v949_v40, 4  ;;  %v5619_v19 = vperm.slane %v1859_v25, %v5032_v51 }
 0x2a3   : > { %v1095_v33 = vsel %vm814_vm15, %v1094_v28, %v6878_v18  ;;  %v1131_v56 = vsel %vm814_vm15, %v1130_v35, %v1105_v57  ;;  %v1132_v49 = vrot.slane %v1105_v57, 4  ;;  %v6879_v28 = vunpack.i.l.bf16 %v5376_v46 }
 0x2a4   : > { %v1101_v61 = vperm.slane %v1095_v33, %v5032_v51  ;;  %v1137_v32 = vperm.slane %v1131_v56, %v5046_v10  ;;  %v6880_v46 = vrot.slane %v5488_v12, 4  ;;  %v6881_v12 = vrot.slane %v5498_v52, 4 }
 0x2a5   : > { %v1133_v35 = vsel %vm814_vm15, %v1117_v55, %v1132_v49 }
 0x2a6   : > { %v1119_v14 = vsel %vm814_vm15, %v1118_v60, %v1101_v61  ;;  %v1120_v30 = vrot.slane %v1101_v61, 4  ;;  %v1141_v60 = vperm.slane %v1133_v35, %v5046_v10  ;;  %v1711_v57 = vsel %vm814_vm15, %v6880_v46, %v5249_v36 }
 0x2a7   : > { %v5622_v39 = vperm.slane %v1119_v14, %v5046_v10  ;;  %v1146_v55 = vrot.slane %v1137_v32, 4 }
 0x2a8   : > { %2418 = vmatpush.bf16.xpose.msrb.mxu0 %v2409_v31  ;;  %v927_v31 = vsel %vm814_vm15, %v926_v1, %v6879_v28  ;;  %v1121_v18 = vsel %vm814_vm15, %v1113_v41, %v1120_v30  ;;  %v1148_v56 = vrot.slane %v1141_v60, 4 }
 0x2a9   : > { %v933_v50 = vperm.slane %v927_v31, %v5032_v51  ;;  %v1129_v25 = vperm.slane %v1121_v18, %v5046_v10  ;;  %v1142_v14 = vrot.slane %v5622_v39, 4  ;;  %v1147_v18 = vsel %vm814_vm15, 0.0, %v1146_v55 }
 0x2aa   : > { %2323 = vmatpush.bf16.xpose.msrb.mxu3 %v2314_v59  ;;  %v937_v59 = vperm.slane %v929_v53, %v5032_v51  ;;  %v5669_v46 = vsel %vm814_vm15, %v1148_v56, %v1137_v32  ;;  %v1782_v32 = vrot.slane %v5322_v20, 4 }
 0x2ab   : > { %v951_v61 = vsel %vm814_vm15, %v950_v45, %v933_v50  ;;  %v952_v1 = vrot.slane %v933_v50, 4  ;;  %v5640_v30 = vrot.slane %v1129_v25, 4  ;;  %v1723_v45 = vsel %vm814_vm15, %v6881_v12, %v5306_v6 }
 0x2ac   : > { %v964_v33 = vrot.slane %v937_v59, 4  ;;  %v963_v53 = vsel %vm814_vm15, %v962_v54, %v937_v59  ;;  %v5636_v49 = vperm.slane %v951_v61, %v5046_v10  ;;  %v1149_v54 = vsel %vm814_vm15, 0.0, %v1148_v56 }
 0x2ad   : > { %v953_v36 = vsel %vm814_vm15, %v945_v37, %v952_v1  ;;  %v5650_v28 = vperm.slane %v963_v53, %v5046_v10  ;;  %v5656_v35 = vsel %vm814_vm15, 0.0, %v5640_v30  ;;  %v2004_v37 = vrot.slane %v1149_v54, 4 }
 0x2ae   : > { %v965_v41 = vsel %vm814_vm15, %v949_v40, %v964_v33  ;;  %v961_v59 = vperm.slane %v953_v36, %v5046_v10  ;;  %v974_v52 = vrot.slane %v5636_v49, 4  ;;  %v1820_v50 = vrot.slane %v5571_v29, 4 }
 0x2af   : > { %v973_v40 = vperm.slane %v965_v41, %v5046_v10  ;;  %v5663_v60 = vperm.slane %v1723_v45, %v5032_v51  ;;  %v5666_v33 = vsel %vm814_vm15, 0.0, %v1142_v14  ;;  %v5674_v61 = vperm.slane %v1711_v57, %v5032_v51 }
 0x2b0   : > { %v5671_v25 = vrot.slane %v961_v59, 4  ;;  %v978_v29 = vrot.slane %v5650_v28, 4  ;;  %v5682_v41 = vsel %vm814_vm15, %v2004_v37, %v1147_v18  ;;  %v5685_v14 = vsel %vm814_vm15, 0.0, %v974_v52 }
 0x2b1   : > { %v5678_v53 = vrot.slane %v973_v40, 4  ;;  %v1758_v55 = vrot.slane %v5663_v60, 4  ;;  %v6882_v57 = vrot.slane %v5266_v8, 4  ;;  %v6883_v12 = vrot.slane %v5257_v9, 4 }
 0x2b2   : > { %v1500_v59 = vrot.slane %v5292_v48, 4  ;;  %v5701_v40 = vsel %vm814_vm15, 0.0, %v5671_v25  ;;  %v6884_v9 = vrot.slane %v5312_v44, 4 }
 0x2b3   : > { %v911_v56 = vsel %vm814_vm15, %v6882_v57, %v5072_v42  ;;  %v1759_v36 = vsel %vm814_vm15, %v1758_v55, %v5674_v61  ;;  %v915_v45 = vsel %vm814_vm15, %v6883_v12, %v5058_v27  ;;  %v1783_v42 = vsel %vm814_vm15, %v1782_v32, %v5284_v47 }
 0x2b4   : > { %v1488_v54 = vrot.slane %v911_v56, 4  ;;  %v1765_v37 = vperm.slane %v1759_v36, %v5046_v10  ;;  %v1486_v8 = vrot.slane %v915_v45, 4  ;;  %v1789_v52 = vperm.slane %v1783_v42, %v5046_v10 }
 0x2b5   : > { %v1501_v27 = vsel %vm814_vm15, %v5280_v11, %v1500_v59  ;;  %v1513_v55 = vsel %vm814_vm15, %v5302_v2, %v6884_v9  ;;  %v1570_v32 = vrot.slane %v5368_v22, 4  ;;  %v6885_v42 = vrot.slane %v5342_v16, 4 }
 0x2b6   : > { %v1489_v18 = vsel %vm814_vm15, %v915_v45, %v1488_v54  ;;  %v1509_v36 = vperm.slane %v1501_v27, %v5032_v51  ;;  %v1521_v12 = vperm.slane %v1513_v55, %v5032_v51  ;;  %v1806_v1 = vrot.slane %v1789_v52, 4 }
 0x2b7   : > { %v1497_v57 = vperm.slane %v1489_v18, %v5032_v51  ;;  %v1661_v45 = vsel %vm814_vm15, %v5331_v24, %v6885_v42  ;;  %v6886_v54 = vrot.slane %v5359_v4, 4  ;;  %v1808_v2 = vrot.slane %v1765_v37, 4 }
 0x2b8   : > { %v1546_v59 = vrot.slane %v1509_v36, 4  ;;  %v1571_v27 = vsel %vm814_vm15, %v1570_v32, %v1521_v12  ;;  %v1572_v9 = vrot.slane %v1521_v12, 4  ;;  %v1807_v55 = vsel %vm814_vm15, %v1806_v1, %v1765_v37 }
 0x2b9   : > { %v1685_v44 = vsel %vm814_vm15, %v5351_v63, %v6886_v54  ;;  %v1548_v18 = vrot.slane %v1497_v57, 4  ;;  %v1577_v6 = vperm.slane %v1571_v27, %v5046_v10  ;;  %v1669_v16 = vperm.slane %v1661_v45, %v5046_v10 }
 0x2ba   : > { %v1693_v31 = vperm.slane %v1685_v44, %v5046_v10  ;;  %v2152_v24 = vmul.f32 0.35355338, %v1807_v55  ;;  %v1547_v4 = vsel %vm814_vm15, %v1546_v59, %v1497_v57  ;;  %v1809_v42 = vsel %vm814_vm15, %v1789_v52, %v1808_v2 }
 0x2bb   : > { %v1821_v63 = vsel %vm814_vm15, %v5574_v62, %v1820_v50  ;;  %v1553_v54 = vperm.slane %v1547_v4, %v5046_v10  ;;  %v1590_v32 = vrot.slane %v1577_v6, 4  ;;  %v2156_v21 = vmul.f32 0.35355338, %v1809_v42 }
 0x2bc   : > { %v1706_v12 = vrot.slane %v1693_v31, 4  ;;  %v2168_v1 = vpack.c.bf16 %v2152_v24, %v2152_v24  ;;  %v2196_v37 = vpack.c.bf16 %v1821_v63, %v1821_v63  ;;  %v1549_v27 = vsel %vm814_vm15, %v1509_v36, %v1548_v18 }
 0x2bd   : > { %v1573_v45 = vsel %vm814_vm15, %v5368_v22, %v1572_v9  ;;  %v1591_v44 = vsel %vm814_vm15, %v1590_v32, %v1553_v54  ;;  %v2172_v52 = vpack.c.bf16 %v2156_v21, %v2156_v21  ;;  %v1592_v2 = vrot.slane %v1553_v54, 4 }
 0x2be   : > { %v1707_v57 = vsel %vm814_vm15, %v1706_v12, %v1669_v16  ;;  %v981_v62 = vsel %vm814_vm15, 0.0, %v5678_v53  ;;  %4351 = vmatmul.msk.bf16.vlgmr.msra.gmra.mxu3 %vm2214_vm0, %v2168_v1  ;;  %v2182_v50 = vpack.c.bf16 %v1591_v44, %v1591_v44  ;;  %v1557_v55 = vperm.slane %v1549_v27, %v5046_v10 }
 0x2bf   : > { %v2191_v59 = vpack.c.bf16 %v1707_v57, %v1707_v57  ;;  %v979_v36 = vsel %vm814_vm15, 0.0, %v978_v29  ;;  %4355 = vmatmul.msk.bf16.vlgmr.msra.gmra.mxu0 %vm2214_vm0, %v2172_v52  ;;  %v1593_v22 = vsel %vm814_vm15, %v1577_v6, %v1592_v2  ;;  %v2485_v18 = vsel %vm2214_vm0, %v2196_v37, 0 }
 0x2c0   : > { %v1581_v21 = vperm.slane %v1573_v45, %v5046_v10  ;;  %v2219_v9 = vsel %vm2214_vm0, %v2182_v50, 0  ;;  %v2186_v4 = vpack.c.bf16 %v1593_v22, %v1593_v22  ;;  %2494 = vmatpush.bf16.xpose.msra.mxu0 %v2485_v18  ;;  %v1487_v42 = vsel %vm814_vm15, %v1486_v8, %v911_v56 }
 0x2c1   : > { %v2390_v24 = vsel %vm2214_vm0, %v2191_v59, 0  ;;  %v1939_v63 = vrot.slane %v5701_v40, 4  ;;  %v1950_v54 = vrot.slane %v981_v62, 4  ;;  %v1760_v29 = vrot.slane %v5674_v61, 4  ;;  %2228 = vmatpush.bf16.xpose.msrb.mxu1 %v2219_v9 }
 0x2c2   : > { %2399 = vmatpush.bf16.xpose.msra.mxu3 %v2390_v24  ;;  %v1594_v6 = vrot.slane %v1581_v21, 4  ;;  %v2295_v32 = vsel %vm2214_vm0, %v2186_v4, 0  ;;  %v6887_v12 = vrot.slane %v5280_v11, 4  ;;  %v6888_v37 = vrot.slane %v5339_v0, 4 }
 0x2c3   : > { %v1596_v8 = vrot.slane %v1557_v55, 4  ;;  %2304 = vmatpush.bf16.xpose.msrb.mxu2 %v2295_v32  ;;  %v5766_v61 = vperm.slane %v1487_v42, %v5032_v51  ;;  %v6889_v57 = vrot.slane %v5444_v43, 4  ;;  %v1708_v2 = vrot.slane %v1669_v16, 4  ;;  %v6894_v32 = vld [vmem:[#allocation15_spill] sm:$0xff] }
 0x2c4   : > { %v1499_v1 = vsel %vm814_vm15, %v6887_v12, %v5292_v48  ;;  %v1559_v56 = vsel %vm814_vm15, %v6888_v37, %v5356_v13  ;;  %v1595_v27 = vsel %vm814_vm15, %v1594_v6, %v1557_v55  ;;  %v5778_v62 = vsel %vm814_vm15, %v1950_v54, %v979_v36 }
 0x2c5   : > { %v5769_v45 = vperm.slane %v1499_v1, %v5032_v51  ;;  %v1565_v44 = vperm.slane %v1559_v56, %v5046_v10  ;;  %v2190_v11 = vpack.c.bf16 %v1595_v27, %v1595_v27  ;;  %v1597_v48 = vsel %vm814_vm15, %v1581_v21, %v1596_v8 }
 0x2c6   : > { %v1697_v52 = vsel %vm814_vm15, %v5454_v34, %v6889_v57  ;;  %v1709_v18 = vsel %vm814_vm15, %v1693_v31, %v1708_v2  ;;  %v6890_v21 = vrot.slane %v5501_v5, 4  ;;  %v6891_v9 = vrot.slane %v5528_v38, 4 }
 0x2c7   : > { %v1534_v50 = vrot.slane %v5769_v45, 4  ;;  %v1582_v59 = vrot.slane %v1565_v44, 4  ;;  %v2155_v55 = vmul.f32 0.35355338, %v1697_v52  ;;  %v2371_v22 = vsel %vm2214_vm0, %v2190_v11, 0 }
 0x2c8   : > { %v1427_v43 = vsel %vm814_vm15, %v6890_v21, %v5420_v7  ;;  %v1825_v34 = vsel %vm814_vm15, %v5520_v26, %v6891_v9  ;;  %v1536_v36 = vrot.slane %v5766_v61, 4  ;;  %v2194_v24 = vpack.c.bf16 %v1597_v48, %v1597_v48 }
 0x2c9   : > { %v1535_v16 = vsel %vm814_vm15, %v1534_v50, %v5766_v61  ;;  %v2171_v4 = vpack.c.bf16 %v2155_v55, %v2155_v55  ;;  %v2195_v42 = vpack.c.bf16 %v1709_v18, %v1709_v18  ;;  %v1845_v5 = vperm.slane %v5552_v17, %v5032_v51 }
 0x2ca   : > { %v1541_v31 = vperm.slane %v1535_v16, %v5046_v10  ;;  %v1846_v7 = vrot.slane %v1427_v43, 4  ;;  %v1833_v38 = vperm.slane %v1825_v34, %v5032_v51  ;;  %v6892_v54 = vrot.slane %v5532_v58, 4 }
 0x2cb   : > { %2380 = vmatpush.bf16.xpose.msra.mxu2 %v2371_v22  ;;  %v6893_v6 = vrot.slane %v5544_v15, 4  ;;  %v1761_v1 = vsel %vm814_vm15, %v5663_v60, %v1760_v29  ;;  %v1882_v61 = vrot.slane %v1845_v5, 4  ;;  %v6895_v15 = vrot.slane %v5284_v47, 4 }
 0x2cc   : > { %v1849_v26 = vsel %vm814_vm15, %v1427_v43, %v6892_v54  ;;  %v1583_v37 = vsel %vm814_vm15, %v1582_v59, %v1541_v31  ;;  %v1584_v56 = vrot.slane %v1541_v31, 4  ;;  %v5811_v11 = vperm.slane %v1761_v1, %v5046_v10 }
 0x2cd   : > { %v1861_v12 = vsel %vm814_vm15, %v6894_v32, %v6893_v6  ;;  %v1857_v17 = vperm.slane %v1849_v26, %v5032_v51  ;;  %v2150_v27 = vmul.f32 0.35355338, %v1583_v37  ;;  %v1785_v48 = vsel %vm814_vm15, %v5322_v20, %v6895_v15 }
 0x2ce   : > { %v1869_v8 = vperm.slane %v1861_v12, %v5032_v51  ;;  %v1585_v57 = vsel %vm814_vm15, %v1565_v44, %v1584_v56  ;;  %v5819_v29 = vperm.slane %v1785_v48, %v5046_v10  ;;  %v1847_v52 = vsel %vm814_vm15, %v1846_v7, %v5532_v58  ;;  %4354 = vmatmul.msk.bf16.vlgmr.msrb.gmra.mxu3 %vm2214_vm0, %v2171_v4 }
 0x2cf   : > { %v2166_v2 = vpack.c.bf16 %v2150_v27, %v2150_v27  ;;  %v2154_v50 = vmul.f32 0.35355338, %v1585_v57  ;;  %v2466_v59 = vsel %vm2214_vm0, %v2195_v42, 0  ;;  %v1883_v55 = vsel %vm814_vm15, %v1882_v61, %v1833_v38 }
 0x2d0   : > { %v1906_v60 = vrot.slane %v1869_v8, 4  ;;  %v1889_v47 = vperm.slane %v1883_v55, %v5046_v10  ;;  %v1810_v44 = vrot.slane %v5819_v29, 4  ;;  %v5830_v22 = vperm.slane %v1847_v52, %v5032_v51  ;;  %2475 = vmatpush.bf16.xpose.msrb.mxu3 %v2466_v59 }
 0x2d1   : > { %4349 = vmatmul.msk.bf16.vlgmr.msrb.gmra.mxu1 %vm2214_vm0, %v2166_v2  ;;  %v2170_v58 = vpack.c.bf16 %v2154_v50, %v2154_v50  ;;  %v6896_v21 = vrot.slane %v5560_v23, 4  ;;  %v1884_v9 = vrot.slane %v1833_v38, 4  ;;  %v2447_v34 = vsel %vm2214_vm0, %v2194_v24, 0 }
 0x2d2   : > { %v1907_v20 = vsel %vm814_vm15, %v1906_v60, %v1857_v17  ;;  %v1928_v16 = vrot.slane %v1889_v47, 4  ;;  %v1811_v4 = vsel %vm814_vm15, %v1810_v44, %v5811_v11  ;;  %v6897_v31 = vrot.slane %v5619_v19, 4  ;;  %v6901_v44 = vld [vmem:[#allocation12_spill] sm:$0xff] }
 0x2d3   : > { %v1913_v18 = vperm.slane %v1907_v20, %v5046_v10  ;;  %v1871_v43 = vsel %vm814_vm15, %v6896_v21, %v5601_v3  ;;  %4353 = vmatmul.msk.bf16.vlgmr.msrb.gmra.mxu2 %vm2214_vm0, %v2170_v58  ;;  %v2160_v54 = vmul.f32 0.35355338, %v1811_v4  ;;  %v1885_v6 = vsel %vm814_vm15, %v1845_v5, %v1884_v9  ;;  %v6902_v9 = vld [vmem:[#allocation14_spill] sm:$0xff] }
 0x2d4   : > { %v1895_v42 = vsel %vm814_vm15, %v6897_v31, %v5830_v22  ;;  %v5847_v26 = vperm.slane %v1871_v43, %v5046_v10  ;;  %2456 = vmatpush.bf16.xpose.msrb.mxu2 %v2447_v34  ;;  %v1908_v32 = vrot.slane %v1857_v17, 4  ;;  %v1537_v12 = vsel %vm814_vm15, %v5769_v45, %v1536_v36 }
 0x2d5   : > { %v1926_v7 = vrot.slane %v1913_v18, 4  ;;  %v5850_v38 = vperm.slane %v1895_v42, %v5046_v10  ;;  %v1929_v24 = vsel %vm814_vm15, %v1913_v18, %v1928_v16  ;;  %v2176_v56 = vpack.c.bf16 %v2160_v54, %v2160_v54  ;;  %v6904_v16 = vld [vmem:[#allocation11_spill] sm:$0xff] }
 0x2d6   : > { %v2189_v37 = vpack.c.bf16 %v1929_v24, %v1929_v24  ;;  %v1909_v15 = vsel %vm814_vm15, %v1869_v8, %v1908_v32  ;;  %v5860_v48 = vperm.slane %v1537_v12, %v5046_v10  ;;  %v6898_v57 = vrot.slane %v5356_v13, 4 }
 0x2d7   : > { %v1927_v1 = vsel %vm814_vm15, %v1926_v7, %v1889_v47  ;;  %v1918_v27 = vrot.slane %v5850_v38, 4  ;;  %4359 = vmatmul.msk.bf16.vlgmr.msrb.gmra.mxu0 %vm2214_vm0, %v2176_v56  ;;  %v5871_v36 = vperm.slane %v1909_v15, %v5046_v10  ;;  %v1945_v60 = vsel %vm814_vm15, %v5678_v53, %v5650_v28  ;;  %v6899_v47 = vld [vmem:[#allocation13_spill] sm:$0xff] }
 0x2d8   : > { %v2185_v61 = vpack.c.bf16 %v1927_v1, %v1927_v1  ;;  %v1561_v5 = vsel %vm814_vm15, %v5339_v0, %v6898_v57  ;;  %v2352_v17 = vsel %vm2214_vm0, %v2189_v37, 0  ;;  %v1934_v0 = vsel %vm814_vm15, %v5671_v25, %v5636_v49 }
 0x2d9   : > { %v1919_v45 = vsel %vm814_vm15, %v1918_v27, %v5847_v26  ;;  %v1569_v8 = vperm.slane %v1561_v5, %v5046_v10  ;;  %v1940_v52 = vsel %vm814_vm15, %v1939_v63, %v5685_v14  ;;  %v5886_v2 = vperm.slane %v1885_v6, %v5046_v10 }
 0x2da   : > { %v2276_v13 = vsel %vm2214_vm0, %v2185_v61, 0  ;;  %v1930_v50 = vrot.slane %v5871_v36, 4  ;;  %v5890_v28 = vperm.slane %v1940_v52, %v5032_v51  ;;  %v1812_v53 = vrot.slane %v5811_v11, 4 }
 0x2db   : > { %2285 = vmatpush.bf16.xpose.msra.mxu1 %v2276_v13  ;;  %v1586_v59 = vrot.slane %v1569_v8, 4  ;;  %v2153_v55 = vmul.f32 0.35355338, %v1919_v45  ;;  %v5894_v49 = vperm.slane %v1934_v0, %v5032_v51  ;;  %v5898_v25 = vperm.slane %v5778_v62, %v5032_v51 }
 0x2dc   : > { %v1931_v14 = vsel %vm814_vm15, %v1930_v50, %v5886_v2  ;;  %v1956_v63 = vrot.slane %v5890_v28, 4  ;;  %v6900_v20 = vrot.slane %v6899_v47, 4  ;;  %v5910_v21 = vperm.slane %v1945_v60, %v5032_v51 }
 0x2dd   : > { %v1587_v40 = vsel %vm814_vm15, %v1586_v59, %v5860_v48  ;;  %v2193_v58 = vpack.c.bf16 %v1931_v14, %v1931_v14  ;;  %v1968_v62 = vrot.slane %v5898_v25, 4  ;;  %v6903_v34 = vrot.slane %v6902_v9, 4 }
 0x2de   : > { %v1649_v11 = vsel %vm814_vm15, %v6901_v44, %v6900_v20  ;;  %v2158_v18 = vmul.f32 0.35355338, %v1587_v40  ;;  %v1957_v43 = vsel %vm814_vm15, %v1956_v63, %v5894_v49  ;;  %v1988_v31 = vsel %vm814_vm15, %v5640_v30, %v5622_v39 }
 0x2df   : > { %v1673_v4 = vsel %vm814_vm15, %v6904_v16, %v6903_v34  ;;  %v6905_v42 = vrot.slane %v5656_v35, 4  ;;  %v2169_v54 = vpack.c.bf16 %v2153_v55, %v2153_v55  ;;  %v2428_v24 = vsel %vm2214_vm0, %v2193_v58, 0 }
 0x2e0   : > { %v1969_v6 = vsel %vm814_vm15, %v1968_v62, %v5910_v21  ;;  %v1657_v32 = vperm.slane %v1649_v11, %v5046_v10  ;;  %v1963_v12 = vperm.slane %v1957_v43, %v5046_v10  ;;  %v1681_v37 = vperm.slane %v1673_v4, %v5046_v10 }
 0x2e1   : > { %v1994_v7 = vsel %vm814_vm15, %v6905_v42, %v5666_v33  ;;  %v1975_v1 = vperm.slane %v1969_v6, %v5046_v10  ;;  %v2174_v30 = vpack.c.bf16 %v2158_v18, %v2158_v18  ;;  %v5937_v35 = vperm.slane %v1988_v31, %v5032_v51 }
 0x2e2   : > { %v5934_v39 = vperm.slane %v1994_v7, %v5032_v51  ;;  %v2009_v33 = vperm.slane %v5682_v41, %v5032_v51  ;;  %v1813_v56 = vsel %vm814_vm15, %v5819_v29, %v1812_v53  ;;  %4352 = vmatmul.msk.bf16.vlgmr.msra.gmra.mxu1 %vm2214_vm0, %v2169_v54  ;;  %v1698_v61 = vrot.slane %v1681_v37, 4 }
 0x2e3   : > { %2361 = vmatpush.bf16.xpose.msrb.mxu1 %v2352_v17  ;;  %v1980_v27 = vrot.slane %v1975_v1, 4  ;;  %v2164_v57 = vmul.f32 0.35355338, %v1813_v56  ;;  %v2003_v5 = vperm.slane %v5669_v46, %v5032_v51  ;;  %v1588_v45 = vrot.slane %v5860_v48, 4  ;;  %4357 = vmatmul.msk.bf16.vlgmr.msra.gmra.mxu2 %vm2214_vm0, %v2174_v30 }
 0x2e4   : > { %v2010_v15 = vrot.slane %v5934_v39, 4  ;;  %v2022_v17 = vrot.slane %v2009_v33, 4  ;;  %v1699_v29 = vsel %vm814_vm15, %v1698_v61, %v1657_v32  ;;  %v1920_v13 = vrot.slane %v5847_v26, 4 }
 0x2e5   : > { %v1981_v41 = vsel %vm814_vm15, %v1980_v27, %v1963_v12  ;;  %v2159_v52 = vmul.f32 0.35355338, %v1699_v29  ;;  %v1932_v46 = vrot.slane %v5886_v2, 4  ;;  %v2180_v53 = vpack.c.bf16 %v2164_v57, %v2164_v57 }
 0x2e6   : > { %v2011_v60 = vsel %vm814_vm15, %v2010_v15, %v5937_v35  ;;  %v2198_v0 = vpack.c.bf16 %v1981_v41, %v1981_v41  ;;  %v2023_v50 = vsel %vm814_vm15, %v2022_v17, %v2003_v5  ;;  %v1589_v55 = vsel %vm814_vm15, %v1569_v8, %v1588_v45 }
 0x2e7   : > { %v2017_v59 = vperm.slane %v2011_v60, %v5046_v10  ;;  %v2029_v48 = vperm.slane %v2023_v50, %v5046_v10  ;;  %v2175_v40 = vpack.c.bf16 %v2159_v52, %v2159_v52  ;;  %4363 = vmatmul.msk.bf16.vlgmr.msra.gmra.mxu0 %vm2214_vm0, %v2180_v53  ;;  %v1700_v26 = vrot.slane %v1657_v32, 4 }
 0x2e8   : > { %v2924_v14 = vsel %vm2922_vm2, %v2198_v0, 0  ;;  %v1921_v2 = vsel %vm814_vm15, %v5850_v38, %v1920_v13  ;;  %v1982_v47 = vrot.slane %v1963_v12, 4  ;;  %v1933_v44 = vsel %vm814_vm15, %v5871_v36, %v1932_v46 }
 0x2e9   : > { %2933 = vmatpush.bf16.msra.mxu2 %v2924_v14  ;;  %v2034_v63 = vrot.slane %v2029_v48, 4  ;;  %4358 = vmatmul.msk.bf16.vlgmr.msra.gmra.mxu3 %vm2214_vm0, %v2175_v40  ;;  %v1701_v8 = vsel %vm814_vm15, %v1681_v37, %v1700_v26  ;;  %v2157_v58 = vmul.f32 0.35355338, %v1921_v2  ;;  %v1896_v18 = vrot.slane %v5830_v22, 4 }
 0x2ea   : > { %v2197_v43 = vpack.c.bf16 %v1933_v44, %v1933_v44  ;;  %v1983_v9 = vsel %vm814_vm15, %v1975_v1, %v1982_v47  ;;  %v2162_v34 = vmul.f32 0.35355338, %v1589_v55  ;;  %v2036_v38 = vrot.slane %v2017_v59, 4 }
 0x2eb   : > { %2437 = vmatpush.bf16.xpose.msra.mxu1 %v2428_v24  ;;  %v2035_v20 = vsel %vm814_vm15, %v2034_v63, %v2017_v59  ;;  %v1897_v16 = vsel %vm814_vm15, %v5619_v19, %v1896_v18  ;;  %v1872_v4 = vrot.slane %v5601_v3, 4  ;;  %v2173_v36 = vpack.c.bf16 %v2157_v58, %v2157_v58 }
 0x2ec   : > { %v2199_v11 = vpack.c.bf16 %v2035_v20, %v2035_v20  ;;  %v2202_v31 = vpack.c.bf16 %v1983_v9, %v1983_v9  ;;  %v2024_v42 = vrot.slane %v2003_v5, 4  ;;  %v1970_v7 = vrot.slane %v5910_v21, 4 }
 0x2ed   : > { %v2504_v22 = vsel %vm2214_vm0, %v2197_v43, 0  ;;  %v1905_v54 = vperm.slane %v1897_v16, %v5046_v10  ;;  %v2178_v24 = vpack.c.bf16 %v2162_v34, %v2162_v34  ;;  %v2037_v6 = vsel %vm814_vm15, %v2029_v48, %v2036_v38 }
 0x2ee   : > { %v2943_v62 = vsel %vm2922_vm2, %v2199_v11, 0  ;;  %v2012_v32 = vrot.slane %v5937_v35, 4  ;;  %v1958_v19 = vrot.slane %v5894_v49, 4  ;;  %v2163_v3 = vmul.f32 0.35355338, %v1701_v8 }
 0x2ef   : > { %2952 = vmatpush.bf16.msra.mxu3 %v2943_v62  ;;  %v2025_v12 = vsel %vm814_vm15, %v2009_v33, %v2024_v42  ;;  %v1971_v21 = vsel %vm814_vm15, %v5898_v25, %v1970_v7  ;;  %v3000_v1 = vsel %vm2922_vm2, %v2202_v31, 0  ;;  %v1873_v37 = vsel %vm814_vm15, %v5560_v23, %v1872_v4 }
 0x2f0   : > { %v2033_v30 = vperm.slane %v2025_v12, %v5046_v10  ;;  %v1979_v35 = vperm.slane %v1971_v21, %v5046_v10  ;;  %v2203_v49 = vpack.c.bf16 %v2037_v6, %v2037_v6  ;;  %v1922_v56 = vrot.slane %v1905_v54, 4 }
 0x2f1   : > { %v2013_v33 = vsel %vm814_vm15, %v5934_v39, %v2012_v32  ;;  %v1959_v25 = vsel %vm814_vm15, %v5890_v28, %v1958_v19  ;;  %v2179_v57 = vpack.c.bf16 %v2163_v3, %v2163_v3  ;;  %v1881_v23 = vperm.slane %v1873_v37, %v5046_v10 }
 0x2f2   : > { %4356 = vmatmul.msk.bf16.vlgmr.msrb.gmra.mxu1 %vm2214_vm0, %v2173_v36  ;;  %v2021_v27 = vperm.slane %v2013_v33, %v5046_v10  ;;  %v2038_v61 = vrot.slane %v2033_v30, 4  ;;  %v1967_v15 = vperm.slane %v1959_v25, %v5046_v10  ;;  %v1984_v5 = vrot.slane %v1979_v35, 4 }
 0x2f3   : > { %2513 = vmatpush.bf16.xpose.msrb.mxu1 %v2504_v22  ;;  %4361 = vmatmul.msk.bf16.vlgmr.msrb.gmra.mxu2 %vm2214_vm0, %v2178_v24  ;;  %v3019_v39 = vsel %vm2922_vm2, %v2203_v49, 0  ;;  %v1923_v28 = vsel %vm814_vm15, %v1922_v56, %v1881_v23  ;;  %v1924_v50 = vrot.slane %v1881_v23, 4 }
 0x2f4   : > { %3009 = vmatpush.bf16.msrb.mxu2 %v3000_v1  ;;  %v5998_v17 = vsel %vm814_vm15, %v2038_v61, %v2021_v27  ;;  %v1986_v45 = vrot.slane %v1967_v15, 4  ;;  %v2040_v41 = vrot.slane %v2021_v27, 4  ;;  %v6004_v29 = vsel %vm814_vm15, %v1984_v5, %v1967_v15 }
 0x2f5   : > { %v2161_v0 = vmul.f32 0.35355338, %v1923_v28  ;;  %v1925_v46 = vsel %vm814_vm15, %v1905_v54, %v1924_v50 }
 0x2f6   : > { %v6007_v60 = vsel %vm814_vm15, %v1979_v35, %v1986_v45  ;;  %v6010_v13 = vsel %vm814_vm15, %v2033_v30, %v2040_v41  ;;  %v2165_v59 = vmul.f32 0.35355338, %v1925_v46 }
 0x2f7   : > { %v2177_v52 = vpack.c.bf16 %v2161_v0, %v2161_v0  ;;  %v6077_v0 = vpop.permute.xlu0 %4540 }
 0x2f8   : > { %v2181_v48 = vpack.c.bf16 %v2165_v59, %v2165_v59 }
 0x2f9   : > { %4362 = vmatmul.msk.bf16.vlgmr.msrb.gmra.mxu3 %vm2214_vm0, %v2179_v57 }
 0x2fa   : > { %3028 = vmatpush.bf16.msrb.mxu3 %v3019_v39  ;;  %v6906_v39 = vld [vmem:[#allocation10_spill] sm:$0xff] }
 0x302   : > { %4360 = vmatmul.msk.bf16.vlgmr.msra.gmra.mxu1 %vm2214_vm0, %v2177_v52 }
 0x311   : > { %v2249_v53 = vpop.f32.mrf.mxu2 }
 0x312   : > { %4364 = vmatmul.msk.bf16.vlgmr.msrb.gmra.mxu1 %vm2214_vm0, %v2181_v48  ;;  %v2522_v55 = vsel %vm2214_vm0, %v2249_v53, -inf }
 0x313   : > { %2523 = vmax.xlane.f32.xlu2 %v2522_v55 }
 0x319   : > { %v2251_v14 = vpop.f32.mrf.mxu2 }
 0x33c   : > { %v6016_v40 = vpop.f32.mrf.mxu0 }
 0x33d   : > { %v2537_v63 = vsel %vm2214_vm0, %v6016_v40, -inf }
 0x33e   : > { %2538 = vmax.xlane.f32.xlu1 %v2537_v63 }
 0x341   : > { %v6020_v26 = vpop.f32.mrf.mxu3 }
 0x342   : > { %v2525_v2 = vsel %vm2214_vm0, %v6020_v26, -inf }
 0x343   : > { %2526 = vmax.xlane.f32.xlu2 %v2525_v2 }
 0x344   : > { %v2346_v47 = vpop.f32.mrf.mxu0 }
 0x349   : > { %v2270_v20 = vpop.f32.mrf.mxu3 }
 0x34e   : > { %v2230_v44 = vpop.f32.mrf.mxu1 }
 0x34f   : > { %v2519_v8 = vsel %vm2214_vm0, %v2230_v44, -inf }
 0x350   : > { %2520 = vmax.xlane.f32.xlu0 %v2519_v8 }
 0x351   : > { %v6025_v11 = vpop.f32.mrf.mxu3 }
 0x352   : > { %v2534_v18 = vsel %vm2214_vm0, %v6025_v11, -inf }
 0x354   : > { %v6027_v58 = vpop.f32.mrf.mxu0 }
 0x355   : > { %v2549_v19 = vsel %vm2214_vm0, %v6027_v58, -inf }
 0x356   : > { %v2232_v62 = vpop.f32.mrf.mxu1  ;;  %v6031_v43 = vpop.f32.mrf.mxu2 }
 0x357   : > { %v2531_v7 = vsel %vm2214_vm0, %v6031_v43, -inf }
 0x358   : > { %2535 = vmax.xlane.f32.xlu0 %v2534_v18 }
 0x359   : > { %v2327_v9 = vpop.f32.mrf.mxu3 }
 0x35c   : > { %v2422_v34 = vpop.f32.mrf.mxu0 }
 0x35e   : > { %v2308_v38 = vpop.f32.mrf.mxu2 }
 0x35f   : > { %v6033_v16 = vpop.f32.mrf.mxu1 }
 0x360   : > { %v2528_v4 = vsel %vm2214_vm0, %v6033_v16, -inf }
 0x361   : > { %2529 = vmax.xlane.f32.xlu1 %v2528_v4 }
 0x364   : > { %v6037_v36 = vpop.f32.mrf.mxu0 }
 0x366   : > { %v6039_v42 = vpop.f32.mrf.mxu2 }
 0x367   : > { %v2289_v31 = vpop.f32.mrf.mxu1  ;;  %v2543_v37 = vsel %vm2214_vm0, %v6039_v42, -inf }
 0x369   : > { %2532 = vmax.xlane.f32.xlu1 %v2531_v7 }
 0x36c   : > { %v6043_v22 = vpop.f32.mrf.mxu3  ;;  %v2498_v24 = vpop.f32.mrf.mxu0 }
 0x36d   : > { %v2546_v54 = vsel %vm2214_vm0, %v6043_v22, -inf }
 0x36e   : > { %2547 = vmax.xlane.f32.xlu2 %v2546_v54  ;;  %v2384_v32 = vpop.f32.mrf.mxu2 }
 0x36f   : > { %v6047_v6 = vpop.f32.mrf.mxu1 }
 0x370   : > { %v2540_v3 = vsel %vm2214_vm0, %v6047_v6, -inf }
 0x371   : > { %2550 = vmax.xlane.f32.xlu1 %v2549_v19  ;;  %2541 = vmax.xlane.f32.xlu0 %v2540_v3 }
 0x374   : > { %v2403_v12 = vpop.f32.mrf.mxu3 }
 0x376   : > { %v6053_v1 = vpop.f32.mrf.mxu2 }
 0x377   : > { %v2365_v21 = vpop.f32.mrf.mxu1  ;;  %v2555_v33 = vsel %vm2214_vm0, %v6053_v1, -inf }
 0x379   : > { %2544 = vmax.xlane.f32.xlu0 %v2543_v37 }
 0x37c   : > { %v6057_v30 = vpop.f32.mrf.mxu3 }
 0x37d   : > { %v2558_v35 = vsel %vm2214_vm0, %v6057_v30, -inf }
 0x37e   : > { %2559 = vmax.xlane.f32.xlu1 %v2558_v35  ;;  %v2460_v49 = vpop.f32.mrf.mxu2 }
 0x37f   : > { %v6061_v56 = vpop.f32.mrf.mxu1 }
 0x380   : > { %v2552_v25 = vsel %vm2214_vm0, %v6061_v56, -inf }
 0x381   : > { %2556 = vmax.xlane.f32.xlu0 %v2555_v33  ;;  %2553 = vmax.xlane.f32.xlu2 %v2552_v25 }
 0x384   : > { %v2479_v27 = vpop.f32.mrf.mxu3 }
 0x386   : > { %v2524_v15 = vpop.xlane.xlu2 %2523 }
 0x387   : > { %v2441_v61 = vpop.f32.mrf.mxu1  ;;  %v2568_v57 = vsub.f32 %v2249_v53, %v2524_v15 }
 0x389   : > { %v2585_v5 = vmul.f32 1.442695, %v2568_v57 }
 0x38b   : > { %4602 = vpow2.f32 %v2585_v5 }
 0x38f   : > { %v6067_v23 = vpop.f32.mrf.mxu1 }
 0x390   : > { %v2564_v21 = vsel %vm2214_vm0, %v6067_v23, -inf }
 0x391   : > { %v6069_v45 = vpop.eup %4602 }
 0x392   : > { %v2618_v28 = vsel %vm2214_vm0, %v6069_v45, 0.0 }
 0x393   : > { %2619 = vadd.xlane.f32.xlu0 %v2618_v28 }
 0x397   : > { %v2517_v41 = vpop.f32.mrf.mxu1  ;;  %4545 = vrot.lane.b32.xlu1 %v6906_v39, %s4797_s22 }
 0x3a7   : > { %4555 = vrot.lane.b32.xlu0 %v6906_v39, %s4799_s28 }
 0x3b1   : > { %v6079_v59 = vpop.xlane.xlu1 %2538 }
 0x3b6   : > { %v2527_v55 = vpop.xlane.xlu2 %2526 }
 0x3b7   : > { %v2569_v47 = vsub.f32 %v6020_v26, %v2527_v55 }
 0x3c3   : > { %v2521_v52 = vpop.xlane.xlu0 %2520 }
 0x3c4   : > { %v2567_v50 = vsub.f32 %v2230_v44, %v2521_v52  ;;  %v2587_v44 = vmul.f32 1.442695, %v2569_v47 }
 0x3c6   : > { %v2583_v46 = vmul.f32 1.442695, %v2567_v50 }
 0x3c8   : > { %4604 = vpow2.f32 %v2583_v46 }
 0x3cb   : > { %v2536_v48 = vpop.xlane.xlu0 %2535 }
 0x3cc   : > { %v2572_v53 = vsub.f32 %v6025_v11, %v2536_v48 }
 0x3ce   : > { %v6082_v14 = vpop.eup %4604  ;;  %v2593_v63 = vmul.f32 1.442695, %v2572_v53  ;;  %v2573_v53 = vsub.f32 %v6016_v40, %v6079_v59 }
 0x3cf   : > { %v2615_v2 = vsel %vm2214_vm0, %v6082_v14, 0.0 }
 0x3d0   : > { %2616 = vadd.xlane.f32.xlu2 %v2615_v2  ;;  %4606 = vpow2.f32 %v2593_v63  ;;  %v2561_v63 = vsel %vm2214_vm0, %v6037_v36, -inf }
 0x3d1   : > { %4608 = vpow2.f32 %v2587_v44 }
 0x3d4   : > { %v2530_v20 = vpop.xlane.xlu1 %2529 }
 0x3d5   : > { %v2570_v52 = vsub.f32 %v6033_v16, %v2530_v20  ;;  %v2595_v16 = vmul.f32 1.442695, %v2573_v53 }
 0x3d6   : > { %v6087_v8 = vpop.eup %4606 }
 0x3d7   : > { %v2630_v18 = vsel %vm2214_vm0, %v6087_v8, 0.0  ;;  %v6092_v9 = vpop.eup %4608  ;;  %v2589_v48 = vmul.f32 1.442695, %v2570_v52  ;;  %v4542_v52 = vunpack.i.l.bf16 %v6077_v0 }
 0x3d8   : > { %2631 = vadd.xlane.f32.xlu0 %v2630_v18  ;;  %v2621_v4 = vsel %vm2214_vm0, %v6092_v9, 0.0 }
 0x3dc   : > { %v2533_v11 = vpop.xlane.xlu1 %2532 }
 0x3dd   : > { %v2571_v62 = vsub.f32 %v6031_v43, %v2533_v11 }
 0x3df   : > { %v2591_v34 = vmul.f32 1.442695, %v2571_v62 }
 0x3e0   : > { %2622 = vadd.xlane.f32.xlu0 %v2621_v4 }
 0x3e1   : > { %4610 = vpow2.f32 %v2591_v34  ;;  %v2548_v38 = vpop.xlane.xlu2 %2547 }
 0x3e2   : > { %v2576_v26 = vsub.f32 %v6043_v22, %v2548_v38 }
 0x3e4   : > { %v2601_v31 = vmul.f32 1.442695, %v2576_v26  ;;  %v2542_v7 = vpop.xlane.xlu0 %2541  ;;  %v2551_v35 = vpop.xlane.xlu1 %2550 }
 0x3e5   : > { %v2574_v3 = vsub.f32 %v6047_v6, %v2542_v7 }
 0x3e6   : > { %4612 = vpow2.f32 %v2601_v31 }
 0x3e7   : > { %v6097_v54 = vpop.eup %4610  ;;  %v2597_v37 = vmul.f32 1.442695, %v2574_v3  ;;  %v2207_v3 = vpack.c.bf16 %v5998_v17, %v5998_v17 }
 0x3e8   : > { %v2627_v24 = vsel %vm2214_vm0, %v6097_v54, 0.0  ;;  %4550 = vrot.lane.b32.xlu2 %v6906_v39, %s4796_s21 }
 0x3e9   : > { %2628 = vadd.xlane.f32.xlu1 %v2627_v24 }
 0x3ec   : > { %v6103_v43 = vpop.eup %4612  ;;  %v2545_v32 = vpop.xlane.xlu0 %2544 }
 0x3ed   : > { %v2575_v22 = vsub.f32 %v6039_v42, %v2545_v32  ;;  %v2642_v19 = vsel %vm2214_vm0, %v6103_v43, 0.0  ;;  %v2577_v42 = vsub.f32 %v6027_v58, %v2551_v35 }
 0x3ee   : > { %2643 = vadd.xlane.f32.xlu0 %v2642_v19 }
 0x3ef   : > { %v2599_v12 = vmul.f32 1.442695, %v2575_v22  ;;  %v2603_v57 = vmul.f32 1.442695, %v2577_v42 }
 0x3f1   : > { %4614 = vpow2.f32 %v2599_v12  ;;  %2565 = vmax.xlane.f32.xlu1 %v2564_v21  ;;  %v2560_v2 = vpop.xlane.xlu1 %2559  ;;  %v3095_v21 = vsel %vm2922_vm2, %v2207_v3, 0 }
 0x3f2   : > { %4616 = vpow2.f32 %v2597_v37  ;;  %v2580_v20 = vsub.f32 %v6057_v30, %v2560_v2 }
 0x3f4   : > { %v2557_v49 = vpop.xlane.xlu0 %2556  ;;  %v2554_v33 = vpop.xlane.xlu2 %2553  ;;  %v2609_v40 = vmul.f32 1.442695, %v2580_v20 }
 0x3f5   : > { %v2579_v25 = vsub.f32 %v6053_v1, %v2557_v49  ;;  %v2578_v6 = vsub.f32 %v6061_v56, %v2554_v33 }
 0x3f7   : > { %v6112_v27 = vpop.eup %4614  ;;  %v2607_v61 = vmul.f32 1.442695, %v2579_v25  ;;  %v2605_v5 = vmul.f32 1.442695, %v2578_v6 }
 0x3f8   : > { %v2639_v15 = vsel %vm2214_vm0, %v6112_v27, 0.0  ;;  %v6118_v41 = vpop.eup %4616 }
 0x3f9   : > { %2640 = vadd.xlane.f32.xlu1 %v2639_v15  ;;  %4618 = vpow2.f32 %v2607_v61  ;;  %v2636_v58 = vsel %vm2214_vm0, %v6118_v41, 0.0 }
 0x3fa   : > { %4620 = vpow2.f32 %v2603_v57 }
 0x3fb   : > { %4622 = vpow2.f32 %v2605_v5 }
 0x3fc   : > { %4624 = vpow2.f32 %v2589_v48 }
 0x3ff   : > { %v6120_v39 = vpop.eup %4618 }
 0x400   : > { %v2651_v1 = vsel %vm2214_vm0, %v6120_v39, 0.0  ;;  %v6126_v56 = vpop.eup %4620 }
 0x401   : > { %2637 = vadd.xlane.f32.xlu1 %v2636_v58  ;;  %2652 = vadd.xlane.f32.xlu0 %v2651_v1  ;;  %v6128_v28 = vpop.eup %4622  ;;  %v2645_v50 = vsel %vm2214_vm0, %v6126_v56, 0.0  ;;  %v4543_v1 = vunpack.i.h.bf16 %v6077_v0 }
 0x402   : > { %v2648_v46 = vsel %vm2214_vm0, %v6128_v28, 0.0  ;;  %v6139_v47 = vpop.eup %4624 }
 0x403   : > { %v2624_v18 = vsel %vm2214_vm0, %v6139_v47, 0.0 }
 0x406   : > { %v2620_v55 = vpop.xlane.xlu0 %2619 }
 0x407   : > { %4626 = vrcp.f32 %v2620_v55  ;;  %v2688_v31 = vand.u32 2147483648, %v2620_v55  ;;  %vm2682_vm4 = vweird.f32 %v2620_v55  ;;  %v2686_v7 = vand.u32 2147483647, %v2620_v55 }
 0x408   : > { %4628 = vpow2.f32 %v2595_v16  ;;  %v1264_v16 = vrot.slane %v4542_v52, 4 }
 0x409   : > { %2646 = vadd.xlane.f32.xlu1 %v2645_v50  ;;  %2649 = vadd.xlane.f32.xlu0 %v2648_v46  ;;  %4630 = vpow2.f32 %v2609_v40  ;;  %v2689_v32 = vor.u32 1.1754944e-38, %v2688_v31  ;;  %vm2687_vm6 = vcmp.eq.f32.partialorder %v2686_v7, 8.507059e+37  ;;  %v4546_v37 = vpop.permute.xlu1 %4545 }
 0x40a   : > { %v4548_v49 = vunpack.i.h.bf16 %v4546_v37  ;;  %v4547_v25 = vunpack.i.l.bf16 %v4546_v37 }
 0x40c   : > { %v1444_v61 = vrot.slane %v4548_v49, 4  ;;  %v1276_v15 = vrot.slane %v4547_v25, 4 }
 0x40d   : > { %v4627_v44 = vpop.eup %4626 }
 0x40e   : > { %v2678_v59 = vmul.f32 %v4627_v44, %v2620_v55  ;;  %v6144_v11 = vpop.eup %4628  ;;  %vm2683_vm3 = vweird.f32 %v4627_v44 }
 0x40f   : > { %v2633_v34 = vsel %vm2214_vm0, %v6144_v11, 0.0  ;;  %v6148_v26 = vpop.eup %4630  ;;  %vm2684_vm5 = vmor %vm2682_vm4, %vm2683_vm3 }
 0x410   : > { %v2679_v62 = vsub.f32 1.0, %v2678_v59  ;;  %v2654_v30 = vsel %vm2214_vm0, %v6148_v26, 0.0 }
 0x411   : > { %2562 = vmax.xlane.f32.xlu2 %v2561_v63  ;;  %v1432_v63 = vrot.slane %v4543_v1, 4 }
 0x412   : > { %v2680_v38 = vmul.f32 %v4627_v44, %v2679_v62 }
 0x414   : > { %v2681_v4 = vadd.f32 %v4627_v44, %v2680_v38 }
 0x416   : > { %v2685_v24 = vsel %vm2684_vm5, %v4627_v44, %v2681_v4 }
 0x417   : > { %v2690_v22 = vsel %vm2687_vm6, %v2689_v32, %v2685_v24 }
 0x418   : > { %v2888_v19 = vmul.f32 %v6069_v45, %v2690_v22 }
 0x419   : > { %2625 = vadd.xlane.f32.xlu2 %v2624_v18  ;;  %v4556_v35 = vpop.permute.xlu0 %4555 }
 0x41a   : > { %v2904_v12 = vpack.c.bf16 %v2888_v19, %v2888_v19  ;;  %v4558_v33 = vunpack.i.h.bf16 %v4556_v35  ;;  %v4557_v42 = vunpack.i.l.bf16 %v4556_v35 }
 0x41c   : > { %4366 = vmatmul.msk.bf16.vlgmr.msra.gmra.mxu3 %vm2214_vm0, %v2904_v12  ;;  %v1442_v6 = vrot.slane %v4558_v33, 4  ;;  %v1445_v45 = vsel %vm814_vm15, %v4558_v33, %v1444_v61  ;;  %v1274_v17 = vrot.slane %v4557_v42, 4  ;;  %v1277_v5 = vsel %vm814_vm15, %v4557_v42, %v1276_v15 }
 0x41d   : > { %3104 = vmatpush.bf16.msra.mxu3 %v3095_v21  ;;  %v1453_v50 = vperm.slane %v1445_v45, %v5032_v51  ;;  %v1285_v46 = vperm.slane %v1277_v5, %v5032_v51 }
 0x41e   : > { %v1443_v58 = vsel %vm814_vm15, %v1442_v6, %v4548_v49  ;;  %v1275_v53 = vsel %vm814_vm15, %v1274_v17, %v4547_v25 }
 0x41f   : > { %v1449_v48 = vperm.slane %v1443_v58, %v5032_v51  ;;  %v1466_v20 = vrot.slane %v1453_v50, 4  ;;  %v1281_v18 = vperm.slane %v1275_v53, %v5032_v51  ;;  %v1298_v40 = vrot.slane %v1285_v46, 4 }
 0x421   : > { %2634 = vadd.xlane.f32.xlu2 %v2633_v34  ;;  %v1454_v4 = vrot.slane %v1449_v48, 4  ;;  %v1286_v3 = vrot.slane %v1281_v18, 4 }
 0x429   : > { %2655 = vadd.xlane.f32.xlu2 %v2654_v30 }
 0x443   : > { %v2617_v57 = vpop.xlane.xlu2 %2616 }
 0x444   : > { %4632 = vrcp.f32 %v2617_v57  ;;  %v2672_v34 = vand.u32 2147483647, %v2617_v57  ;;  %v2674_v38 = vand.u32 2147483648, %v2617_v57  ;;  %vm2668_vm8 = vweird.f32 %v2617_v57 }
 0x446   : > { %vm2673_vm10 = vcmp.eq.f32.partialorder %v2672_v34, 8.507059e+37  ;;  %v2675_v25 = vor.u32 1.1754944e-38, %v2674_v38 }
 0x44a   : > { %v4633_v55 = vpop.eup %4632 }
 0x44b   : > { %v2664_v2 = vmul.f32 %v4633_v55, %v2617_v57  ;;  %v4551_v44 = vpop.permute.xlu2 %4550  ;;  %vm2669_vm7 = vweird.f32 %v4633_v55 }
 0x44c   : > { %v4553_v59 = vunpack.i.h.bf16 %v4551_v44  ;;  %v4552_v62 = vunpack.i.l.bf16 %v4551_v44  ;;  %vm2670_vm9 = vmor %vm2668_vm8, %vm2669_vm7 }
 0x44d   : > { %v2665_v0 = vsub.f32 1.0, %v2664_v2 }
 0x44e   : > { %v1430_v30 = vrot.slane %v4553_v59, 4  ;;  %v1262_v31 = vrot.slane %v4552_v62, 4  ;;  %v1265_v7 = vsel %vm814_vm15, %v4552_v62, %v1264_v16  ;;  %v1433_v24 = vsel %vm814_vm15, %v4553_v59, %v1432_v63 }
 0x44f   : > { %v2666_v32 = vmul.f32 %v4633_v55, %v2665_v0  ;;  %v1273_v22 = vperm.slane %v1265_v7, %v5032_v51  ;;  %v1441_v19 = vperm.slane %v1433_v24, %v5032_v51 }
 0x450   : > { %v1263_v12 = vsel %vm814_vm15, %v1262_v31, %v4542_v52  ;;  %v1431_v21 = vsel %vm814_vm15, %v1430_v30, %v4543_v1 }
 0x451   : > { %v2667_v37 = vadd.f32 %v4633_v55, %v2666_v32  ;;  %v1269_v35 = vperm.slane %v1263_v12, %v5032_v51  ;;  %v1299_v49 = vsel %vm814_vm15, %v1298_v40, %v1273_v22  ;;  %v1300_v33 = vrot.slane %v1273_v22, 4 }
 0x452   : > { %v1437_v42 = vperm.slane %v1431_v21, %v5032_v51  ;;  %v1468_v61 = vrot.slane %v1441_v19, 4  ;;  %v1305_v5 = vperm.slane %v1299_v49, %v5046_v10  ;;  %v1467_v1 = vsel %vm814_vm15, %v1466_v20, %v1441_v19 }
 0x453   : > { %v2671_v6 = vsel %vm2670_vm9, %v4633_v55, %v2667_v37  ;;  %v1287_v15 = vsel %vm814_vm15, %v1286_v3, %v1269_v35  ;;  %v1288_v57 = vrot.slane %v1269_v35, 4  ;;  %v1301_v45 = vsel %vm814_vm15, %v1285_v46, %v1300_v33  ;;  %v6206_v33 = vpop.xlane.xlu0 %2631 }
 0x454   : > { %v2676_v17 = vsel %vm2673_vm10, %v2675_v25, %v2671_v6  ;;  %v1309_v58 = vperm.slane %v1301_v45, %v5046_v10  ;;  %v1293_v53 = vperm.slane %v1287_v15, %v5046_v10  ;;  %v1455_v63 = vsel %vm814_vm15, %v1454_v4, %v1437_v42 }
 0x455   : > { %v1289_v52 = vsel %vm814_vm15, %v1281_v18, %v1288_v57  ;;  %v1456_v16 = vrot.slane %v1437_v42, 4  ;;  %v2887_v55 = vmul.f32 %v6082_v14, %v2676_v17  ;;  %v2206_v46 = vpack.c.bf16 %v6004_v29, %v6004_v29 }
 0x456   : > { %v1297_v2 = vperm.slane %v1289_v52, %v5046_v10  ;;  %v1316_v44 = vrot.slane %v1309_v58, 4  ;;  %v1461_v59 = vperm.slane %v1455_v63, %v5046_v10  ;;  %v1469_v20 = vsel %vm814_vm15, %v1453_v50, %v1468_v61 }
 0x457   : > { %v1457_v40 = vsel %vm814_vm15, %v1449_v48, %v1456_v16  ;;  %v1473_v18 = vperm.slane %v1467_v1, %v5046_v10  ;;  %v1314_v0 = vrot.slane %v1305_v5, 4  ;;  %v1310_v38 = vrot.slane %v1293_v53, 4 }
 0x458   : > { %v1312_v62 = vrot.slane %v1297_v2, 4  ;;  %v1317_v34 = vsel %vm814_vm15, 0.0, %v1316_v44  ;;  %v1465_v14 = vperm.slane %v1457_v40, %v5046_v10  ;;  %v1477_v4 = vperm.slane %v1469_v20, %v5046_v10 }
 0x459   : > { %v2058_v31 = vrot.slane %v1317_v34, 4  ;;  %v2903_v48 = vpack.c.bf16 %v2887_v55, %v2887_v55  ;;  %v1478_v7 = vrot.slane %v1461_v59, 4  ;;  %v1482_v24 = vrot.slane %v1473_v18, 4 }
 0x45a   : > { %v1313_v30 = vsel %vm814_vm15, 0.0, %v1312_v62  ;;  %v1480_v29 = vrot.slane %v1465_v14, 4  ;;  %v1484_v32 = vrot.slane %v1477_v4, 4  ;;  %v1315_v19 = vsel %vm814_vm15, 0.0, %v1314_v0 }
 0x45b   : > { %v2047_v50 = vrot.slane %v1313_v30, 4  ;;  %4365 = vmatmul.msk.bf16.vlgmr.msra.gmra.mxu2 %vm2214_vm0, %v2903_v48  ;;  %v3076_v12 = vsel %vm2922_vm2, %v2206_v46, 0  ;;  %v1311_v21 = vsel %vm814_vm15, 0.0, %v1310_v38  ;;  %v2059_v35 = vsel %vm814_vm15, %v2058_v31, %v1315_v19 }
 0x45c   : > { %v6196_v22 = vpop.xlane.xlu1 %2628  ;;  %v1481_v3 = vsel %vm814_vm15, 0.0, %v1480_v29  ;;  %v1485_v37 = vsel %vm814_vm15, 0.0, %v1484_v32  ;;  %3085 = vmatpush.bf16.msra.mxu2 %v3076_v12  ;;  %v2053_v25 = vsel %vm814_vm15, %v1316_v44, %v1305_v5  ;;  %v2042_v61 = vsel %vm814_vm15, %v1312_v62, %v1293_v53 }
 0x45d   : > { %4634 = vrcp.f32 %v6196_v22  ;;  %v2101_v49 = vrot.slane %v1481_v3, 4  ;;  %v2112_v42 = vrot.slane %v1485_v37, 4  ;;  %v2048_v6 = vsel %vm814_vm15, %v2047_v50, %v1311_v21 }
 0x45e   : > { %v1479_v15 = vsel %vm814_vm15, 0.0, %v1478_v7  ;;  %v1483_v57 = vsel %vm814_vm15, 0.0, %v1482_v24  ;;  %v2107_v45 = vsel %vm814_vm15, %v1484_v32, %v1473_v18  ;;  %v6215_v17 = vperm.slane %v2048_v6, %v5032_v51  ;;  %v6256_v7 = vpop.xlane.xlu0 %2622 }
 0x45f   : > { %v2113_v58 = vsel %vm814_vm15, %v2112_v42, %v1483_v57  ;;  %v2728_v1 = vand.u32 2147483647, %v6196_v22  ;;  %v6220_v5 = vperm.slane %v2059_v35, %v5032_v51  ;;  %v2096_v52 = vsel %vm814_vm15, %v1480_v29, %v1461_v59 }
 0x460   : > { %v6224_v53 = vperm.slane %v2042_v61, %v5032_v51  ;;  %v6227_v63 = vperm.slane %v2053_v25, %v5032_v51  ;;  %v2064_v16 = vrot.slane %v6215_v17, 4  ;;  %v2102_v55 = vsel %vm814_vm15, %v2101_v49, %v1479_v15 }
 0x461   : > { %v2076_v44 = vrot.slane %v6220_v5, 4  ;;  %v6233_v46 = vperm.slane %v2102_v55, %v5032_v51  ;;  %v6236_v40 = vperm.slane %v2113_v58, %v5032_v51  ;;  %4636 = vrcp.f32 %v6206_v33 }
 0x462   : > { %v2730_v20 = vand.u32 2147483648, %v6196_v22  ;;  %v2065_v62 = vsel %vm814_vm15, %v2064_v16, %v6224_v53  ;;  %v6244_v0 = vperm.slane %v2096_v52, %v5032_v51  ;;  %v6253_v31 = vperm.slane %v2107_v45, %v5032_v51 }
 0x463   : > { %v4635_v2 = vpop.eup %4634  ;;  %v2071_v14 = vperm.slane %v2065_v62, %v5046_v10  ;;  %v2077_v38 = vsel %vm814_vm15, %v2076_v44, %v6227_v63  ;;  %v2118_v4 = vrot.slane %v6233_v46, 4  ;;  %v2130_v48 = vrot.slane %v6236_v40, 4 }
 0x464   : > { %v2720_v59 = vmul.f32 %v4635_v2, %v6196_v22  ;;  %v2566_v18 = vpop.xlane.xlu1 %2565  ;;  %v2083_v29 = vperm.slane %v2077_v38, %v5046_v10  ;;  %vm2725_vm11 = vweird.f32 %v4635_v2  ;;  %vm2724_vm12 = vweird.f32 %v6196_v22 }
 0x465   : > { %v2582_v34 = vsub.f32 %v6067_v23, %v2566_v18  ;;  %v2119_v23 = vsel %vm814_vm15, %v2118_v4, %v6244_v0  ;;  %v2090_v32 = vrot.slane %v2071_v14, 4  ;;  %v2131_v12 = vsel %vm814_vm15, %v2130_v48, %v6253_v31  ;;  %vm2726_vm13 = vmor %vm2724_vm12, %vm2725_vm11 }
 0x466   : > { %v2721_v30 = vsub.f32 1.0, %v2720_v59  ;;  %v2088_v19 = vrot.slane %v2083_v29, 4  ;;  %v2125_v3 = vperm.slane %v2119_v23, %v5046_v10  ;;  %v2137_v37 = vperm.slane %v2131_v12, %v5046_v10 }
 0x467   : > { %v2613_v24 = vmul.f32 1.442695, %v2582_v34  ;;  %v4637_v21 = vpop.eup %4636  ;;  %v2091_v35 = vsel %vm814_vm15, %v2083_v29, %v2090_v32  ;;  %v2731_v6 = vor.u32 1.1754944e-38, %v2730_v20  ;;  %vm2729_vm14 = vcmp.eq.f32.partialorder %v2728_v1, 8.507059e+37 }
 0x468   : > { %v2722_v50 = vmul.f32 %v4635_v2, %v2721_v30  ;;  %v2089_v25 = vsel %vm814_vm15, %v2088_v19, %v2071_v14  ;;  %v2204_v42 = vpack.c.bf16 %v2091_v35, %v2091_v35  ;;  %v2144_v61 = vrot.slane %v2125_v3, 4 }
 0x469   : > { %4638 = vpow2.f32 %v2613_v24  ;;  %v2200_v15 = vpack.c.bf16 %v2089_v25, %v2089_v25  ;;  %v2142_v57 = vrot.slane %v2137_v37, 4  ;;  %v2734_v45 = vmul.f32 %v4637_v21, %v6206_v33 }
 0x46a   : > { %v2723_v49 = vadd.f32 %v4635_v2, %v2722_v50  ;;  %v3038_v52 = vsel %vm2922_vm2, %v2204_v42, 0  ;;  %v2145_v16 = vsel %vm814_vm15, %v2137_v37, %v2144_v61  ;;  %v2210_v1 = vpack.c.bf16 %v6007_v60, %v6007_v60 }
 0x46b   : > { %v2962_v44 = vsel %vm2922_vm2, %v2200_v15, 0  ;;  %v2143_v59 = vsel %vm814_vm15, %v2142_v57, %v2125_v3  ;;  %v2205_v34 = vpack.c.bf16 %v2145_v16, %v2145_v16  ;;  %v2735_v14 = vsub.f32 1.0, %v2734_v45 }
 0x46c   : > { %v2727_v58 = vsel %vm2726_vm13, %v4635_v2, %v2723_v49  ;;  %v6269_v22 = vpop.xlane.xlu1 %2640  ;;  %2971 = vmatpush.bf16.msrb.mxu0 %v2962_v44  ;;  %v2201_v18 = vpack.c.bf16 %v2143_v59, %v2143_v59  ;;  %v6279_v2 = vpop.xlane.xlu0 %2643  ;;  %v2744_v4 = vand.u32 2147483648, %v6206_v33  ;;  %vm2739_vm3 = vweird.f32 %v4637_v21 }
 0x46d   : > { %v2732_v55 = vsel %vm2729_vm14, %v2731_v6, %v2727_v58  ;;  %4640 = vrcp.f32 %v6269_v22  ;;  %v3057_v60 = vsel %vm2922_vm2, %v2205_v34, 0  ;;  %v2736_v29 = vmul.f32 %v4637_v21, %v2735_v14 }
 0x46e   : > { %v2891_v20 = vmul.f32 %v6097_v54, %v2732_v55  ;;  %4642 = vrcp.f32 %v6256_v7  ;;  %v2981_v38 = vsel %vm2922_vm2, %v2201_v18, 0  ;;  %v2742_v48 = vand.u32 2147483647, %v6206_v33 }
 0x46f   : > { %v6281_v62 = vpop.eup %4638  ;;  %2990 = vmatpush.bf16.msra.mxu1 %v2981_v38  ;;  %v3152_v24 = vsel %vm2922_vm2, %v2210_v1, 0  ;;  %4644 = vrcp.f32 %v6279_v2  ;;  %v2737_v32 = vadd.f32 %v4637_v21, %v2736_v29  ;;  %vm2738_vm4 = vweird.f32 %v6206_v33 }
 0x470   : > { %3047 = vmatpush.bf16.msra.mxu0 %v3038_v52  ;;  %v2660_v54 = vsel %vm2214_vm0, %v6281_v62, 0.0  ;;  %v2907_v30 = vpack.c.bf16 %v2891_v20, %v2891_v20  ;;  %vm2740_vm5 = vmor %vm2738_vm4, %vm2739_vm3  ;;  %v2745_v19 = vor.u32 1.1754944e-38, %v2744_v4  ;;  %vm2743_vm6 = vcmp.eq.f32.partialorder %v2742_v48, 8.507059e+37 }
 0x471   : > { %2661 = vadd.xlane.f32.xlu1 %v2660_v54  ;;  %v2741_v12 = vsel %vm2740_vm5, %v4637_v21, %v2737_v32  ;;  %vm2780_vm7 = vweird.f32 %v6269_v22  ;;  %v2786_v42 = vand.u32 2147483648, %v6269_v22  ;;  %v2211_v61 = vpack.c.bf16 %v6010_v13, %v6010_v13 }
 0x472   : > { %4369 = vmatmul.msk.bf16.vlgmr.msrb.gmra.mxu2 %vm2214_vm0, %v2907_v30  ;;  %v2746_v35 = vsel %vm2743_vm6, %v2745_v19, %v2741_v12  ;;  %v2784_v21 = vand.u32 2147483647, %v6269_v22  ;;  %v2702_v45 = vand.u32 2147483648, %v6256_v7  ;;  %v2078_v20 = vrot.slane %v6227_v63, 4 }
 0x473   : > { %3066 = vmatpush.bf16.msrb.mxu1 %v3057_v60  ;;  %v4641_v23 = vpop.eup %4640  ;;  %3161 = vmatpush.bf16.msrb.mxu2 %v3152_v24  ;;  %v2892_v33 = vmul.f32 %v6087_v8, %v2746_v35  ;;  %v2700_v8 = vand.u32 2147483647, %v6256_v7  ;;  %v2787_v13 = vor.u32 1.1754944e-38, %v2786_v42  ;;  %v3171_v59 = vsel %vm2922_vm2, %v2211_v61, 0 }
 0x474   : > { %v2776_v50 = vmul.f32 %v4641_v23, %v6269_v22  ;;  %v4643_v3 = vpop.eup %4642  ;;  %v6296_v25 = vpop.xlane.xlu0 %2652  ;;  %vm2781_vm8 = vweird.f32 %v4641_v23  ;;  %vm2785_vm11 = vcmp.eq.f32.partialorder %v2784_v21, 8.507059e+37  ;;  %vm2696_vm12 = vweird.f32 %v6256_v7 }
 0x475   : > { %v2692_v49 = vmul.f32 %v4643_v3, %v6256_v7  ;;  %v4645_v6 = vpop.eup %4644  ;;  %v2908_v52 = vpack.c.bf16 %v2892_v33, %v2892_v33  ;;  %4646 = vrcp.f32 %v6296_v25  ;;  %vm2697_vm9 = vweird.f32 %v4643_v3  ;;  %vm2782_vm10 = vmor %vm2780_vm7, %vm2781_vm8 }
 0x476   : > { %v2777_v37 = vsub.f32 1.0, %v2776_v50  ;;  %v2790_v58 = vmul.f32 %v4645_v6, %v6279_v2  ;;  %vm2698_vm13 = vmor %vm2696_vm12, %vm2697_vm9  ;;  %v2703_v14 = vor.u32 1.1754944e-38, %v2702_v45  ;;  %v2798_v22 = vand.u32 2147483647, %v6279_v2 }
 0x477   : > { %v2693_v57 = vsub.f32 1.0, %v2692_v49  ;;  %4370 = vmatmul.msk.bf16.vlgmr.msrb.gmra.mxu3 %vm2214_vm0, %v2908_v52  ;;  %v2800_v38 = vand.u32 2147483648, %v6279_v2  ;;  %vm2701_vm14 = vcmp.eq.f32.partialorder %v2700_v8, 8.507059e+37  ;;  %v2066_v30 = vrot.slane %v6224_v53, 4 }
 0x478   : > { %v2778_v15 = vmul.f32 %v4641_v23, %v2777_v37  ;;  %v2791_v44 = vsub.f32 1.0, %v2790_v58  ;;  %3180 = vmatpush.bf16.msrb.mxu3 %v3171_v59  ;;  %vm2795_vm3 = vweird.f32 %v4645_v6  ;;  %v2079_v7 = vsel %vm814_vm15, %v6220_v5, %v2078_v20 }
 0x479   : > { %v2694_v55 = vmul.f32 %v4643_v3, %v2693_v57  ;;  %vm2794_vm4 = vweird.f32 %v6279_v2  ;;  %v2067_v50 = vsel %vm814_vm15, %v6215_v17, %v2066_v30  ;;  %v6327_v19 = vperm.slane %v2079_v7, %v5046_v10 }
 0x47a   : > { %v2779_v16 = vadd.f32 %v4641_v23, %v2778_v15  ;;  %v2792_v29 = vmul.f32 %v4645_v6, %v2791_v44  ;;  %vm2796_vm5 = vmor %vm2794_vm4, %vm2795_vm3  ;;  %vm2799_vm6 = vcmp.eq.f32.partialorder %v2798_v22, 8.507059e+37  ;;  %v2840_v12 = vand.u32 2147483647, %v6296_v25  ;;  %v6341_v15 = vpop.xlane.xlu1 %2637 }
 0x47b   : > { %v2695_v1 = vadd.f32 %v4643_v3, %v2694_v55  ;;  %v4647_v63 = vpop.eup %4646  ;;  %v2842_v37 = vand.u32 2147483648, %v6296_v25  ;;  %v2092_v42 = vrot.slane %v6327_v19, 4  ;;  %vm2836_vm8 = vweird.f32 %v6296_v25 }
 0x47c   : > { %v2783_v18 = vsel %vm2782_vm10, %v4641_v23, %v2779_v16  ;;  %v2793_v23 = vadd.f32 %v4645_v6, %v2792_v29  ;;  %v2832_v32 = vmul.f32 %v4647_v63, %v6296_v25  ;;  %vm2837_vm7 = vweird.f32 %v4647_v63  ;;  %v6372_v29 = vpop.xlane.xlu0 %2649 }
 0x47d   : > { %v2788_v34 = vsel %vm2785_vm11, %v2787_v13, %v2783_v18  ;;  %v2699_v54 = vsel %vm2698_vm13, %v4643_v3, %v2695_v1  ;;  %v6330_v3 = vperm.slane %v2067_v50, %v5046_v10  ;;  %vm2838_vm9 = vmor %vm2836_vm8, %vm2837_vm7  ;;  %v2843_v57 = vor.u32 1.1754944e-38, %v2842_v37 }
 0x47e   : > { %v2895_v4 = vmul.f32 %v6112_v27, %v2788_v34  ;;  %v2704_v60 = vsel %vm2701_vm14, %v2703_v14, %v2699_v54  ;;  %v2801_v27 = vor.u32 1.1754944e-38, %v2800_v38  ;;  %v2797_v5 = vsel %vm2796_vm5, %v4645_v6, %v2793_v23 }
 0x47f   : > { %v2889_v48 = vmul.f32 %v6092_v9, %v2704_v60  ;;  %v2833_v9 = vsub.f32 1.0, %v2832_v32  ;;  %v2093_v6 = vsel %vm814_vm15, %v2092_v42, %v6330_v3  ;;  %vm2841_vm10 = vcmp.eq.f32.partialorder %v2840_v12, 8.507059e+37 }
 0x480   : > { %v2911_v24 = vpack.c.bf16 %v2895_v4, %v2895_v4  ;;  %v2802_v2 = vsel %vm2799_vm6, %v2801_v27, %v2797_v5  ;;  %v2208_v45 = vpack.c.bf16 %v2093_v6, %v2093_v6  ;;  %v2132_v55 = vrot.slane %v6253_v31, 4 }
 0x481   : > { %v2905_v53 = vpack.c.bf16 %v2889_v48, %v2889_v48  ;;  %v2896_v35 = vmul.f32 %v6103_v43, %v2802_v2  ;;  %v2834_v17 = vmul.f32 %v4647_v63, %v2833_v9  ;;  %v2120_v59 = vrot.slane %v6244_v0, 4 }
 0x482   : > { %4373 = vmatmul.msk.bf16.vlgmr.msra.gmra.mxu2 %vm2214_vm0, %v2911_v24  ;;  %v3114_v16 = vsel %vm2922_vm2, %v2208_v45, 0  ;;  %v6355_v20 = vpop.xlane.xlu1 %2646  ;;  %vm2766_vm5 = vweird.f32 %v6341_v15  ;;  %v2770_v45 = vand.u32 2147483647, %v6341_v15 }
 0x483   : > { %4367 = vmatmul.msk.bf16.vlgmr.msrb.gmra.mxu0 %vm2214_vm0, %v2905_v53  ;;  %v2835_v61 = vadd.f32 %v4647_v63, %v2834_v17  ;;  %v2912_v43 = vpack.c.bf16 %v2896_v35, %v2896_v35  ;;  %v2121_v0 = vsel %vm814_vm15, %v6233_v46, %v2120_v59 }
 0x484   : > { %v2563_v49 = vpop.xlane.xlu2 %2562  ;;  %3123 = vmatpush.bf16.msrb.mxu0 %v3114_v16  ;;  %v6369_v4 = vperm.slane %v2121_v0, %v5046_v10 }
 0x485   : > { %v2581_v33 = vsub.f32 %v6037_v36, %v2563_v49  ;;  %v2839_v58 = vsel %vm2838_vm9, %v4647_v63, %v2835_v61  ;;  %v2094_v49 = vrot.slane %v6330_v3, 4 }
 0x486   : > { %v2844_v52 = vsel %vm2841_vm10, %v2843_v57, %v2839_v58  ;;  %vm2771_vm10 = vcmp.eq.f32.partialorder %v2770_v45, 8.507059e+37 }
 0x487   : > { %v2611_v21 = vmul.f32 1.442695, %v2581_v33  ;;  %v2899_v36 = vmul.f32 %v6120_v39, %v2844_v52  ;;  %4374 = vmatmul.msk.bf16.vlgmr.msra.gmra.mxu3 %vm2214_vm0, %v2912_v43  ;;  %v2133_v39 = vsel %vm814_vm15, %v6236_v40, %v2132_v55  ;;  %v2772_v43 = vand.u32 2147483648, %v6341_v15 }
 0x488   : > { %v6361_v1 = vperm.slane %v2133_v39, %v5046_v10  ;;  %v2095_v52 = vsel %vm814_vm15, %v6327_v19, %v2094_v49 }
 0x489   : > { %4648 = vpow2.f32 %v2611_v21  ;;  %v2915_v8 = vpack.c.bf16 %v2899_v36, %v2899_v36  ;;  %v2212_v39 = vpack.c.bf16 %v2095_v52, %v2095_v52 }
 0x48a   : > { %4650 = vrcp.f32 %v6341_v15  ;;  %v2146_v54 = vrot.slane %v6361_v1, 4 }
 0x48c   : > { %v2626_v25 = vpop.xlane.xlu2 %2625  ;;  %v2147_v23 = vsel %vm814_vm15, %v2146_v54, %v6369_v4 }
 0x48d   : > { %4652 = vrcp.f32 %v2626_v25  ;;  %v2716_v38 = vand.u32 2147483648, %v2626_v25  ;;  %v2714_v63 = vand.u32 2147483647, %v2626_v25  ;;  %vm2710_vm12 = vweird.f32 %v2626_v25 }
 0x48e   : > { %4654 = vrcp.f32 %v6355_v20  ;;  %v2209_v37 = vpack.c.bf16 %v2147_v23, %v2147_v23 }
 0x48f   : > { %v6348_v13 = vpop.eup %4648  ;;  %v2717_v24 = vor.u32 1.1754944e-38, %v2716_v38  ;;  %vm2715_vm14 = vcmp.eq.f32.partialorder %v2714_v63, 8.507059e+37 }
 0x490   : > { %v2657_v44 = vsel %vm2214_vm0, %v6348_v13, 0.0  ;;  %v6358_v18 = vpop.eup %4650 }
 0x491   : > { %2658 = vadd.xlane.f32.xlu2 %v2657_v44  ;;  %v2762_v40 = vmul.f32 %v6358_v18, %v6341_v15  ;;  %vm2767_vm4 = vweird.f32 %v6358_v18 }
 0x492   : > { %4377 = vmatmul.msk.bf16.vlgmr.msrb.gmra.mxu2 %vm2214_vm0, %v2915_v8  ;;  %vm6401_vm8 = vmor %vm2766_vm5, %vm2767_vm4 }
 0x493   : > { %v4653_v31 = vpop.eup %4652  ;;  %v2763_v60 = vsub.f32 1.0, %v2762_v40 }
 0x494   : > { %v2706_v34 = vmul.f32 %v4653_v31, %v2626_v25  ;;  %v2635_v14 = vpop.xlane.xlu2 %2634  ;;  %vm2711_vm11 = vweird.f32 %v4653_v31  ;;  %v6374_v7 = vpop.eup %4654 }
 0x495   : > { %4656 = vrcp.f32 %v2635_v14  ;;  %vm2712_vm13 = vmor %vm2710_vm12, %vm2711_vm11  ;;  %v2764_v50 = vmul.f32 %v6358_v18, %v2763_v60  ;;  %v2804_v5 = vmul.f32 %v6374_v7, %v6355_v20  ;;  %v2758_v35 = vand.u32 2147483648, %v2635_v14 }
 0x496   : > { %v2707_v22 = vsub.f32 1.0, %v2706_v34  ;;  %4658 = vrcp.f32 %v6372_v29  ;;  %v2756_v42 = vand.u32 2147483647, %v2635_v14  ;;  %vm2752_vm6 = vweird.f32 %v2635_v14 }
 0x497   : > { %v2765_v61 = vadd.f32 %v6358_v18, %v2764_v50  ;;  %v2805_v6 = vsub.f32 1.0, %v2804_v5  ;;  %v2759_v58 = vor.u32 1.1754944e-38, %v2758_v35  ;;  %vm2809_vm12 = vweird.f32 %v6374_v7 }
 0x498   : > { %v2708_v30 = vmul.f32 %v4653_v31, %v2707_v22  ;;  %vm2757_vm9 = vcmp.eq.f32.partialorder %v2756_v42, 8.507059e+37 }
 0x499   : > { %v2769_v15 = vsel %vm6401_vm8, %v6358_v18, %v2765_v61  ;;  %v2806_v55 = vmul.f32 %v6374_v7, %v2805_v6  ;;  %vm2822_vm8 = vweird.f32 %v6372_v29 }
 0x49a   : > { %v2709_v46 = vadd.f32 %v4653_v31, %v2708_v30  ;;  %v3190_v30 = vsel %vm2922_vm2, %v2212_v39, 0 }
 0x49b   : > { %v4657_v48 = vpop.eup %4656  ;;  %v2807_v38 = vadd.f32 %v6374_v7, %v2806_v55 }
 0x49c   : > { %v2713_v32 = vsel %vm2712_vm13, %v4653_v31, %v2709_v46  ;;  %v2748_v27 = vmul.f32 %v4657_v48, %v2635_v14  ;;  %v6379_v53 = vpop.xlane.xlu2 %2655  ;;  %vm2753_vm3 = vweird.f32 %v4657_v48  ;;  %v6389_v21 = vpop.eup %4658  ;;  %v2773_v31 = vor.u32 1.1754944e-38, %v2772_v43 }
 0x49d   : > { %v2718_v9 = vsel %vm2715_vm14, %v2717_v24, %v2713_v32  ;;  %4660 = vrcp.f32 %v6379_v53  ;;  %vm2754_vm7 = vmor %vm2752_vm6, %vm2753_vm3  ;;  %v2818_v19 = vmul.f32 %v6389_v21, %v6372_v29  ;;  %v2856_v34 = vand.u32 2147483648, %v6379_v53 }
 0x49e   : > { %v2890_v2 = vmul.f32 %v6139_v47, %v2718_v9  ;;  %v2749_v12 = vsub.f32 1.0, %v2748_v27  ;;  %v3133_v47 = vsel %vm2922_vm2, %v2209_v37, 0  ;;  %v2148_v14 = vrot.slane %v6369_v4, 4 }
 0x49f   : > { %v2854_v18 = vand.u32 2147483647, %v6379_v53  ;;  %v2774_v22 = vsel %vm2771_vm10, %v2773_v31, %v2769_v15  ;;  %v2819_v54 = vsub.f32 1.0, %v2818_v19  ;;  %vm2850_vm13 = vweird.f32 %v6379_v53  ;;  %v6443_v42 = vpop.f32.mrf.mxu3 }
 0x4a0   : > { %v2750_v17 = vmul.f32 %v4657_v48, %v2749_v12  ;;  %v2906_v33 = vpack.c.bf16 %v2890_v2, %v2890_v2  ;;  %vm2808_vm14 = vweird.f32 %v6355_v20  ;;  %v2814_v4 = vand.u32 2147483648, %v6355_v20 }
 0x4a1   : > { %v2857_v63 = vor.u32 1.1754944e-38, %v2856_v34  ;;  %v2149_v60 = vsel %vm814_vm15, %v6361_v1, %v2148_v14  ;;  %v2894_v46 = vmul.f32 %v6118_v41, %v2774_v22  ;;  %vm2855_vm4 = vcmp.eq.f32.partialorder %v2854_v18, 8.507059e+37  ;;  %vm2810_vm5 = vmor %vm2808_vm14, %vm2809_vm12 }
 0x4a2   : > { %v2751_v57 = vadd.f32 %v4657_v48, %v2750_v17  ;;  %4368 = vmatmul.msk.bf16.vlgmr.msra.gmra.mxu1 %vm2214_vm0, %v2906_v33  ;;  %v2811_v32 = vsel %vm2810_vm5, %v6374_v7, %v2807_v38  ;;  %v2820_v27 = vmul.f32 %v6389_v21, %v2819_v54  ;;  %v2213_v50 = vpack.c.bf16 %v2149_v60, %v2149_v60 }
 0x4a3   : > { %v4661_v3 = vpop.eup %4660  ;;  %3142 = vmatpush.bf16.msra.mxu1 %v3133_v47  ;;  %v2815_v5 = vor.u32 1.1754944e-38, %v2814_v4  ;;  %v2910_v1 = vpack.c.bf16 %v2894_v46, %v2894_v46  ;;  %v2828_v2 = vand.u32 2147483648, %v6372_v29  ;;  %v2826_v12 = vand.u32 2147483647, %v6372_v29 }
 0x4a4   : > { %v2755_v36 = vsel %vm2754_vm7, %v4657_v48, %v2751_v57  ;;  %v2846_v25 = vmul.f32 %v4661_v3, %v6379_v53  ;;  %vm2851_vm11 = vweird.f32 %v4661_v3  ;;  %v2812_v48 = vand.u32 2147483647, %v6355_v20 }
 0x4a5   : > { %v2760_v8 = vsel %vm2757_vm9, %v2759_v58, %v2755_v36  ;;  %vm2852_vm3 = vmor %vm2850_vm13, %vm2851_vm11  ;;  %v2821_v20 = vadd.f32 %v6389_v21, %v2820_v27  ;;  %vm2823_vm7 = vweird.f32 %v6389_v21  ;;  %v3209_v7 = vsel %vm2922_vm2, %v2213_v50, 0 }
 0x4a6   : > { %v2893_v44 = vmul.f32 %v6144_v11, %v2760_v8  ;;  %v2847_v59 = vsub.f32 1.0, %v2846_v25  ;;  %vm2813_vm6 = vcmp.eq.f32.partialorder %v2812_v48, 8.507059e+37  ;;  %vm2824_vm9 = vmor %vm2822_vm8, %vm2823_vm7  ;;  %v2829_v35 = vor.u32 1.1754944e-38, %v2828_v2 }
 0x4a7   : > { %v2816_v41 = vsel %vm2813_vm6, %v2815_v5, %v2811_v32  ;;  %v2825_v37 = vsel %vm2824_vm9, %v6389_v21, %v2821_v20  ;;  %vm2827_vm10 = vcmp.eq.f32.partialorder %v2826_v12, 8.507059e+37  ;;  %vm3716_vm6 = vcmask 130048  }
 0x4a8   : > { %v2848_v0 = vmul.f32 %v4661_v3, %v2847_v59  ;;  %v2909_v40 = vpack.c.bf16 %v2893_v44, %v2893_v44  ;;  %v2830_v17 = vsel %vm2827_vm10, %v2829_v35, %v2825_v37  ;;  %vm3721_vm7 = vcmask 195584  }
 0x4a9   : > { %v2898_v33 = vmul.f32 %v6128_v28, %v2830_v17 }
 0x4aa   : > { %v2849_v11 = vadd.f32 %v4661_v3, %v2848_v0  ;;  %4371 = vmatmul.msk.bf16.vlgmr.msra.gmra.mxu0 %vm2214_vm0, %v2909_v40 }
 0x4ab   : > { %3199 = vmatpush.bf16.msra.mxu0 %v3190_v30  ;;  %v2914_v61 = vpack.c.bf16 %v2898_v33, %v2898_v33 }
 0x4ac   : > { %v2853_v24 = vsel %vm2852_vm3, %v4661_v3, %v2849_v11 }
 0x4ad   : > { %v2858_v23 = vsel %vm2855_vm4, %v2857_v63, %v2853_v24 }
 0x4ae   : > { %v2900_v53 = vmul.f32 %v6148_v26, %v2858_v23  ;;  %v2897_v26 = vmul.f32 %v6126_v56, %v2816_v41  ;;  %v2956_v56 = vpop.f32.mrf.mxu3 }
 0x4b0   : > { %v2916_v9 = vpack.c.bf16 %v2900_v53, %v2900_v53  ;;  %v2913_v49 = vpack.c.bf16 %v2897_v26, %v2897_v26 }
 0x4b2   : > { %4372 = vmatmul.msk.bf16.vlgmr.msrb.gmra.mxu1 %vm2214_vm0, %v2910_v1  ;;  %4378 = vmatmul.msk.bf16.vlgmr.msrb.gmra.mxu3 %vm2214_vm0, %v2916_v9 }
 0x4b3   : > { %3218 = vmatpush.bf16.msrb.mxu1 %v3209_v7 }
 0x4ba   : > { %4375 = vmatmul.msk.bf16.vlgmr.msrb.gmra.mxu0 %vm2214_vm0, %v2913_v49 }
 0x4c2   : > { %4376 = vmatmul.msk.bf16.vlgmr.msra.gmra.mxu1 %vm2214_vm0, %v2914_v61 }
 0x4de   : > { %v2935_v6 = vpop.f32.mrf.mxu2 }
 0x4df   : > { %v3226_v22 = vrot.slane %v2935_v6, 4 }
 0x4e4   : > { %v2662_v57 = vpop.xlane.xlu1 %2661 }
 0x4e5   : > { %4662 = vrcp.f32 %v2662_v57  ;;  %v2884_v45 = vand.u32 2147483648, %v2662_v57  ;;  %v2882_v58 = vand.u32 2147483647, %v2662_v57  ;;  %vm2878_vm11 = vweird.f32 %v2662_v57 }
 0x4e6   : > { %v2937_v29 = vpop.f32.mrf.mxu2 }
 0x4e7   : > { %v2885_v16 = vor.u32 1.1754944e-38, %v2884_v45  ;;  %vm2883_vm13 = vcmp.eq.f32.partialorder %v2882_v58, 8.507059e+37 }
 0x4eb   : > { %v4663_v47 = vpop.eup %4662 }
 0x4ec   : > { %v2874_v21 = vmul.f32 %v4663_v47, %v2662_v57  ;;  %vm2879_vm2 = vweird.f32 %v4663_v47 }
 0x4ed   : > { %vm2880_vm12 = vmor %vm2878_vm11, %vm2879_vm2 }
 0x4ee   : > { %v2875_v3 = vsub.f32 1.0, %v2874_v21 }
 0x4f0   : > { %v2876_v43 = vmul.f32 %v4663_v47, %v2875_v3 }
 0x4f2   : > { %v2877_v52 = vadd.f32 %v4663_v47, %v2876_v43 }
 0x4f4   : > { %v2881_v28 = vsel %vm2880_vm12, %v4663_v47, %v2877_v52 }
 0x4f5   : > { %v2886_v36 = vsel %vm2883_vm13, %v2885_v16, %v2881_v28  ;;  %v3011_v25 = vpop.f32.mrf.mxu2 }
 0x4f6   : > { %v2902_v15 = vmul.f32 %v6281_v62, %v2886_v36  ;;  %v3238_v48 = vrot.slane %v3011_v25, 4 }
 0x4f8   : > { %v2918_v55 = vpack.c.bf16 %v2902_v15, %v2902_v15 }
 0x4fa   : > { %4380 = vmatmul.msk.bf16.vlgmr.msrb.gmra.mxu1 %vm2214_vm0, %v2918_v55  ;;  %v6449_v19 = vpop.f32.mrf.mxu3 }
 0x4fd   : > { %v3013_v8 = vpop.f32.mrf.mxu2 }
 0x500   : > { %v6451_v44 = vpop.f32.mrf.mxu0 }
 0x502   : > { %v3032_v31 = vpop.f32.mrf.mxu3 }
 0x504   : > { %v2659_v59 = vpop.xlane.xlu2 %2658 }
 0x505   : > { %v3087_v39 = vpop.f32.mrf.mxu2  ;;  %4664 = vrcp.f32 %v2659_v59  ;;  %v2870_v54 = vand.u32 2147483648, %v2659_v59  ;;  %v2868_v4 = vand.u32 2147483647, %v2659_v59  ;;  %vm2864_vm3 = vweird.f32 %v2659_v59 }
 0x506   : > { %v3224_v18 = vrot.slane %v3087_v39, 4  ;;  %v3227_v11 = vsel %vm814_vm15, %v3087_v39, %v3226_v22 }
 0x507   : > { %v3235_v46 = vperm.slane %v3227_v11, %v5032_v51  ;;  %v2871_v24 = vor.u32 1.1754944e-38, %v2870_v54  ;;  %vm2869_vm5 = vcmp.eq.f32.partialorder %v2868_v4, 8.507059e+37 }
 0x508   : > { %v2975_v34 = vpop.f32.mrf.mxu0  ;;  %v3225_v63 = vsel %vm814_vm15, %v3224_v18, %v2935_v6 }
 0x509   : > { %v3231_v23 = vperm.slane %v3225_v63, %v5032_v51  ;;  %v3262_v41 = vrot.slane %v3235_v46, 4  ;;  %v3282_v63 = vrot.slane %v6443_v42, 4 }
 0x50a   : > { %v6453_v38 = vpop.f32.mrf.mxu3 }
 0x50b   : > { %v4665_v14 = vpop.eup %4664  ;;  %v3250_v7 = vrot.slane %v3231_v23, 4 }
 0x50c   : > { %v2860_v0 = vmul.f32 %v4665_v14, %v2659_v59  ;;  %vm2865_vm14 = vweird.f32 %v4665_v14 }
 0x50d   : > { %v3089_v40 = vpop.f32.mrf.mxu2  ;;  %vm2866_vm4 = vmor %vm2864_vm3, %vm2865_vm14 }
 0x50e   : > { %v2861_v62 = vsub.f32 1.0, %v2860_v0 }
 0x510   : > { %v2862_v30 = vmul.f32 %v4665_v14, %v2861_v62 }
 0x512   : > { %v2863_v60 = vadd.f32 %v4665_v14, %v2862_v30  ;;  %v3108_v50 = vpop.f32.mrf.mxu3 }
 0x514   : > { %v2867_v32 = vsel %vm2866_vm4, %v4665_v14, %v2863_v60  ;;  %v3280_v60 = vrot.slane %v6453_v38, 4 }
 0x515   : > { %v3163_v27 = vpop.f32.mrf.mxu2  ;;  %v2872_v53 = vsel %vm2869_vm5, %v2871_v24, %v2867_v32 }
 0x516   : > { %v3236_v5 = vrot.slane %v3163_v27, 4  ;;  %v3239_v1 = vsel %vm814_vm15, %v3163_v27, %v3238_v48  ;;  %v2901_v9 = vmul.f32 %v6348_v13, %v2872_v53  ;;  %v3283_v53 = vsel %vm814_vm15, %v6453_v38, %v3282_v63 }
 0x517   : > { %v3247_v20 = vperm.slane %v3239_v1, %v5032_v51 }
 0x518   : > { %v3237_v2 = vsel %vm814_vm15, %v3236_v5, %v3011_v25  ;;  %v2917_v26 = vpack.c.bf16 %v2901_v9, %v2901_v9 }
 0x519   : > { %v3243_v12 = vperm.slane %v3237_v2, %v5032_v51  ;;  %v3260_v37 = vrot.slane %v3247_v20, 4  ;;  %v3263_v35 = vsel %vm814_vm15, %v3247_v20, %v3262_v41  ;;  %v3281_v41 = vsel %vm814_vm15, %v3280_v60, %v6443_v42 }
 0x51a   : > { %v3271_v49 = vperm.slane %v3263_v35, %v5046_v10  ;;  %4379 = vmatmul.msk.bf16.vlgmr.msra.gmra.mxu0 %vm2214_vm0, %v2917_v26  ;;  %v3291_v20 = vperm.slane %v3283_v53, %v5032_v51  ;;  %v3294_v2 = vrot.slane %v6449_v19, 4  ;;  %v3287_v26 = vperm.slane %v3281_v41, %v5032_v51 }
 0x51b   : > { %v3248_v17 = vrot.slane %v3243_v12, 4  ;;  %v3251_v33 = vsel %vm814_vm15, %v3243_v12, %v3250_v7  ;;  %v3261_v13 = vsel %vm814_vm15, %v3260_v37, %v3235_v46  ;;  %v3338_v35 = vrot.slane %v6451_v44, 4 }
 0x51c   : > { %v3259_v61 = vperm.slane %v3251_v33, %v5046_v10  ;;  %v3267_v56 = vperm.slane %v3261_v13, %v5046_v10  ;;  %v3278_v6 = vrot.slane %v3271_v49, 4 }
 0x51d   : > { %v3249_v57 = vsel %vm814_vm15, %v3248_v17, %v3231_v23  ;;  %v3165_v29 = vpop.f32.mrf.mxu2  ;;  %v3318_v17 = vrot.slane %v3291_v20, 4 }
 0x51e   : > { %v3255_v47 = vperm.slane %v3249_v57, %v5046_v10  ;;  %v3274_v21 = vrot.slane %v3259_v61, 4  ;;  %v3276_v3 = vrot.slane %v3267_v56, 4  ;;  %v3279_v45 = vsel %vm814_vm15, 0.0, %v3278_v6 }
 0x51f   : > { %v3459_v43 = vsel %vm814_vm15, %v3278_v6, %v3267_v56  ;;  %v3464_v58 = vrot.slane %v3279_v45, 4  ;;  %v6475_v52 = vpop.f32.mrf.mxu1  ;;  %v3306_v29 = vrot.slane %v3287_v26, 4 }
 0x520   : > { %v3277_v16 = vsel %vm814_vm15, 0.0, %v3276_v3  ;;  %v3448_v28 = vsel %vm814_vm15, %v3274_v21, %v3255_v47  ;;  %v3463_v36 = vperm.slane %v3459_v43, %v5032_v51  ;;  %v3275_v15 = vsel %vm814_vm15, 0.0, %v3274_v21 }
 0x521   : > { %v3465_v25 = vsel %vm814_vm15, %v3464_v58, %v3277_v16  ;;  %v3272_v55 = vrot.slane %v3255_v47, 4  ;;  %v3453_v39 = vrot.slane %v3275_v15, 4  ;;  %v3452_v0 = vperm.slane %v3448_v28, %v5032_v51 }
 0x522   : > { %v3469_v8 = vperm.slane %v3465_v25, %v5032_v51  ;;  %v3484_v59 = vrot.slane %v3463_v36, 4 }
 0x523   : > { %v3273_v14 = vsel %vm814_vm15, 0.0, %v3272_v55  ;;  %v3472_v54 = vrot.slane %v3452_v0, 4 }
 0x524   : > { %v3485_v18 = vsel %vm814_vm15, %v3469_v8, %v3484_v59  ;;  %v3454_v40 = vsel %vm814_vm15, %v3453_v39, %v3273_v14  ;;  %v3482_v23 = vrot.slane %v3469_v8, 4 }
 0x525   : > { %v3493_v22 = vperm.slane %v3485_v18, %v5046_v10  ;;  %v3458_v62 = vperm.slane %v3454_v40, %v5032_v51 }
 0x526   : > { %v3483_v1 = vsel %vm814_vm15, %v3482_v23, %v3463_v36 }
 0x527   : > { %v2994_v31 = vpop.f32.mrf.mxu1  ;;  %v6483_v34 = vpop.f32.mrf.mxu0  ;;  %v3498_v11 = vrot.slane %v3493_v22, 4  ;;  %v3473_v30 = vsel %vm814_vm15, %v3458_v62, %v3472_v54  ;;  %v3470_v24 = vrot.slane %v3458_v62, 4  ;;  %v6514_v7 = vperm.slane %v3483_v1, %v5046_v10 }
 0x528   : > { %v3481_v4 = vperm.slane %v3473_v30, %v5046_v10  ;;  %v3394_v31 = vrot.slane %v6475_v52, 4 }
 0x529   : > { %v3471_v5 = vsel %vm814_vm15, %v3470_v24, %v3452_v0 }
 0x52a   : > { %v6496_v46 = vsel %vm814_vm15, %v3498_v11, %v3481_v4  ;;  %v3500_v48 = vrot.slane %v3481_v4, 4  ;;  %v6508_v9 = vperm.slane %v3471_v5, %v5046_v10 }
 0x52c   : > { %v6503_v50 = vsel %vm814_vm15, %v3493_v22, %v3500_v48  ;;  %v3496_v38 = vrot.slane %v6508_v9, 4 }
 0x52e   : > { %v6521_v37 = vsel %vm814_vm15, %v6514_v7, %v3496_v38 }
 0x52f   : > { %v3051_v32 = vpop.f32.mrf.mxu0  ;;  %v6498_v27 = vpop.f32.mrf.mxu1 }
 0x535   : > { %v3182_v12 = vpop.f32.mrf.mxu3 }
 0x536   : > { %v3292_v49 = vrot.slane %v3182_v12, 4  ;;  %v3295_v42 = vsel %vm814_vm15, %v3182_v12, %v3294_v2 }
 0x537   : > { %v3303_v33 = vperm.slane %v3295_v42, %v5032_v51  ;;  %v3070_v13 = vpop.f32.mrf.mxu1  ;;  %v3125_v61 = vpop.f32.mrf.mxu0 }
 0x538   : > { %v3293_v56 = vsel %vm814_vm15, %v3292_v49, %v6449_v19  ;;  %v3336_v6 = vrot.slane %v3125_v61, 4  ;;  %v6529_v57 = vsel %vm814_vm15, %v3125_v61, %v3338_v35  ;;  %v3494_v61 = vrot.slane %v6514_v7, 4 }
 0x539   : > { %v3299_v47 = vperm.slane %v3293_v56, %v5032_v51  ;;  %v3316_v21 = vrot.slane %v3303_v33, 4  ;;  %v3319_v3 = vsel %vm814_vm15, %v3303_v33, %v3318_v17 }
 0x53a   : > { %v3327_v45 = vperm.slane %v3319_v3, %v5046_v10  ;;  %v6536_v43 = vsel %vm814_vm15, %v3336_v6, %v6451_v44  ;;  %v6577_v7 = vsel %vm814_vm15, %v3494_v61, %v6508_v9 }
 0x53b   : > { %v3304_v58 = vrot.slane %v3299_v47, 4  ;;  %v3307_v16 = vsel %vm814_vm15, %v3299_v47, %v3306_v29  ;;  %v3317_v19 = vsel %vm814_vm15, %v3316_v21, %v3291_v20 }
 0x53c   : > { %v3315_v28 = vperm.slane %v3307_v16, %v5046_v10  ;;  %v3323_v36 = vperm.slane %v3317_v19, %v5046_v10  ;;  %v3334_v25 = vrot.slane %v3327_v45, 4 }
 0x53d   : > { %v3305_v15 = vsel %vm814_vm15, %v3304_v58, %v3287_v26  ;;  %v3184_v55 = vpop.f32.mrf.mxu3 }
 0x53e   : > { %v3311_v8 = vperm.slane %v3305_v15, %v5046_v10  ;;  %v3330_v59 = vrot.slane %v3315_v28, 4  ;;  %v3332_v39 = vrot.slane %v3323_v36, 4  ;;  %v3335_v44 = vsel %vm814_vm15, 0.0, %v3334_v25 }
 0x53f   : > { %v3513_v14 = vsel %vm814_vm15, %v3334_v25, %v3323_v36  ;;  %v3518_v0 = vrot.slane %v3335_v44, 4  ;;  %v3127_v18 = vpop.f32.mrf.mxu0  ;;  %v3144_v40 = vpop.f32.mrf.mxu1  ;;  %v3406_v28 = vrot.slane %v6498_v27, 4 }
 0x540   : > { %v3328_v22 = vrot.slane %v3311_v8, 4  ;;  %v3331_v62 = vsel %vm814_vm15, 0.0, %v3330_v59  ;;  %v3333_v54 = vsel %vm814_vm15, 0.0, %v3332_v39  ;;  %v3502_v11 = vsel %vm814_vm15, %v3330_v59, %v3311_v8 }
 0x541   : > { %v3507_v30 = vrot.slane %v3331_v62, 4  ;;  %v3517_v4 = vperm.slane %v3513_v14, %v5032_v51  ;;  %v3519_v63 = vsel %vm814_vm15, %v3518_v0, %v3333_v54  ;;  %v3392_v60 = vrot.slane %v3144_v40, 4 }
 0x542   : > { %v3523_v48 = vperm.slane %v3519_v63, %v5032_v51  ;;  %v3395_v24 = vsel %vm814_vm15, %v3144_v40, %v3394_v31  ;;  %v3329_v23 = vsel %vm814_vm15, 0.0, %v3328_v22  ;;  %v3506_v32 = vperm.slane %v3502_v11, %v5032_v51 }
 0x543   : > { %v3538_v53 = vrot.slane %v3517_v4, 4  ;;  %v3393_v5 = vsel %vm814_vm15, %v3392_v60, %v6475_v52  ;;  %v3508_v1 = vsel %vm814_vm15, %v3507_v30, %v3329_v23  ;;  %v3403_v19 = vperm.slane %v3395_v24, %v5032_v51 }
 0x544   : > { %v3512_v41 = vperm.slane %v3508_v1, %v5032_v51  ;;  %v3526_v20 = vrot.slane %v3506_v32, 4  ;;  %v3536_v38 = vrot.slane %v3523_v48, 4  ;;  %v3399_v36 = vperm.slane %v3393_v5, %v5032_v51 }
 0x545   : > { %v3539_v2 = vsel %vm814_vm15, %v3523_v48, %v3538_v53  ;;  %v3430_v55 = vrot.slane %v3403_v19, 4 }
 0x546   : > { %v3527_v26 = vsel %vm814_vm15, %v3512_v41, %v3526_v20  ;;  %v3547_v12 = vperm.slane %v3539_v2, %v5046_v10  ;;  %v3524_v35 = vrot.slane %v3512_v41, 4  ;;  %v3537_v52 = vsel %vm814_vm15, %v3536_v38, %v3517_v4 }
 0x547   : > { %v3146_v49 = vpop.f32.mrf.mxu1  ;;  %v3535_v42 = vperm.slane %v3527_v26, %v5046_v10  ;;  %v3543_v21 = vperm.slane %v3537_v52, %v5046_v10  ;;  %v3418_v59 = vrot.slane %v3399_v36, 4 }
 0x548   : > { %v3552_v17 = vrot.slane %v3547_v12, 4  ;;  %v3525_v33 = vsel %vm814_vm15, %v3524_v35, %v3506_v32 }
 0x549   : > { %v3554_v13 = vrot.slane %v3535_v42, 4  ;;  %v3531_v56 = vperm.slane %v3525_v33, %v5046_v10  ;;  %v3548_v16 = vrot.slane %v3543_v21, 4 }
 0x54a   : > { %v3553_v6 = vsel %vm814_vm15, %v3552_v17, %v3535_v42 }
 0x54b   : > { %v4564_v29 = vpack.i.bf16 %v3553_v6, %v6496_v46  ;;  %v3555_v47 = vsel %vm814_vm15, %v3547_v12, %v3554_v13  ;;  %v3550_v3 = vrot.slane %v3531_v56, 4 }
 0x54c   : > { %v4569_v45 = vpack.i.bf16 %v3555_v47, %v6503_v50  ;;  %v6583_v50 = vsel %vm814_vm15, %v3548_v16, %v3531_v56 }
 0x54d   : > { %4565 = vrot.lane.b32.xlu2 %v4564_v29, %s4802_s11  ;;  %v3551_v58 = vsel %vm814_vm15, %v3543_v21, %v3550_v3 }
 0x54e   : > { %4570 = vrot.lane.b32.xlu1 %v4569_v45, %s4803_s19  ;;  %v4559_v46 = vpack.i.bf16 %v3551_v58, %v6521_v37  ;;  %v3347_v58 = vperm.slane %v6529_v57, %v5032_v51 }
 0x550   : > { %4560 = vrot.lane.b32.xlu0 %v4559_v46, %s4804_s0 }
 0x577   : > { %v3220_v9 = vpop.f32.mrf.mxu1 }
 0x578   : > { %v3404_v25 = vrot.slane %v3220_v9, 4  ;;  %v3407_v15 = vsel %vm814_vm15, %v3220_v9, %v3406_v28  ;;  %v3350_v28 = vrot.slane %v6483_v34, 4 }
 0x579   : > { %v3415_v37 = vperm.slane %v3407_v15, %v5032_v51 }
 0x57a   : > { %v3405_v8 = vsel %vm814_vm15, %v3404_v25, %v6498_v27 }
 0x57b   : > { %v3411_v39 = vperm.slane %v3405_v8, %v5032_v51  ;;  %v3428_v44 = vrot.slane %v3415_v37, 4  ;;  %v3431_v31 = vsel %vm814_vm15, %v3415_v37, %v3430_v55  ;;  %v3374_v37 = vrot.slane %v3347_v58, 4 }
 0x57c   : > { %v3439_v14 = vperm.slane %v3431_v31, %v5046_v10 }
 0x57d   : > { %v3416_v0 = vrot.slane %v3411_v39, 4  ;;  %v3419_v18 = vsel %vm814_vm15, %v3411_v39, %v3418_v59  ;;  %v3429_v40 = vsel %vm814_vm15, %v3428_v44, %v3403_v19 }
 0x57e   : > { %v3427_v22 = vperm.slane %v3419_v18, %v5046_v10  ;;  %v3435_v62 = vperm.slane %v3429_v40, %v5046_v10  ;;  %v3446_v54 = vrot.slane %v3439_v14, 4 }
 0x57f   : > { %v3417_v27 = vsel %vm814_vm15, %v3416_v0, %v3399_v36  ;;  %v3222_v11 = vpop.f32.mrf.mxu1  ;;  %v3343_v36 = vperm.slane %v6536_v43, %v5032_v51 }
 0x580   : > { %v3444_v30 = vrot.slane %v3435_v62, 4  ;;  %v3447_v4 = vsel %vm814_vm15, 0.0, %v3446_v54  ;;  %v3423_v63 = vperm.slane %v3417_v27, %v5046_v10  ;;  %v3442_v60 = vrot.slane %v3427_v22, 4 }
 0x581   : > { %v3621_v48 = vsel %vm814_vm15, %v3446_v54, %v3435_v62  ;;  %v3626_v24 = vrot.slane %v3447_v4, 4  ;;  %v3362_v59 = vrot.slane %v3343_v36, 4 }
 0x582   : > { %v3445_v23 = vsel %vm814_vm15, 0.0, %v3444_v30  ;;  %v3625_v32 = vperm.slane %v3621_v48, %v5032_v51  ;;  %v3440_v53 = vrot.slane %v3423_v63, 4  ;;  %v3443_v5 = vsel %vm814_vm15, 0.0, %v3442_v60 }
 0x583   : > { %v3627_v1 = vsel %vm814_vm15, %v3626_v24, %v3445_v23  ;;  %v3615_v41 = vrot.slane %v3443_v5, 4  ;;  %v3610_v2 = vsel %vm814_vm15, %v3442_v60, %v3423_v63 }
 0x584   : > { %v3631_v20 = vperm.slane %v3627_v1, %v5032_v51  ;;  %v3646_v38 = vrot.slane %v3625_v32, 4  ;;  %v3441_v26 = vsel %vm814_vm15, 0.0, %v3440_v53  ;;  %v3614_v12 = vperm.slane %v3610_v2, %v5032_v51 }
 0x585   : > { %v3616_v35 = vsel %vm814_vm15, %v3615_v41, %v3441_v26 }
 0x586   : > { %v3647_v49 = vsel %vm814_vm15, %v3631_v20, %v3646_v38  ;;  %v3620_v42 = vperm.slane %v3616_v35, %v5032_v51  ;;  %v3634_v33 = vrot.slane %v3614_v12, 4  ;;  %v3644_v56 = vrot.slane %v3631_v20, 4 }
 0x587   : > { %v3655_v17 = vperm.slane %v3647_v49, %v5046_v10 }
 0x588   : > { %v3635_v13 = vsel %vm814_vm15, %v3620_v42, %v3634_v33  ;;  %v3632_v61 = vrot.slane %v3620_v42, 4  ;;  %v3645_v47 = vsel %vm814_vm15, %v3644_v56, %v3625_v32 }
 0x589   : > { %v3660_v52 = vrot.slane %v3655_v17, 4  ;;  %v3643_v6 = vperm.slane %v3635_v13, %v5046_v10  ;;  %v3651_v46 = vperm.slane %v3645_v47, %v5046_v10  ;;  %v4445_v47 = vld [vmem:[%s4905_s20] sm:$0xff] }
 0x58a   : > { %v3633_v29 = vsel %vm814_vm15, %v3632_v61, %v3614_v12  ;;  %v4446_v61 = vld [vmem:[%s4905_s20 + $0x8] sm:$0xff] }
 0x58b   : > { %v6620_v21 = vsel %vm814_vm15, %v3660_v52, %v3643_v6  ;;  %v3639_v3 = vperm.slane %v3633_v29, %v5046_v10  ;;  %v3662_v45 = vrot.slane %v3643_v6, 4  ;;  %v3656_v27 = vrot.slane %v3651_v46, 4  ;;  %3760 = vmatpush.bf16.msra.mxu2 %v4446_v61  ;;  %v4684_v61 = vld [vmem:[#allocation5 + $0x10] sm:$0xff] }
 0x58d   : > { %v3658_v16 = vrot.slane %v3639_v3, 4  ;;  %v6627_v19 = vsel %vm814_vm15, %v3655_v17, %v3662_v45  ;;  %v3657_v26 = vsel %vm814_vm15, %v3656_v27, %v3639_v3 }
 0x58f   : > { %v6633_v25 = vsel %vm814_vm15, %v3651_v46, %v3658_v16  ;;  %3761 = vmatpush.bf16.msra.mxu2 %v4445_v47 }
 0x597   : > { %v3201_v9 = vpop.f32.mrf.mxu0 }
 0x598   : > { %v3348_v15 = vrot.slane %v3201_v9, 4  ;;  %v3351_v55 = vsel %vm814_vm15, %v3201_v9, %v3350_v28 }
 0x599   : > { %v3359_v57 = vperm.slane %v3351_v55, %v5032_v51 }
 0x59a   : > { %v3349_v8 = vsel %vm814_vm15, %v3348_v15, %v6483_v34 }
 0x59b   : > { %v3355_v39 = vperm.slane %v3349_v8, %v5032_v51  ;;  %v3372_v44 = vrot.slane %v3359_v57, 4  ;;  %v3375_v31 = vsel %vm814_vm15, %v3359_v57, %v3374_v37 }
 0x59c   : > { %v3383_v43 = vperm.slane %v3375_v31, %v5046_v10 }
 0x59d   : > { %v3360_v14 = vrot.slane %v3355_v39, 4  ;;  %v3363_v0 = vsel %vm814_vm15, %v3355_v39, %v3362_v59  ;;  %v3373_v18 = vsel %vm814_vm15, %v3372_v44, %v3347_v58 }
 0x59e   : > { %v3371_v40 = vperm.slane %v3363_v0, %v5046_v10  ;;  %v3379_v22 = vperm.slane %v3373_v18, %v5046_v10  ;;  %v3390_v62 = vrot.slane %v3383_v43, 4 }
 0x59f   : > { %v3361_v34 = vsel %vm814_vm15, %v3360_v14, %v3343_v36  ;;  %v3203_v54 = vpop.f32.mrf.mxu0 }
 0x5a0   : > { %v3367_v11 = vperm.slane %v3361_v34, %v5046_v10  ;;  %v3386_v30 = vrot.slane %v3371_v40, 4  ;;  %v3388_v4 = vrot.slane %v3379_v22, 4  ;;  %v3391_v63 = vsel %vm814_vm15, 0.0, %v3390_v62 }
 0x5a1   : > { %v3567_v60 = vsel %vm814_vm15, %v3390_v62, %v3379_v22  ;;  %v3572_v48 = vrot.slane %v3391_v63, 4 }
 0x5a2   : > { %v3384_v24 = vrot.slane %v3367_v11, 4  ;;  %v3387_v23 = vsel %vm814_vm15, 0.0, %v3386_v30  ;;  %v3389_v32 = vsel %vm814_vm15, 0.0, %v3388_v4  ;;  %v3556_v53 = vsel %vm814_vm15, %v3386_v30, %v3367_v11 }
 0x5a3   : > { %v3561_v5 = vrot.slane %v3387_v23, 4  ;;  %v3571_v1 = vperm.slane %v3567_v60, %v5032_v51  ;;  %v3573_v41 = vsel %vm814_vm15, %v3572_v48, %v3389_v32  ;;  %v3560_v20 = vperm.slane %v3556_v53, %v5032_v51 }
 0x5a4   : > { %v3577_v38 = vperm.slane %v3573_v41, %v5032_v51  ;;  %v3385_v2 = vsel %vm814_vm15, 0.0, %v3384_v24  ;;  %v4589_v41 = vld [vmem:[%s6909_s2] ss:$0 sm:$0xff] }
 0x5a5   : > { %v3592_v12 = vrot.slane %v3571_v1, 4  ;;  %v3562_v35 = vsel %vm814_vm15, %v3561_v5, %v3385_v2  ;;  %v3580_v49 = vrot.slane %v3560_v20, 4  ;;  %v4682_v2 = vld [vmem:[#allocation5] sm:$0xff] }
 0x5a6   : > { %v3566_v42 = vperm.slane %v3562_v35, %v5032_v51  ;;  %v3590_v33 = vrot.slane %v3577_v38, 4 }
 0x5a7   : > { %v3593_v17 = vsel %vm814_vm15, %v3577_v38, %v3592_v12 }
 0x5a8   : > { %v3581_v52 = vsel %vm814_vm15, %v3566_v42, %v3580_v49  ;;  %v3601_v13 = vperm.slane %v3593_v17, %v5046_v10  ;;  %v3578_v6 = vrot.slane %v3566_v42, 4  ;;  %v3591_v45 = vsel %vm814_vm15, %v3590_v33, %v3571_v1  ;;  %v4683_v42 = vld [vmem:[#allocation5 + $0x8] sm:$0xff] }
 0x5a9   : > { %v3589_v56 = vperm.slane %v3581_v52, %v5046_v10  ;;  %v3597_v36 = vperm.slane %v3591_v45, %v5046_v10 }
 0x5aa   : > { %v3606_v29 = vrot.slane %v3601_v13, 4  ;;  %v3579_v3 = vsel %vm814_vm15, %v3578_v6, %v3560_v20 }
 0x5ab   : > { %v3608_v58 = vrot.slane %v3589_v56, 4  ;;  %v3585_v46 = vperm.slane %v3579_v3, %v5046_v10  ;;  %v3602_v57 = vrot.slane %v3597_v36, 4  ;;  %v4685_v3 = vld [vmem:[#allocation5 + $0x18] sm:$0xff] }
 0x5ac   : > { %v3607_v51 = vsel %vm814_vm15, %v3606_v29, %v3589_v56 }
 0x5ad   : > { %v4579_v16 = vpack.i.bf16 %v6620_v21, %v3607_v51  ;;  %v3609_v28 = vsel %vm814_vm15, %v3601_v13, %v3608_v58  ;;  %v3604_v9 = vrot.slane %v3585_v46, 4  ;;  %v4566_v21 = vpop.permute.xlu2 %4565  ;;  %v3603_v31 = vsel %vm814_vm15, %v3602_v57, %v3585_v46  ;;  %v6910_v46 = vld [vmem:[#allocation9_spill] sm:$0xff] }
 0x5ae   : > { %v4584_v15 = vpack.i.bf16 %v6627_v19, %v3609_v28  ;;  %v4568_v44 = vunpack.i.h.bf16 %v4566_v21  ;;  %v4567_v19 = vunpack.i.l.bf16 %v4566_v21 }
 0x5af   : > { %4580 = vrot.lane.b32.xlu2 %v4579_v16, %s4802_s11  ;;  %v3605_v55 = vsel %vm814_vm15, %v3597_v36, %v3604_v9 }
 0x5b0   : > { %v4574_v37 = vpack.i.bf16 %v6633_v25, %v3605_v55 }
 0x5b2   : > { %4575 = vrot.lane.b32.xlu0 %v4574_v37, %s4804_s0 }
 0x5ba   : > { %4585 = vrot.lane.b32.xlu0 %v4584_v15, %s4803_s19 }
 0x5c0   : > { %v4571_v8 = vpop.permute.xlu1 %4570 }
 0x5c1   : > { %v4573_v43 = vunpack.i.h.bf16 %v4571_v8  ;;  %v4572_v14 = vunpack.i.l.bf16 %v4571_v8 }
 0x5c2   : > { %v4561_v59 = vpop.permute.xlu0 %4560 }
 0x5c3   : > { %v4563_v10 = vunpack.i.h.bf16 %v4561_v59  ;;  %v4562_v39 = vunpack.i.l.bf16 %v4561_v59 }
 0x5c5   : > { %v3713_v25 = vsel %vm2214_vm0, %v6583_v50, %v4563_v10  ;;  %v3712_v0 = vsel %vm2214_vm0, %v6577_v7, %v4562_v39 }
 0x5c6   : > { %v3718_v18 = vsel %vm3716_vm6, %v3713_v25, %v4568_v44  ;;  %v3717_v40 = vsel %vm3716_vm6, %v3712_v0, %v4567_v19 }
 0x5c7   : > { %v3723_v22 = vsel %vm3721_vm7, %v3718_v18, %v4573_v43  ;;  %v3722_v62 = vsel %vm3721_vm7, %v3717_v40, %v4572_v14 }
 0x5c8   : > { %v3726_v34 = vpack.c.bf16 %v3723_v22, %v3722_v62  ;;  %v4448_v22 = vld [vmem:[%s4910_s23 + $0x8] sm:$0xff]  ;;  %v4447_v62 = vld [vmem:[%s4910_s23] sm:$0xff] }
 0x5c9   : > { %3909 = vmatpush.bf16.msra.mxu3 %v4448_v22  ;;  %v4453_v22 = vld [vmem:[%s4924_s18 + $0x20] sm:$0xff] }
 0x5ca   : > { %4389 = vmatmul.msk.bf16.vlgmr.msra.gmra.mxu2 %vm528_vm1, %v3726_v34 }
 0x5cd   : > { %3910 = vmatpush.bf16.msra.mxu3 %v4447_v62  ;;  %v4590_v62 = vld [vmem:[%s495_s27] ss:$0 sm:$0xff] }
 0x609   : > { %v4581_v30 = vpop.permute.xlu2 %4580 }
 0x60a   : > { %v4583_v4 = vunpack.i.h.bf16 %v4581_v30  ;;  %v4582_v63 = vunpack.i.l.bf16 %v4581_v30 }
 0x624   : > { %v4576_v54 = vpop.permute.xlu0 %4575 }
 0x625   : > { %v4578_v27 = vunpack.i.h.bf16 %v4576_v54  ;;  %v4577_v11 = vunpack.i.l.bf16 %v4576_v54 }
 0x627   : > { %v3715_v50 = vsel %vm2214_vm0, %v3657_v26, %v4578_v27  ;;  %v3714_v7 = vsel %vm2214_vm0, %v3603_v31, %v4577_v11 }
 0x628   : > { %v3719_v23 = vsel %vm3716_vm6, %v3714_v7, %v4582_v63  ;;  %v3720_v32 = vsel %vm3716_vm6, %v3715_v50, %v4583_v4 }
 0x62c   : > { %v4586_v60 = vpop.permute.xlu0 %4585 }
 0x62d   : > { %v4588_v48 = vunpack.i.h.bf16 %v4586_v60  ;;  %v4587_v24 = vunpack.i.l.bf16 %v4586_v60 }
 0x62f   : > { %v3724_v53 = vsel %vm3721_vm7, %v3719_v23, %v4587_v24  ;;  %v3725_v5 = vsel %vm3721_vm7, %v3720_v32, %v4588_v48 }
 0x630   : > { %v3727_v1 = vpack.c.bf16 %v3725_v5, %v3724_v53  ;;  %v4686_v5 = vld [vmem:[%s4930_s26] sm:$0xf] }
 0x632   : > { %4390 = vmatmul.msk.bf16.gmra.mxu2 %vm528_vm1, %v3727_v1  ;;  %v3865_v1 = vperm.slane %v4686_v5, 2 }
 0x64d   : > { %v3763_v20 = vpop.f32.mrf.mxu2 }
 0x64e   : > { %v3764_v38 = vadd.f32 %v4589_v41, %v3763_v20 }
 0x650   : > { %v6702_v26 = vadd.f32 %v4682_v2, %v3764_v38  ;;  %v3870_v2 = vperm.slane %v4686_v5, 3 }
 0x652   : > { %v3777_v12 = vsel %vm528_vm1, %v6702_v26, 0.0 }
 0x653   : > { %3778 = vadd.xlane.f32.xlu1 %v3777_v12 }
 0x655   : > { %v3765_v35 = vpop.f32.mrf.mxu2 }
 0x656   : > { %v3766_v49 = vadd.f32 %v4589_v41, %v3765_v35 }
 0x658   : > { %v6706_v17 = vadd.f32 %v4683_v42, %v3766_v49 }
 0x65a   : > { %v3780_v33 = vsel %vm528_vm1, %v6706_v17, 0.0 }
 0x65b   : > { %3781 = vadd.xlane.f32.xlu2 %v3780_v33 }
 0x6b5   : > { %v3768_v52 = vpop.f32.mrf.mxu2 }
 0x6b6   : > { %v3769_v13 = vadd.f32 %v4589_v41, %v3768_v52 }
 0x6b8   : > { %v6710_v56 = vadd.f32 %v4684_v61, %v3769_v13 }
 0x6ba   : > { %v3783_v6 = vsel %vm528_vm1, %v6710_v56, 0.0 }
 0x6bb   : > { %3784 = vadd.xlane.f32.xlu0 %v3783_v6 }
 0x6bd   : > { %v3770_v29 = vpop.f32.mrf.mxu2 }
 0x6be   : > { %v3771_v47 = vadd.f32 %v4589_v41, %v3770_v29 }
 0x6c0   : > { %v6714_v45 = vadd.f32 %v4685_v3, %v3771_v47 }
 0x6c2   : > { %v3786_v58 = vsel %vm528_vm1, %v6714_v45, 0.0 }
 0x6c3   : > { %3787 = vadd.xlane.f32.xlu1 %v3786_v58 }
 0x6c6   : > { %v3779_v51 = vpop.xlane.xlu1 %3778 }
 0x6c7   : > { %v3789_v16 = vmul.f32 %v3779_v51, %v6910_v46 }
 0x6c9   : > { %v3793_v28 = vsub.f32 %v6702_v26, %v3789_v16 }
 0x6cb   : > { %v3797_v36 = vmul.f32 %v3793_v28, %v3793_v28 }
 0x6cd   : > { %v3801_v9 = vsel %vm528_vm1, %v3797_v36, 0.0 }
 0x6ce   : > { %v3782_v15 = vpop.xlane.xlu2 %3781  ;;  %3802 = vadd.xlane.f32.xlu2 %v3801_v9 }
 0x6cf   : > { %v3790_v55 = vmul.f32 %v3782_v15, %v6910_v46 }
 0x6d1   : > { %v3794_v37 = vsub.f32 %v6706_v17, %v3790_v55 }
 0x6d3   : > { %v3798_v57 = vmul.f32 %v3794_v37, %v3794_v37 }
 0x6d5   : > { %v3804_v21 = vsel %vm528_vm1, %v3798_v57, 0.0 }
 0x6d6   : > { %3805 = vadd.xlane.f32.xlu0 %v3804_v21 }
 0x72e   : > { %v3785_v8 = vpop.xlane.xlu0 %3784 }
 0x72f   : > { %v3791_v59 = vmul.f32 %v3785_v8, %v6910_v46 }
 0x731   : > { %v6726_v10 = vsub.f32 %v6710_v56, %v3791_v59 }
 0x733   : > { %v3799_v39 = vmul.f32 %v6726_v10, %v6726_v10 }
 0x735   : > { %v3807_v44 = vsel %vm528_vm1, %v3799_v39, 0.0 }
 0x736   : > { %3808 = vadd.xlane.f32.xlu1 %v3807_v44  ;;  %v3788_v19 = vpop.xlane.xlu1 %3787 }
 0x737   : > { %v3792_v31 = vmul.f32 %v3788_v19, %v6910_v46 }
 0x739   : > { %v6733_v43 = vsub.f32 %v6714_v45, %v3792_v31 }
 0x73b   : > { %v3800_v14 = vmul.f32 %v6733_v43, %v6733_v43 }
 0x73d   : > { %v3810_v25 = vsel %vm528_vm1, %v3800_v14, 0.0 }
 0x73e   : > { %3811 = vadd.xlane.f32.xlu2 %v3810_v25 }
 0x741   : > { %v3803_v0 = vpop.xlane.xlu2 %3802 }
 0x742   : > { %v3813_v18 = vmul.f32 %v3803_v0, %v6910_v46 }
 0x744   : > { %v3817_v40 = vadd.f32 1e-05, %v3813_v18  ;;  %v4455_v18 = vld [vmem:[%s4924_s18 + $0x30] sm:$0xff] }
 0x746   : > { %4666 = vrsqrt.f32 %v3817_v40  ;;  %vm3827_vm0 = vweird.f32 %v3817_v40 }
 0x749   : > { %v3806_v34 = vpop.xlane.xlu0 %3805 }
 0x74a   : > { %v3814_v54 = vmul.f32 %v3806_v34, %v6910_v46  ;;  %v4451_v34 = vld [vmem:[%s4924_s18 + $0x10] sm:$0xff] }
 0x74c   : > { %v4667_v27 = vpop.eup %4666  ;;  %v3818_v11 = vadd.f32 1e-05, %v3814_v54 }
 0x74d   : > { %v3822_v30 = vmul.f32 %v4667_v27, %v3817_v40  ;;  %vm3828_vm15 = vweird.f32 %v4667_v27  ;;  %v4454_v40 = vld [vmem:[%s4924_s18 + $0x28] sm:$0xff] }
 0x74e   : > { %4668 = vrsqrt.f32 %v3818_v11  ;;  %vm3829_vm8 = vmor %vm3827_vm0, %vm3828_vm15  ;;  %vm3837_vm10 = vweird.f32 %v3818_v11 }
 0x74f   : > { %v3823_v50 = vmul.f32 %v4667_v27, %v3822_v30 }
 0x751   : > { %v3824_v7 = vmul.f32 0.5, %v3823_v50 }
 0x753   : > { %v3825_v4 = vsub.f32 1.5, %v3824_v7  ;;  %v4449_v7 = vld [vmem:[%s4924_s18] sm:$0xff] }
 0x754   : > { %v4669_v63 = vpop.eup %4668 }
 0x755   : > { %v3826_v60 = vmul.f32 %v4667_v27, %v3825_v4  ;;  %v3832_v48 = vmul.f32 %v4669_v63, %v3818_v11  ;;  %vm3838_vm9 = vweird.f32 %v4669_v63  ;;  %v4450_v11 = vld [vmem:[%s4924_s18 + $0x8] sm:$0xff] }
 0x756   : > { %vm3839_vm2 = vmor %vm3837_vm10, %vm3838_vm9 }
 0x757   : > { %v3833_v24 = vmul.f32 %v4669_v63, %v3832_v48  ;;  %v3830_v23 = vsel %vm3829_vm8, %v4667_v27, %v3826_v60 }
 0x758   : > { %v3861_v41 = vmul.f32 %v3830_v23, %v3793_v28 }
 0x759   : > { %v3834_v32 = vmul.f32 0.5, %v3833_v24 }
 0x75a   : > { %v3866_v12 = vmul.f32 %v3865_v1, %v3861_v41 }
 0x75b   : > { %v3835_v53 = vsub.f32 1.5, %v3834_v32 }
 0x75c   : > { %v3871_v42 = vadd.f32 %v3870_v2, %v3866_v12 }
 0x75d   : > { %v3836_v20 = vmul.f32 %v4669_v63, %v3835_v53 }
 0x75f   : > { %v3840_v38 = vsel %vm3839_vm2, %v4669_v63, %v3836_v20 }
 0x760   : > { %v3862_v35 = vmul.f32 %v3840_v38, %v3794_v37 }
 0x762   : > { %v3867_v49 = vmul.f32 %v3865_v1, %v3862_v35 }
 0x764   : > { %v3872_v33 = vadd.f32 %v3870_v2, %v3867_v49 }
 0x766   : > { %v3875_v52 = vpack.c.bf16 %v3872_v33, %v3871_v42 }
 0x768   : > { %4399 = vmatmul.msk.bf16.vlgmr.msra.gmra.mxu3 %vm528_vm1, %v3875_v52 }
 0x7a9   : > { %v3809_v13 = vpop.xlane.xlu1 %3808 }
 0x7aa   : > { %v3815_v61 = vmul.f32 %v3809_v13, %v6910_v46 }
 0x7ac   : > { %v3819_v6 = vadd.f32 1e-05, %v3815_v61 }
 0x7ae   : > { %4670 = vrsqrt.f32 %v3819_v6  ;;  %vm3847_vm12 = vweird.f32 %v3819_v6 }
 0x7b1   : > { %v3812_v29 = vpop.xlane.xlu2 %3811 }
 0x7b2   : > { %v3816_v47 = vmul.f32 %v3812_v29, %v6910_v46 }
 0x7b4   : > { %v4671_v3 = vpop.eup %4670  ;;  %v3820_v58 = vadd.f32 1e-05, %v3816_v47 }
 0x7b5   : > { %v3842_v51 = vmul.f32 %v4671_v3, %v3819_v6  ;;  %vm3848_vm11 = vweird.f32 %v4671_v3 }
 0x7b6   : > { %4672 = vrsqrt.f32 %v3820_v58  ;;  %vm3849_vm13 = vmor %vm3847_vm12, %vm3848_vm11  ;;  %vm3857_vm3 = vweird.f32 %v3820_v58 }
 0x7b7   : > { %v3843_v16 = vmul.f32 %v4671_v3, %v3842_v51 }
 0x7b9   : > { %v3844_v28 = vmul.f32 0.5, %v3843_v16 }
 0x7bb   : > { %v3845_v36 = vsub.f32 1.5, %v3844_v28 }
 0x7bc   : > { %v4673_v9 = vpop.eup %4672 }
 0x7bd   : > { %v3846_v15 = vmul.f32 %v4671_v3, %v3845_v36  ;;  %v3852_v55 = vmul.f32 %v4673_v9, %v3820_v58  ;;  %vm3858_vm14 = vweird.f32 %v4673_v9 }
 0x7be   : > { %vm3859_vm4 = vmor %vm3857_vm3, %vm3858_vm14 }
 0x7bf   : > { %v3853_v37 = vmul.f32 %v4673_v9, %v3852_v55  ;;  %v3850_v57 = vsel %vm3849_vm13, %v4671_v3, %v3846_v15 }
 0x7c0   : > { %v3863_v46 = vmul.f32 %v3850_v57, %v6726_v10  ;;  %v4456_v10 = vld [vmem:[%s4924_s18 + $0x38] sm:$0xff] }
 0x7c1   : > { %v3854_v21 = vmul.f32 0.5, %v3853_v37  ;;  %4024 = vmatpush.bf16.msrb.mxu0 %v4456_v10 }
 0x7c2   : > { %v3868_v19 = vmul.f32 %v3865_v1, %v3863_v46 }
 0x7c3   : > { %v3855_v8 = vsub.f32 1.5, %v3854_v21 }
 0x7c4   : > { %v3873_v14 = vadd.f32 %v3870_v2, %v3868_v19  ;;  %v4591_v19 = vld [vmem:[%s503_s30] ss:$0 sm:$0xff] }
 0x7c5   : > { %v3856_v59 = vmul.f32 %v4673_v9, %v3855_v8  ;;  %4025 = vmatpush.bf16.msrb.mxu0 %v4455_v18 }
 0x7c7   : > { %v3860_v39 = vsel %vm3859_vm4, %v4673_v9, %v3856_v59 }
 0x7c8   : > { %v3864_v44 = vmul.f32 %v3860_v39, %v6733_v43  ;;  %v4452_v43 = vld [vmem:[%s4924_s18 + $0x18] sm:$0xff] }
 0x7c9   : > { %4026 = vmatpush.bf16.msrb.mxu0 %v4454_v40 }
 0x7ca   : > { %v3869_v31 = vmul.f32 %v3865_v1, %v3864_v44 }
 0x7cc   : > { %v3874_v25 = vadd.f32 %v3870_v2, %v3869_v31 }
 0x7cd   : > { %4027 = vmatpush.bf16.msrb.mxu0 %v4453_v22 }
 0x7ce   : > { %v3876_v0 = vpack.c.bf16 %v3874_v25, %v3873_v14 }
 0x7d0   : > { %4400 = vmatmul.msk.bf16.gmra.mxu3 %vm528_vm1, %v3876_v0 }
 0x7d1   : > { %4028 = vmatpush.bf16.msrb.mxu0 %v4452_v43 }
 0x7d5   : > { %4029 = vmatpush.bf16.msrb.mxu0 %v4451_v34 }
 0x7d9   : > { %4030 = vmatpush.bf16.msrb.mxu0 %v4450_v11 }
 0x7dd   : > { %4031 = vmatpush.bf16.msrb.mxu0 %v4449_v7 }
 0x7eb   : > { %v3912_v54 = vpop.f32.mrf.mxu3 }
 0x7ec   : > { %v3913_v27 = vadd.f32 %v4590_v62, %v3912_v54 }
 0x7ee   : > { %v3926_v30 = vmul.f32 0.044715, %v3913_v27  ;;  %v3922_v2 = vmul.f32 0.5, %v3913_v27 }
 0x7f0   : > { %v3930_v50 = vmul.f32 %v3926_v30, %v3913_v27 }
 0x7f2   : > { %v3934_v4 = vmul.f32 %v3930_v50, %v3913_v27 }
 0x7f3   : > { %v3914_v63 = vpop.f32.mrf.mxu3 }
 0x7f4   : > { %v3938_v60 = vadd.f32 %v3934_v4, %v3913_v27  ;;  %v3915_v48 = vadd.f32 %v4590_v62, %v3914_v63 }
 0x7f6   : > { %v3927_v24 = vmul.f32 0.044715, %v3915_v48  ;;  %v3942_v23 = vmul.f32 0.7978846, %v3938_v60  ;;  %v3923_v12 = vmul.f32 0.5, %v3915_v48 }
 0x7f8   : > { %v3931_v32 = vmul.f32 %v3927_v24, %v3915_v48  ;;  %4674 = vtanh.f32 %v3942_v23 }
 0x7fa   : > { %v3935_v53 = vmul.f32 %v3931_v32, %v3915_v48 }
 0x7fc   : > { %v3939_v5 = vadd.f32 %v3935_v53, %v3915_v48 }
 0x7fe   : > { %v3943_v1 = vmul.f32 0.7978846, %v3939_v5  ;;  %v4675_v41 = vpop.eup %4674 }
 0x7ff   : > { %v3950_v20 = vadd.f32 1.0, %v4675_v41 }
 0x800   : > { %4676 = vtanh.f32 %v3943_v1 }
 0x801   : > { %v3954_v49 = vmul.f32 %v3950_v20, %v3922_v2 }
 0x806   : > { %v4677_v38 = vpop.eup %4676 }
 0x807   : > { %v3951_v35 = vadd.f32 1.0, %v4677_v38 }
 0x809   : > { %v3955_v42 = vmul.f32 %v3951_v35, %v3923_v12 }
 0x80b   : > { %v3958_v33 = vpack.c.bf16 %v3955_v42, %v3954_v49 }
 0x80d   : > { %4032 = vmatmul.bf16.vlgmr.msrb.gmra.mxu0 %v3958_v33 }
 0x853   : > { %v3917_v52 = vpop.f32.mrf.mxu3 }
 0x854   : > { %v3918_v13 = vadd.f32 %v4590_v62, %v3917_v52 }
 0x856   : > { %v3928_v61 = vmul.f32 0.044715, %v3918_v13  ;;  %v3924_v21 = vmul.f32 0.5, %v3918_v13 }
 0x858   : > { %v3932_v6 = vmul.f32 %v3928_v61, %v3918_v13 }
 0x85a   : > { %v3936_v29 = vmul.f32 %v3932_v6, %v3918_v13 }
 0x85b   : > { %v3919_v47 = vpop.f32.mrf.mxu3 }
 0x85c   : > { %v3920_v3 = vadd.f32 %v4590_v62, %v3919_v47  ;;  %v3940_v58 = vadd.f32 %v3936_v29, %v3918_v13 }
 0x85e   : > { %v3929_v51 = vmul.f32 0.044715, %v3920_v3  ;;  %v3944_v28 = vmul.f32 0.7978846, %v3940_v58  ;;  %v3925_v8 = vmul.f32 0.5, %v3920_v3 }
 0x860   : > { %v3933_v16 = vmul.f32 %v3929_v51, %v3920_v3  ;;  %4678 = vtanh.f32 %v3944_v28 }
 0x862   : > { %v3937_v36 = vmul.f32 %v3933_v16, %v3920_v3 }
 0x864   : > { %v3941_v9 = vadd.f32 %v3937_v36, %v3920_v3 }
 0x866   : > { %v3945_v15 = vmul.f32 0.7978846, %v3941_v9  ;;  %v4679_v55 = vpop.eup %4678 }
 0x867   : > { %v3952_v37 = vadd.f32 1.0, %v4679_v55 }
 0x868   : > { %4680 = vtanh.f32 %v3945_v15 }
 0x869   : > { %v3956_v59 = vmul.f32 %v3952_v37, %v3924_v21 }
 0x86e   : > { %v4681_v57 = vpop.eup %4680 }
 0x86f   : > { %v3953_v46 = vadd.f32 1.0, %v4681_v57 }
 0x871   : > { %v3957_v39 = vmul.f32 %v3953_v46, %v3925_v8 }
 0x873   : > { %v3959_v44 = vpack.c.bf16 %v3957_v39, %v3956_v59 }
 0x875   : > { %4037 = vmatmul.bf16.gmra.mxu0 %v3959_v44 }
 0x88a   : > { %v4033_v31 = vpop.f32.mrf.mxu0 }
 0x88b   : > { %v4043_v14 = vadd.f32 %v4033_v31, %v6702_v26 }
 0x88d   : > { %v4051_v25 = vadd.f32 %v4591_v19, %v4043_v14 }
 0x892   : > { %v4035_v0 = vpop.f32.mrf.mxu0 }
 0x893   : > { %v4044_v10 = vadd.f32 %v4035_v0, %v6706_v17 }
 0x895   : > { %v4052_v18 = vadd.f32 %v4591_v19, %v4044_v10 }
 0x8f2   : > { %v4038_v40 = vpop.f32.mrf.mxu0 }
 0x8f3   : > { %v4045_v22 = vadd.f32 %v4038_v40, %v6710_v56 }
 0x8f5   : > { %v4053_v43 = vadd.f32 %v4591_v19, %v4045_v22 }
 0x8f9   : > { %4058 = sbr.rel (%p4433_p9) target bundleno = 2306 (0x902), region = 72 }
 0x8fa   : > { %v4040_v62 = vpop.f32.mrf.mxu0 }
 0x8fb   : > { %v4046_v34 = vadd.f32 %v4040_v62, %v6714_v45 }
 0x8fd   : > { %v4054_v54 = vadd.f32 %v4591_v19, %v4046_v34 }
 0x8fe   : > { %4059 = vst.msk [vmem:[#allocation5] sm:$0xff] %vm528_vm1, %v4051_v25 }
 0x8ff   : > { %4060 = vst.msk [vmem:[#allocation5 + $0x8] sm:$0xff] %vm528_vm1, %v4052_v18 }
 0x900   : > { %4061 = vst.msk [vmem:[#allocation5 + $0x10] sm:$0xff] %vm528_vm1, %v4053_v43 }
 0x901   : > { %4062 = vst.msk [vmem:[#allocation5 + $0x18] sm:$0xff] %vm528_vm1, %v4054_v54 }
 0x902 PF: > { %p4434_p10 = scmp.ne.s32.totalorder %s4775_s13, 1 }
 0x904   : > { %4066 = sbr.rel (%p4434_p10) target bundleno = 2591 (0xa1f), region = 76 }
 0x909   : > { %v4074_v26 = vsel %vm528_vm1, %v4053_v43, 0.0  ;;  %v4068_v17 = vsel %vm528_vm1, %v4051_v25, 0.0  ;;  %v4077_v56 = vsel %vm528_vm1, %v4054_v54, 0.0  ;;  %v4071_v45 = vsel %vm528_vm1, %v4052_v18, 0.0  ;;  %v6911_v30 = vld [vmem:[#allocation9_spill] sm:$0xff] }
 0x90a   : > { %4075 = vadd.xlane.f32.xlu1 %v4074_v26  ;;  %4069 = vadd.xlane.f32.xlu0 %v4068_v17  ;;  %v4067_v21 = vld [vmem:[%s6839_s9] sm:$0x3] }
 0x90b   : > { %v4156_v31 = vperm.slane %v4067_v21, 0  ;;  %v4161_v40 = vperm.slane %v4067_v21, 1 }
 0x912   : > { %4078 = vadd.xlane.f32.xlu1 %v4077_v56  ;;  %4072 = vadd.xlane.f32.xlu0 %v4071_v45 }
 0x97d   : > { %v4076_v27 = vpop.xlane.xlu1 %4075  ;;  %v4070_v11 = vpop.xlane.xlu0 %4069 }
 0x97e   : > { %v4082_v50 = vmul.f32 %v4076_v27, %v6911_v30  ;;  %v4080_v7 = vmul.f32 %v4070_v11, %v6911_v30 }
 0x980   : > { %v6783_v4 = vsub.f32 %v4053_v43, %v4082_v50  ;;  %v4084_v63 = vsub.f32 %v4051_v25, %v4080_v7 }
 0x982   : > { %v4090_v60 = vmul.f32 %v6783_v4, %v6783_v4  ;;  %v4088_v48 = vmul.f32 %v4084_v63, %v4084_v63 }
 0x984   : > { %v4098_v24 = vsel %vm528_vm1, %v4090_v60, 0.0  ;;  %v4092_v23 = vsel %vm528_vm1, %v4088_v48, 0.0 }
 0x985   : > { %v4079_v32 = vpop.xlane.xlu1 %4078  ;;  %4099 = vadd.xlane.f32.xlu0 %v4098_v24  ;;  %4093 = vadd.xlane.f32.xlu2 %v4092_v23  ;;  %v4073_v53 = vpop.xlane.xlu0 %4072 }
 0x986   : > { %v4083_v5 = vmul.f32 %v4079_v32, %v6911_v30  ;;  %v4081_v1 = vmul.f32 %v4073_v53, %v6911_v30 }
 0x988   : > { %v6791_v41 = vsub.f32 %v4054_v54, %v4083_v5  ;;  %v6793_v20 = vsub.f32 %v4052_v18, %v4081_v1 }
 0x98a   : > { %v4091_v38 = vmul.f32 %v6791_v41, %v6791_v41  ;;  %v4089_v2 = vmul.f32 %v6793_v20, %v6793_v20 }
 0x98c   : > { %v4101_v12 = vsel %vm528_vm1, %v4091_v38, 0.0  ;;  %v4095_v35 = vsel %vm528_vm1, %v4089_v2, 0.0 }
 0x98d   : > { %4102 = vadd.xlane.f32.xlu1 %v4101_v12  ;;  %4096 = vadd.xlane.f32.xlu2 %v4095_v35 }
 0x9f8   : > { %v4094_v49 = vpop.xlane.xlu2 %4093  ;;  %v4100_v42 = vpop.xlane.xlu0 %4099 }
 0x9f9   : > { %v4104_v33 = vmul.f32 %v4094_v49, %v6911_v30  ;;  %v4106_v52 = vmul.f32 %v4100_v42, %v6911_v30 }
 0x9fb   : > { %v4108_v13 = vadd.f32 1e-05, %v4104_v33  ;;  %v4110_v61 = vadd.f32 1e-05, %v4106_v52 }
 0x9fd   : > { %4687 = vrsqrt.f32 %v4108_v13  ;;  %vm4118_vm7 = vweird.f32 %v4108_v13  ;;  %vm4138_vm0 = vweird.f32 %v4110_v61 }
 0x9fe   : > { %4689 = vrsqrt.f32 %v4110_v61 }
 0xa00   : > { %v4103_v6 = vpop.xlane.xlu1 %4102  ;;  %v4097_v29 = vpop.xlane.xlu2 %4096 }
 0xa01   : > { %v4107_v47 = vmul.f32 %v4103_v6, %v6911_v30  ;;  %v4105_v3 = vmul.f32 %v4097_v29, %v6911_v30 }
 0xa03   : > { %v4688_v58 = vpop.eup %4687  ;;  %v4111_v51 = vadd.f32 1e-05, %v4107_v47  ;;  %v4109_v16 = vadd.f32 1e-05, %v4105_v3 }
 0xa04   : > { %v4690_v28 = vpop.eup %4689  ;;  %v4113_v36 = vmul.f32 %v4688_v58, %v4108_v13  ;;  %vm4119_vm5 = vweird.f32 %v4688_v58 }
 0xa05   : > { %v4133_v9 = vmul.f32 %v4690_v28, %v4110_v61  ;;  %4691 = vrsqrt.f32 %v4111_v51  ;;  %vm4139_vm6 = vweird.f32 %v4690_v28  ;;  %vm4120_vm15 = vmor %vm4118_vm7, %vm4119_vm5  ;;  %vm4148_vm2 = vweird.f32 %v4111_v51 }
 0xa06   : > { %v4114_v15 = vmul.f32 %v4688_v58, %v4113_v36  ;;  %4693 = vrsqrt.f32 %v4109_v16  ;;  %vm4140_vm8 = vmor %vm4138_vm0, %vm4139_vm6  ;;  %vm4128_vm12 = vweird.f32 %v4109_v16 }
 0xa07   : > { %v4134_v55 = vmul.f32 %v4690_v28, %v4133_v9 }
 0xa08   : > { %v4115_v37 = vmul.f32 0.5, %v4114_v15 }
 0xa09   : > { %v4135_v57 = vmul.f32 0.5, %v4134_v55 }
 0xa0a   : > { %v4116_v8 = vsub.f32 1.5, %v4115_v37 }
 0xa0b   : > { %v4692_v46 = vpop.eup %4691  ;;  %v4136_v59 = vsub.f32 1.5, %v4135_v57 }
 0xa0c   : > { %v4694_v39 = vpop.eup %4693  ;;  %v4117_v44 = vmul.f32 %v4688_v58, %v4116_v8  ;;  %v4143_v19 = vmul.f32 %v4692_v46, %v4111_v51  ;;  %vm4149_vm9 = vweird.f32 %v4692_v46 }
 0xa0d   : > { %v4137_v14 = vmul.f32 %v4690_v28, %v4136_v59  ;;  %v4123_v25 = vmul.f32 %v4694_v39, %v4109_v16  ;;  %vm4129_vm10 = vweird.f32 %v4694_v39  ;;  %vm4150_vm11 = vmor %vm4148_vm2, %vm4149_vm9 }
 0xa0e   : > { %v4121_v0 = vsel %vm4120_vm15, %v4688_v58, %v4117_v44  ;;  %v4144_v10 = vmul.f32 %v4692_v46, %v4143_v19  ;;  %vm4130_vm13 = vmor %vm4128_vm12, %vm4129_vm10 }
 0xa0f   : > { %v4152_v18 = vmul.f32 %v4121_v0, %v4084_v63  ;;  %v4141_v22 = vsel %vm4140_vm8, %v4690_v28, %v4137_v14  ;;  %v4124_v43 = vmul.f32 %v4694_v39, %v4123_v25 }
 0xa10   : > { %v4154_v62 = vmul.f32 %v4141_v22, %v6783_v4  ;;  %v4145_v34 = vmul.f32 0.5, %v4144_v10 }
 0xa11   : > { %v4157_v54 = vmul.f32 %v4156_v31, %v4152_v18  ;;  %v4125_v26 = vmul.f32 0.5, %v4124_v43 }
 0xa12   : > { %v4159_v17 = vmul.f32 %v4156_v31, %v4154_v62  ;;  %v4146_v56 = vsub.f32 1.5, %v4145_v34 }
 0xa13   : > { %v4162_v45 = vadd.f32 %v4161_v40, %v4157_v54  ;;  %v4126_v27 = vsub.f32 1.5, %v4125_v26 }
 0xa14   : > { %v4164_v11 = vadd.f32 %v4161_v40, %v4159_v17  ;;  %v4147_v30 = vmul.f32 %v4692_v46, %v4146_v56 }
 0xa15   : > { %4166 = vst.msk [vmem:[#allocation5] sm:$0xff] %vm528_vm1, %v4162_v45  ;;  %v4127_v50 = vmul.f32 %v4694_v39, %v4126_v27 }
 0xa16   : > { %4168 = vst.msk [vmem:[#allocation5 + $0x10] sm:$0xff] %vm528_vm1, %v4164_v11  ;;  %v4151_v7 = vsel %vm4150_vm11, %v4692_v46, %v4147_v30 }
 0xa17   : > { %v4155_v4 = vmul.f32 %v4151_v7, %v6791_v41  ;;  %v4131_v63 = vsel %vm4130_vm13, %v4694_v39, %v4127_v50 }
 0xa18   : > { %v4153_v60 = vmul.f32 %v4131_v63, %v6793_v20 }
 0xa19   : > { %v4160_v48 = vmul.f32 %v4156_v31, %v4155_v4 }
 0xa1a   : > { %v4158_v24 = vmul.f32 %v4156_v31, %v4153_v60 }
 0xa1b   : > { %v4165_v23 = vadd.f32 %v4161_v40, %v4160_v48 }
 0xa1c   : > { %v4163_v32 = vadd.f32 %v4161_v40, %v4158_v24 }
 0xa1d   : > { %4169 = vst.msk [vmem:[#allocation5 + $0x18] sm:$0xff] %vm528_vm1, %v4165_v23 }
 0xa1e   : > { %4167 = vst.msk [vmem:[#allocation5 + $0x8] sm:$0xff] %vm528_vm1, %v4163_v32 }
 0xa1f PF: > { %s6912_s30 = sadd.s32 4294967295, %s4783_s15   ;;  %s4180_s29 = sshll.u32 %s6840_s10, 4  ;;  %s4181_s29 = int_to_ptr.hbm [resolvable:$true] %s4180_s29 }
 0xa20   : > { %p4471_p11 = scmp.eq.s32.totalorder %s6912_s30, 1  ;;  %s4805_s12 = smov [#allocation5]  }
 0xa21   : > { %s4178_s21 = sshll.u32 %s4805_s12, 4  ;;  %s4806_s22 = smov 128   ;;  %s4179_s21 = int_to_ptr.vmem [resolvable:$true] %s4178_s21 }
 0xa22   : > { %4462 = dma.vmem_to_hbm [thread:$0]  (%p4471_p11), %s4179_s21, 512, %s4181_s29, [#allocation4], %s4806_s22, %s4806_s22, %s4804_s0  }
 0xa23   : > { %4770 = dma.done.wait (%p4471_p11), [#allocation4], 512  }
 0xa24   : > { %4772 = vsyncadd (%p4471_p11), [#allocation4], 4294966784 }
 0xa25 PF: > { %s22_s15 = sadd.s32 1, %s4783_s15   ;;  %s6913_s24 = sld [smem:[#allocation8_spill]] }
 0xa26   : > { %p19_p12 = scmp.ge.s32.totalorder %s22_s15, 4   ;;  %s6914_s13 = smov %s4779_s14 }
 0xa28   :  { %21 = sbr.rel (!%p19_p12) target bundleno = 7 (0x7), region = 127 }
 0xa2b   : > { %s6915_s14 = smov %s6913_s24 }
 0xa2d   :  { %4197 = vsyncpa [#allocation3], 1 }
 0xa2e   :  { %4199 = vsyncpa [#allocation3 + $0x1], 1 }
 0xa2f   :  { %4200 = vsyncpa [#allocation4], 1 }
 0xa30   :  { %4202 = vsyncpa [#allocation4 + $0x1], 1 }

</bundles_post_ra>
